<compile_context>
chip_gen: v7x
topology: tpu7x:2x2x1
jax: 0.10.0
libtpu: 0.0.40
codegen_flags: <defaults>
</compile_context>

<pallas_src>
import functools

import jax
import jax.numpy as jnp
from jax import lax
from jax.experimental import pallas as pl
from jax.experimental.pallas import tpu as pltpu

EPS = 1e-5          # InstanceNorm2d default eps
NEG_SLOPE = 0.01    # nn.LeakyReLU default negative_slope
LANE = 128          # lane width: pad channels to a multiple of this


def _round_up(x, m):
    return ((x + m - 1) // m) * m


def _leaky(y):
    return jnp.where(y >= 0, y, NEG_SLOPE * y)


def _instance_norm(y, gamma, beta, inv_hw):
    # Two-pass statistics in f32 (stable, no E[x^2]-E[x]^2 cancellation).
    mean = jnp.sum(y, axis=0, keepdims=True) * inv_hw
    d = y - mean
    var = jnp.sum(d * d, axis=0, keepdims=True) * inv_hw
    return d * lax.rsqrt(var + EPS) * gamma + beta


def resblock_kernel(patch_ref, w1_ref, w2_ref, w3_ref, vec_ref, out_ref, *, H, W, K):
    HW = H * W
    Co = out_ref.shape[-1]                 # Cout_p (lane-dense)
    inv_hw = jnp.float32(1.0 / HW)

    b1 = vec_ref[0:1]
    g1 = vec_ref[1:2]
    be1 = vec_ref[2:3]
    b2 = vec_ref[3:4]
    g2 = vec_ref[4:5]
    be2 = vec_ref[5:6]
    b3 = vec_ref[6:7]

    # Pre-gathered conv1 im2col patch (bf16, lane-dense): (HW, P1).
    patch = patch_ref[0].reshape(HW, patch_ref.shape[-1])

    # conv1 and the 1x1 shortcut share the same patch -> two bf16 MXU matmuls
    # with f32 accumulation.
    y = jnp.dot(patch, w1_ref[...], preferred_element_type=jnp.float32) + b1
    res = jnp.dot(patch, w3_ref[...], preferred_element_type=jnp.float32) + b3

    # InstanceNorm1 + LeakyReLU (f32).
    y = _leaky(_instance_norm(y, g1, be1, inv_hw))

    # conv2: 9 shifted taps built with XLU rolls + VPU border masks (no padded
    # scratch, no relayout copies), accumulated as 9 small bf16 MXU matmuls.
    hh = lax.broadcasted_iota(jnp.int32, (H, W, Co), 0).reshape(HW, Co)
    ww = lax.broadcasted_iota(jnp.int32, (H, W, Co), 1).reshape(HW, Co)
    not_top = hh > 0
    not_bot = hh < H - 1
    not_left = ww > 0
    not_right = ww < W - 1

    acc = jnp.zeros((HW, Co), jnp.float32)
    for kh in range(K):
        for kw in range(K):
            dh = kh - K // 2
            dw = kw - K // 2
            if dh == 0 and dw == 0:
                tap = y                                    # center tap: no shift/mask
            else:
                off = dh * W + dw                          # flat index delta
                # tap[i] = y[(i + off) % HW]  (wrap positions are masked below)
                tap = pltpu.roll(y, shift=(-off) % HW, axis=0)
                mask = None
                if dh < 0:
                    mask = not_top
                elif dh > 0:
                    mask = not_bot
                if dw < 0:
                    mask = not_left if mask is None else (mask & not_left)
                elif dw > 0:
                    mask = not_right if mask is None else (mask & not_right)
                tap = jnp.where(mask, tap, 0.0)
            acc = acc + jnp.dot(tap.astype(jnp.bfloat16), w2_ref[kh * K + kw],
                                preferred_element_type=jnp.float32)

    # InstanceNorm2 (f32), residual add, LeakyReLU; lane-dense store.
    y2 = _instance_norm(acc + b2, g2, be2, inv_hw)
    out = _leaky(y2 + res)
    out_ref[0] = out.reshape(H, W, Co).astype(out_ref.dtype)


def basic_res_block(x_nchw, params, *, K=3):
    """x_nchw: (N, Cin, H, W) float32. Returns (N, Cout, H, W) float32."""
    x = jnp.transpose(x_nchw, (0, 2, 3, 1))            # NCHW -> NHWC
    N, H, W, Cin = x.shape
    Cout = params["w1"].shape[0]                        # torch layout (Cout, Cin, K, K)
    P1 = _round_up(K * K * Cin, LANE)                   # conv1 contraction (128 here)
    Cout_p = _round_up(Cout, LANE)

    # Wrapper-side im2col for conv1: (N, H, W, K*K*Cin) -> pad to P1 lanes -> bf16.
    xp = jnp.pad(x, ((0, 0), (1, 1), (1, 1), (0, 0)))
    taps = [xp[:, dh:dh + H, dw:dw + W, :] for dh in range(K) for dw in range(K)]
    patch = jnp.concatenate(taps, axis=-1)
    patch = jnp.pad(patch, ((0, 0), (0, 0), (0, 0), (0, P1 - K * K * Cin)))
    patch = patch.astype(jnp.bfloat16)

    # conv1 weight: torch (Cout, Cin, K, K) -> (P1, Cout_p), rows ordered (kh, kw, cin).
    w1 = jnp.transpose(params["w1"], (2, 3, 1, 0)).reshape(K * K * Cin, Cout)
    w1 = jnp.pad(w1, ((0, P1 - K * K * Cin), (0, Cout_p - Cout))).astype(jnp.bfloat16)

    # 1x1 shortcut folded onto the same patch: only the center-tap rows are nonzero.
    center = (K // 2) * K + (K // 2)
    w3 = jnp.transpose(params["w3"][:, :, 0, 0], (1, 0))          # (Cin, Cout)
    w3e = jnp.zeros((P1, Cout_p), jnp.float32)
    w3e = w3e.at[center * Cin:center * Cin + Cin, :Cout].set(w3)
    w3e = w3e.astype(jnp.bfloat16)

    # conv2 weights: one (Cout_p, Cout_p) matrix per tap -> (K*K, Cout_p, Cout_p).
    w2 = jnp.transpose(params["w2"], (2, 3, 1, 0)).reshape(K * K, Cout, Cout)
    w2 = jnp.pad(w2, ((0, 0), (0, Cout_p - Cout), (0, Cout_p - Cout)))
    w2 = w2.astype(jnp.bfloat16)

    # Pack the seven per-channel vectors into a single (8, Cout_p) f32 tile.
    def pad_vec(v):
        return jnp.pad(v, (0, Cout_p - Cout))

    vecs = jnp.stack([pad_vec(params["b1"]), pad_vec(params["gamma1"]),
                      pad_vec(params["beta1"]), pad_vec(params["b2"]),
                      pad_vec(params["gamma2"]), pad_vec(params["beta2"]),
                      pad_vec(params["b3"]),
                      jnp.zeros((Cout_p,), jnp.float32)], axis=0)

    out = pl.pallas_call(
        functools.partial(resblock_kernel, H=H, W=W, K=K),
        out_shape=jax.ShapeDtypeStruct((N, H, W, Cout_p), jnp.float32),
        grid_spec=pltpu.PrefetchScalarGridSpec(
            num_scalar_prefetch=0,
            grid=(N,),
            in_specs=[
                pl.BlockSpec((1, H, W, P1), lambda n: (n, 0, 0, 0)),
                pl.BlockSpec((P1, Cout_p), lambda n: (0, 0)),
                pl.BlockSpec((K * K, Cout_p, Cout_p), lambda n: (0, 0, 0)),
                pl.BlockSpec((P1, Cout_p), lambda n: (0, 0)),
                pl.BlockSpec((8, Cout_p), lambda n: (0, 0)),
            ],
            out_specs=pl.BlockSpec((1, H, W, Cout_p), lambda n: (n, 0, 0, 0)),
        ),
        compiler_params=pltpu.CompilerParams(
            dimension_semantics=("parallel",),       # batch independent; megacore on v7x
            vmem_limit_bytes=48 * 1024 * 1024,       # headroom below v7x's 64 MiB
        ),
    )(patch, w1, w2, w3e, vecs)

    out = out[..., :Cout]                                # drop lane padding
    return jnp.transpose(out, (0, 3, 1, 2))              # NHWC -> NCHW


# ---------------- pure-JAX reference (for correctness check) ----------------
def _conv2d_ref(x, w, b, stride=1, padding=1):
    y = lax.conv_general_dilated(
        x, w, window_strides=(stride, stride),
        padding=[(padding, padding), (padding, padding)],
        dimension_numbers=("NCHW", "OIHW", "NCHW"))
    return y + b[None, :, None, None]


def _inorm_ref(y, gamma, beta):
    mean = jnp.mean(y, axis=(2, 3), keepdims=True)
    var = jnp.mean((y - mean) ** 2, axis=(2, 3), keepdims=True)
    return (y - mean) * lax.rsqrt(var + EPS) * gamma[None, :, None, None] \
        + beta[None, :, None, None]


def _leaky_ref(y):
    return jnp.where(y >= 0, y, NEG_SLOPE * y)


def basic_res_block_ref(x, p):
    y = _conv2d_ref(x, p["w1"], p["b1"])
    y = _leaky_ref(_inorm_ref(y, p["gamma1"], p["beta1"]))
    y = _inorm_ref(_conv2d_ref(y, p["w2"], p["b2"]), p["gamma2"], p["beta2"])
    sc = _conv2d_ref(x, p["w3"], p["b3"], padding=0)
    return _leaky_ref(y + sc)


if __name__ == "__main__":
    N, Cin, H, W = 2, 4, 16, 16
    Cout, K = 8, 3

    key = jax.random.PRNGKey(0)
    keys = jax.random.split(key, 12)
    x = jax.random.normal(keys[0], (N, Cin, H, W), jnp.float32)

    params = {
        "w1": 0.1 * jax.random.normal(keys[1], (Cout, Cin, K, K), jnp.float32),
        "b1": 0.05 * jax.random.normal(keys[2], (Cout,), jnp.float32),
        "gamma1": 1.0 + 0.1 * jax.random.normal(keys[3], (Cout,), jnp.float32),
        "beta1": 0.1 * jax.random.normal(keys[4], (Cout,), jnp.float32),
        "w2": 0.1 * jax.random.normal(keys[5], (Cout, Cout, K, K), jnp.float32),
        "b2": 0.05 * jax.random.normal(keys[6], (Cout,), jnp.float32),
        "gamma2": 1.0 + 0.1 * jax.random.normal(keys[7], (Cout,), jnp.float32),
        "beta2": 0.1 * jax.random.normal(keys[8], (Cout,), jnp.float32),
        "w3": 0.1 * jax.random.normal(keys[9], (Cout, Cin, 1, 1), jnp.float32),
        "b3": 0.05 * jax.random.normal(keys[10], (Cout,), jnp.float32),
    }

    out = jax.jit(basic_res_block)(x, params)
    out = jax.block_until_ready(out)

    ref = jax.block_until_ready(basic_res_block_ref(x, params))
    assert out.shape == (N, Cout, H, W), out.shape
    # bf16 MXU operands -> tolerance a bit above the ~1e-2 bf16 rounding floor;
    # a structural bug (roll direction, mask, layout) would show errors O(1).
    assert jnp.allclose(out, ref, atol=5e-2, rtol=5e-2), \
        f"max abs err {jnp.max(jnp.abs(out - ref))}"

    print("KERNEL_OK")
</pallas_src>

<mosaic_0001>
module attributes {stable_mosaic.version = 11 : i64} {
  func.func @resblock_kernel(%arg0: i32, %arg1: memref<1x16x16x128xbf16, #tpu.memory_space<vmem>>, %arg2: memref<128x128xbf16, #tpu.memory_space<vmem>>, %arg3: memref<9x128x128xbf16, #tpu.memory_space<vmem>>, %arg4: memref<128x128xbf16, #tpu.memory_space<vmem>>, %arg5: memref<8x128xf32, #tpu.memory_space<vmem>>, %arg6: memref<1x16x16x128xf32, #tpu.memory_space<vmem>>) attributes {dimension_semantics = [#tpu.dimension_semantics<parallel>], iteration_bounds = array<i64: 2>, scalar_prefetch = 0 : i64, scratch_operands = 0 : i64, tpu.core_type = #tpu.core_type<tc>, window_params = [{transform_indices = @transform_0, window_bounds = array<i64: 1, 16, 16, 128>}, {pipeline_mode = #tpu.pipeline_mode<synchronous>, transform_indices = @transform_1, window_bounds = array<i64: 128, 128>}, {pipeline_mode = #tpu.pipeline_mode<synchronous>, transform_indices = @transform_2, window_bounds = array<i64: 9, 128, 128>}, {pipeline_mode = #tpu.pipeline_mode<synchronous>, transform_indices = @transform_3, window_bounds = array<i64: 128, 128>}, {pipeline_mode = #tpu.pipeline_mode<synchronous>, transform_indices = @transform_4, window_bounds = array<i64: 8, 128>}, {transform_indices = @transform_5, window_bounds = array<i64: 1, 16, 16, 128>}]} {
    %c0 = arith.constant 0 : index
    %c0_0 = arith.constant 0 : index
    %0 = vector.load %arg5[%c0, %c0_0] : memref<8x128xf32, #tpu.memory_space<vmem>>, vector<1x128xf32>
    %c1 = arith.constant 1 : index
    %c0_1 = arith.constant 0 : index
    %1 = vector.load %arg5[%c1, %c0_1] : memref<8x128xf32, #tpu.memory_space<vmem>>, vector<1x128xf32>
    %c2 = arith.constant 2 : index
    %c0_2 = arith.constant 0 : index
    %2 = vector.load %arg5[%c2, %c0_2] : memref<8x128xf32, #tpu.memory_space<vmem>>, vector<1x128xf32>
    %c3 = arith.constant 3 : index
    %c0_3 = arith.constant 0 : index
    %3 = vector.load %arg5[%c3, %c0_3] : memref<8x128xf32, #tpu.memory_space<vmem>>, vector<1x128xf32>
    %c4 = arith.constant 4 : index
    %c0_4 = arith.constant 0 : index
    %4 = vector.load %arg5[%c4, %c0_4] : memref<8x128xf32, #tpu.memory_space<vmem>>, vector<1x128xf32>
    %c5 = arith.constant 5 : index
    %c0_5 = arith.constant 0 : index
    %5 = vector.load %arg5[%c5, %c0_5] : memref<8x128xf32, #tpu.memory_space<vmem>>, vector<1x128xf32>
    %c6 = arith.constant 6 : index
    %c0_6 = arith.constant 0 : index
    %6 = vector.load %arg5[%c6, %c0_6] : memref<8x128xf32, #tpu.memory_space<vmem>>, vector<1x128xf32>
    %c0_7 = arith.constant 0 : index
    %c0_8 = arith.constant 0 : index
    %c0_9 = arith.constant 0 : index
    %c0_10 = arith.constant 0 : index
    %7 = vector.load %arg1[%c0_7, %c0_8, %c0_9, %c0_10] : memref<1x16x16x128xbf16, #tpu.memory_space<vmem>>, vector<1x16x16x128xbf16>
    %8 = vector.shape_cast %7 : vector<1x16x16x128xbf16> to vector<16x16x128xbf16>
    %9 = vector.shape_cast %8 : vector<16x16x128xbf16> to vector<256x128xbf16>
    %c0_11 = arith.constant 0 : index
    %c0_12 = arith.constant 0 : index
    %10 = vector.load %arg2[%c0_11, %c0_12] : memref<128x128xbf16, #tpu.memory_space<vmem>>, vector<128x128xbf16>
    %cst = arith.constant dense<0.000000e+00> : vector<256x128xf32>
    %11 = tpu.matmul %9, %10, %cst {dimension_numbers = #tpu.dot_dimension_numbers<[1], [0], [0], [1], [0, 0, 1, 1], [], []>} : vector<256x128xbf16>, vector<128x128xbf16>, vector<256x128xf32> -> vector<256x128xf32>
    %12 = vector.broadcast %0 : vector<1x128xf32> to vector<256x128xf32>
    %13 = arith.addf %11, %12 : vector<256x128xf32>
    %c0_13 = arith.constant 0 : index
    %c0_14 = arith.constant 0 : index
    %14 = vector.load %arg4[%c0_13, %c0_14] : memref<128x128xbf16, #tpu.memory_space<vmem>>, vector<128x128xbf16>
    %cst_15 = arith.constant dense<0.000000e+00> : vector<256x128xf32>
    %15 = tpu.matmul %9, %14, %cst_15 {dimension_numbers = #tpu.dot_dimension_numbers<[1], [0], [0], [1], [0, 0, 1, 1], [], []>} : vector<256x128xbf16>, vector<128x128xbf16>, vector<256x128xf32> -> vector<256x128xf32>
    %16 = vector.broadcast %6 : vector<1x128xf32> to vector<256x128xf32>
    %17 = arith.addf %15, %16 : vector<256x128xf32>
    %cst_16 = arith.constant dense<0.000000e+00> : vector<128xf32>
    %18 = vector.multi_reduction <add>, %13, %cst_16 [0] : vector<256x128xf32> to vector<128xf32>
    %19 = vector.shape_cast %18 : vector<128xf32> to vector<1x128xf32>
    %cst_17 = arith.constant 3.906250e-03 : f32
    %20 = vector.broadcast %cst_17 : f32 to vector<1x128xf32>
    %21 = arith.mulf %19, %20 : vector<1x128xf32>
    %22 = vector.broadcast %21 : vector<1x128xf32> to vector<256x128xf32>
    %23 = arith.subf %13, %22 : vector<256x128xf32>
    %24 = arith.mulf %23, %23 : vector<256x128xf32>
    %cst_18 = arith.constant dense<0.000000e+00> : vector<128xf32>
    %25 = vector.multi_reduction <add>, %24, %cst_18 [0] : vector<256x128xf32> to vector<128xf32>
    %26 = vector.shape_cast %25 : vector<128xf32> to vector<1x128xf32>
    %cst_19 = arith.constant 3.906250e-03 : f32
    %27 = vector.broadcast %cst_19 : f32 to vector<1x128xf32>
    %28 = arith.mulf %26, %27 : vector<1x128xf32>
    %cst_20 = arith.constant 9.99999974E-6 : f32
    %29 = vector.broadcast %cst_20 : f32 to vector<1x128xf32>
    %30 = arith.addf %28, %29 : vector<1x128xf32>
    %31 = math.rsqrt %30 : vector<1x128xf32>
    %32 = vector.broadcast %31 : vector<1x128xf32> to vector<256x128xf32>
    %33 = arith.mulf %23, %32 : vector<256x128xf32>
    %34 = vector.broadcast %1 : vector<1x128xf32> to vector<256x128xf32>
    %35 = arith.mulf %33, %34 : vector<256x128xf32>
    %36 = vector.broadcast %2 : vector<1x128xf32> to vector<256x128xf32>
    %37 = arith.addf %35, %36 : vector<256x128xf32>
    %cst_21 = arith.constant 0.000000e+00 : f32
    %38 = vector.broadcast %cst_21 : f32 to vector<256x128xf32>
    %39 = arith.cmpf oge, %37, %38 : vector<256x128xf32>
    %cst_22 = arith.constant 0.00999999977 : f32
    %40 = vector.broadcast %cst_22 : f32 to vector<256x128xf32>
    %41 = arith.mulf %40, %37 : vector<256x128xf32>
    %42 = arith.select %39, %37, %41 : vector<256x128xi1>, vector<256x128xf32>
    %43 = tpu.iota {dimensions = array<i32: 0>} : vector<16x16x128xi32>
    %44 = vector.shape_cast %43 : vector<16x16x128xi32> to vector<256x128xi32>
    %45 = tpu.iota {dimensions = array<i32: 1>} : vector<16x16x128xi32>
    %46 = vector.shape_cast %45 : vector<16x16x128xi32> to vector<256x128xi32>
    %c0_i32 = arith.constant 0 : i32
    %47 = vector.broadcast %c0_i32 : i32 to vector<256x128xi32>
    %48 = arith.cmpi sgt, %44, %47 : vector<256x128xi32>
    %c15_i32 = arith.constant 15 : i32
    %49 = vector.broadcast %c15_i32 : i32 to vector<256x128xi32>
    %50 = arith.cmpi slt, %44, %49 : vector<256x128xi32>
    %c0_i32_23 = arith.constant 0 : i32
    %51 = vector.broadcast %c0_i32_23 : i32 to vector<256x128xi32>
    %52 = arith.cmpi sgt, %46, %51 : vector<256x128xi32>
    %c15_i32_24 = arith.constant 15 : i32
    %53 = vector.broadcast %c15_i32_24 : i32 to vector<256x128xi32>
    %54 = arith.cmpi slt, %46, %53 : vector<256x128xi32>
    %cst_25 = arith.constant 0.000000e+00 : f32
    %55 = vector.broadcast %cst_25 : f32 to vector<256x128xf32>
    %c17_i32 = arith.constant 17 : i32
    %56 = tpu.dynamic_rotate %42 by %c17_i32 dim 0 : vector<256x128xf32>, i32 -> vector<256x128xf32>
    %57 = arith.andi %48, %52 : vector<256x128xi1>
    %cst_26 = arith.constant 0.000000e+00 : f32
    %58 = vector.broadcast %cst_26 : f32 to vector<256x128xf32>
    %59 = arith.select %57, %56, %58 : vector<256x128xi1>, vector<256x128xf32>
    %60 = arith.truncf %59 : vector<256x128xf32> to vector<256x128xbf16>
    %c0_27 = arith.constant 0 : index
    %c0_28 = arith.constant 0 : index
    %c0_29 = arith.constant 0 : index
    %61 = vector.load %arg3[%c0_27, %c0_28, %c0_29] : memref<9x128x128xbf16, #tpu.memory_space<vmem>>, vector<1x128x128xbf16>
    %62 = vector.shape_cast %61 : vector<1x128x128xbf16> to vector<128x128xbf16>
    %cst_30 = arith.constant dense<0.000000e+00> : vector<256x128xf32>
    %63 = tpu.matmul %60, %62, %cst_30 {dimension_numbers = #tpu.dot_dimension_numbers<[1], [0], [0], [1], [0, 0, 1, 1], [], []>} : vector<256x128xbf16>, vector<128x128xbf16>, vector<256x128xf32> -> vector<256x128xf32>
    %64 = arith.addf %55, %63 : vector<256x128xf32>
    %c16_i32 = arith.constant 16 : i32
    %65 = tpu.dynamic_rotate %42 by %c16_i32 dim 0 : vector<256x128xf32>, i32 -> vector<256x128xf32>
    %cst_31 = arith.constant 0.000000e+00 : f32
    %66 = vector.broadcast %cst_31 : f32 to vector<256x128xf32>
    %67 = arith.select %48, %65, %66 : vector<256x128xi1>, vector<256x128xf32>
    %68 = arith.truncf %67 : vector<256x128xf32> to vector<256x128xbf16>
    %c1_32 = arith.constant 1 : index
    %c0_33 = arith.constant 0 : index
    %c0_34 = arith.constant 0 : index
    %69 = vector.load %arg3[%c1_32, %c0_33, %c0_34] : memref<9x128x128xbf16, #tpu.memory_space<vmem>>, vector<1x128x128xbf16>
    %70 = vector.shape_cast %69 : vector<1x128x128xbf16> to vector<128x128xbf16>
    %cst_35 = arith.constant dense<0.000000e+00> : vector<256x128xf32>
    %71 = tpu.matmul %68, %70, %cst_35 {dimension_numbers = #tpu.dot_dimension_numbers<[1], [0], [0], [1], [0, 0, 1, 1], [], []>} : vector<256x128xbf16>, vector<128x128xbf16>, vector<256x128xf32> -> vector<256x128xf32>
    %72 = arith.addf %64, %71 : vector<256x128xf32>
    %c15_i32_36 = arith.constant 15 : i32
    %73 = tpu.dynamic_rotate %42 by %c15_i32_36 dim 0 : vector<256x128xf32>, i32 -> vector<256x128xf32>
    %74 = arith.andi %48, %54 : vector<256x128xi1>
    %cst_37 = arith.constant 0.000000e+00 : f32
    %75 = vector.broadcast %cst_37 : f32 to vector<256x128xf32>
    %76 = arith.select %74, %73, %75 : vector<256x128xi1>, vector<256x128xf32>
    %77 = arith.truncf %76 : vector<256x128xf32> to vector<256x128xbf16>
    %c2_38 = arith.constant 2 : index
    %c0_39 = arith.constant 0 : index
    %c0_40 = arith.constant 0 : index
    %78 = vector.load %arg3[%c2_38, %c0_39, %c0_40] : memref<9x128x128xbf16, #tpu.memory_space<vmem>>, vector<1x128x128xbf16>
    %79 = vector.shape_cast %78 : vector<1x128x128xbf16> to vector<128x128xbf16>
    %cst_41 = arith.constant dense<0.000000e+00> : vector<256x128xf32>
    %80 = tpu.matmul %77, %79, %cst_41 {dimension_numbers = #tpu.dot_dimension_numbers<[1], [0], [0], [1], [0, 0, 1, 1], [], []>} : vector<256x128xbf16>, vector<128x128xbf16>, vector<256x128xf32> -> vector<256x128xf32>
    %81 = arith.addf %72, %80 : vector<256x128xf32>
    %c1_i32 = arith.constant 1 : i32
    %82 = tpu.dynamic_rotate %42 by %c1_i32 dim 0 : vector<256x128xf32>, i32 -> vector<256x128xf32>
    %cst_42 = arith.constant 0.000000e+00 : f32
    %83 = vector.broadcast %cst_42 : f32 to vector<256x128xf32>
    %84 = arith.select %52, %82, %83 : vector<256x128xi1>, vector<256x128xf32>
    %85 = arith.truncf %84 : vector<256x128xf32> to vector<256x128xbf16>
    %c3_43 = arith.constant 3 : index
    %c0_44 = arith.constant 0 : index
    %c0_45 = arith.constant 0 : index
    %86 = vector.load %arg3[%c3_43, %c0_44, %c0_45] : memref<9x128x128xbf16, #tpu.memory_space<vmem>>, vector<1x128x128xbf16>
    %87 = vector.shape_cast %86 : vector<1x128x128xbf16> to vector<128x128xbf16>
    %cst_46 = arith.constant dense<0.000000e+00> : vector<256x128xf32>
    %88 = tpu.matmul %85, %87, %cst_46 {dimension_numbers = #tpu.dot_dimension_numbers<[1], [0], [0], [1], [0, 0, 1, 1], [], []>} : vector<256x128xbf16>, vector<128x128xbf16>, vector<256x128xf32> -> vector<256x128xf32>
    %89 = arith.addf %81, %88 : vector<256x128xf32>
    %90 = arith.truncf %42 : vector<256x128xf32> to vector<256x128xbf16>
    %c4_47 = arith.constant 4 : index
    %c0_48 = arith.constant 0 : index
    %c0_49 = arith.constant 0 : index
    %91 = vector.load %arg3[%c4_47, %c0_48, %c0_49] : memref<9x128x128xbf16, #tpu.memory_space<vmem>>, vector<1x128x128xbf16>
    %92 = vector.shape_cast %91 : vector<1x128x128xbf16> to vector<128x128xbf16>
    %cst_50 = arith.constant dense<0.000000e+00> : vector<256x128xf32>
    %93 = tpu.matmul %90, %92, %cst_50 {dimension_numbers = #tpu.dot_dimension_numbers<[1], [0], [0], [1], [0, 0, 1, 1], [], []>} : vector<256x128xbf16>, vector<128x128xbf16>, vector<256x128xf32> -> vector<256x128xf32>
    %94 = arith.addf %89, %93 : vector<256x128xf32>
    %c255_i32 = arith.constant 255 : i32
    %95 = tpu.dynamic_rotate %42 by %c255_i32 dim 0 : vector<256x128xf32>, i32 -> vector<256x128xf32>
    %cst_51 = arith.constant 0.000000e+00 : f32
    %96 = vector.broadcast %cst_51 : f32 to vector<256x128xf32>
    %97 = arith.select %54, %95, %96 : vector<256x128xi1>, vector<256x128xf32>
    %98 = arith.truncf %97 : vector<256x128xf32> to vector<256x128xbf16>
    %c5_52 = arith.constant 5 : index
    %c0_53 = arith.constant 0 : index
    %c0_54 = arith.constant 0 : index
    %99 = vector.load %arg3[%c5_52, %c0_53, %c0_54] : memref<9x128x128xbf16, #tpu.memory_space<vmem>>, vector<1x128x128xbf16>
    %100 = vector.shape_cast %99 : vector<1x128x128xbf16> to vector<128x128xbf16>
    %cst_55 = arith.constant dense<0.000000e+00> : vector<256x128xf32>
    %101 = tpu.matmul %98, %100, %cst_55 {dimension_numbers = #tpu.dot_dimension_numbers<[1], [0], [0], [1], [0, 0, 1, 1], [], []>} : vector<256x128xbf16>, vector<128x128xbf16>, vector<256x128xf32> -> vector<256x128xf32>
    %102 = arith.addf %94, %101 : vector<256x128xf32>
    %c241_i32 = arith.constant 241 : i32
    %103 = tpu.dynamic_rotate %42 by %c241_i32 dim 0 : vector<256x128xf32>, i32 -> vector<256x128xf32>
    %104 = arith.andi %50, %52 : vector<256x128xi1>
    %cst_56 = arith.constant 0.000000e+00 : f32
    %105 = vector.broadcast %cst_56 : f32 to vector<256x128xf32>
    %106 = arith.select %104, %103, %105 : vector<256x128xi1>, vector<256x128xf32>
    %107 = arith.truncf %106 : vector<256x128xf32> to vector<256x128xbf16>
    %c6_57 = arith.constant 6 : index
    %c0_58 = arith.constant 0 : index
    %c0_59 = arith.constant 0 : index
    %108 = vector.load %arg3[%c6_57, %c0_58, %c0_59] : memref<9x128x128xbf16, #tpu.memory_space<vmem>>, vector<1x128x128xbf16>
    %109 = vector.shape_cast %108 : vector<1x128x128xbf16> to vector<128x128xbf16>
    %cst_60 = arith.constant dense<0.000000e+00> : vector<256x128xf32>
    %110 = tpu.matmul %107, %109, %cst_60 {dimension_numbers = #tpu.dot_dimension_numbers<[1], [0], [0], [1], [0, 0, 1, 1], [], []>} : vector<256x128xbf16>, vector<128x128xbf16>, vector<256x128xf32> -> vector<256x128xf32>
    %111 = arith.addf %102, %110 : vector<256x128xf32>
    %c240_i32 = arith.constant 240 : i32
    %112 = tpu.dynamic_rotate %42 by %c240_i32 dim 0 : vector<256x128xf32>, i32 -> vector<256x128xf32>
    %cst_61 = arith.constant 0.000000e+00 : f32
    %113 = vector.broadcast %cst_61 : f32 to vector<256x128xf32>
    %114 = arith.select %50, %112, %113 : vector<256x128xi1>, vector<256x128xf32>
    %115 = arith.truncf %114 : vector<256x128xf32> to vector<256x128xbf16>
    %c7 = arith.constant 7 : index
    %c0_62 = arith.constant 0 : index
    %c0_63 = arith.constant 0 : index
    %116 = vector.load %arg3[%c7, %c0_62, %c0_63] : memref<9x128x128xbf16, #tpu.memory_space<vmem>>, vector<1x128x128xbf16>
    %117 = vector.shape_cast %116 : vector<1x128x128xbf16> to vector<128x128xbf16>
    %cst_64 = arith.constant dense<0.000000e+00> : vector<256x128xf32>
    %118 = tpu.matmul %115, %117, %cst_64 {dimension_numbers = #tpu.dot_dimension_numbers<[1], [0], [0], [1], [0, 0, 1, 1], [], []>} : vector<256x128xbf16>, vector<128x128xbf16>, vector<256x128xf32> -> vector<256x128xf32>
    %119 = arith.addf %111, %118 : vector<256x128xf32>
    %c239_i32 = arith.constant 239 : i32
    %120 = tpu.dynamic_rotate %42 by %c239_i32 dim 0 : vector<256x128xf32>, i32 -> vector<256x128xf32>
    %121 = arith.andi %50, %54 : vector<256x128xi1>
    %cst_65 = arith.constant 0.000000e+00 : f32
    %122 = vector.broadcast %cst_65 : f32 to vector<256x128xf32>
    %123 = arith.select %121, %120, %122 : vector<256x128xi1>, vector<256x128xf32>
    %124 = arith.truncf %123 : vector<256x128xf32> to vector<256x128xbf16>
    %c8 = arith.constant 8 : index
    %c0_66 = arith.constant 0 : index
    %c0_67 = arith.constant 0 : index
    %125 = vector.load %arg3[%c8, %c0_66, %c0_67] : memref<9x128x128xbf16, #tpu.memory_space<vmem>>, vector<1x128x128xbf16>
    %126 = vector.shape_cast %125 : vector<1x128x128xbf16> to vector<128x128xbf16>
    %cst_68 = arith.constant dense<0.000000e+00> : vector<256x128xf32>
    %127 = tpu.matmul %124, %126, %cst_68 {dimension_numbers = #tpu.dot_dimension_numbers<[1], [0], [0], [1], [0, 0, 1, 1], [], []>} : vector<256x128xbf16>, vector<128x128xbf16>, vector<256x128xf32> -> vector<256x128xf32>
    %128 = arith.addf %119, %127 : vector<256x128xf32>
    %129 = vector.broadcast %3 : vector<1x128xf32> to vector<256x128xf32>
    %130 = arith.addf %128, %129 : vector<256x128xf32>
    %cst_69 = arith.constant dense<0.000000e+00> : vector<128xf32>
    %131 = vector.multi_reduction <add>, %130, %cst_69 [0] : vector<256x128xf32> to vector<128xf32>
    %132 = vector.shape_cast %131 : vector<128xf32> to vector<1x128xf32>
    %cst_70 = arith.constant 3.906250e-03 : f32
    %133 = vector.broadcast %cst_70 : f32 to vector<1x128xf32>
    %134 = arith.mulf %132, %133 : vector<1x128xf32>
    %135 = vector.broadcast %134 : vector<1x128xf32> to vector<256x128xf32>
    %136 = arith.subf %130, %135 : vector<256x128xf32>
    %137 = arith.mulf %136, %136 : vector<256x128xf32>
    %cst_71 = arith.constant dense<0.000000e+00> : vector<128xf32>
    %138 = vector.multi_reduction <add>, %137, %cst_71 [0] : vector<256x128xf32> to vector<128xf32>
    %139 = vector.shape_cast %138 : vector<128xf32> to vector<1x128xf32>
    %cst_72 = arith.constant 3.906250e-03 : f32
    %140 = vector.broadcast %cst_72 : f32 to vector<1x128xf32>
    %141 = arith.mulf %139, %140 : vector<1x128xf32>
    %cst_73 = arith.constant 9.99999974E-6 : f32
    %142 = vector.broadcast %cst_73 : f32 to vector<1x128xf32>
    %143 = arith.addf %141, %142 : vector<1x128xf32>
    %144 = math.rsqrt %143 : vector<1x128xf32>
    %145 = vector.broadcast %144 : vector<1x128xf32> to vector<256x128xf32>
    %146 = arith.mulf %136, %145 : vector<256x128xf32>
    %147 = vector.broadcast %4 : vector<1x128xf32> to vector<256x128xf32>
    %148 = arith.mulf %146, %147 : vector<256x128xf32>
    %149 = vector.broadcast %5 : vector<1x128xf32> to vector<256x128xf32>
    %150 = arith.addf %148, %149 : vector<256x128xf32>
    %151 = arith.addf %150, %17 : vector<256x128xf32>
    %cst_74 = arith.constant 0.000000e+00 : f32
    %152 = vector.broadcast %cst_74 : f32 to vector<256x128xf32>
    %153 = arith.cmpf oge, %151, %152 : vector<256x128xf32>
    %cst_75 = arith.constant 0.00999999977 : f32
    %154 = vector.broadcast %cst_75 : f32 to vector<256x128xf32>
    %155 = arith.mulf %154, %151 : vector<256x128xf32>
    %156 = arith.select %153, %151, %155 : vector<256x128xi1>, vector<256x128xf32>
    %157 = vector.shape_cast %156 : vector<256x128xf32> to vector<16x16x128xf32>
    %c0_76 = arith.constant 0 : index
    %c0_77 = arith.constant 0 : index
    %c0_78 = arith.constant 0 : index
    %c0_79 = arith.constant 0 : index
    %158 = vector.load %arg6[%c0_76, %c0_77, %c0_78, %c0_79] : memref<1x16x16x128xf32, #tpu.memory_space<vmem>>, vector<1x16x16x128xf32>
    %159 = vector.shape_cast %158 : vector<1x16x16x128xf32> to vector<16x16x128xf32>
    %160 = vector.shape_cast %157 : vector<16x16x128xf32> to vector<1x16x16x128xf32>
    tpu.vector_store %arg6[%c0_76, %c0_77, %c0_78, %c0_79], %160 {strides = array<i32>} : memref<1x16x16x128xf32, #tpu.memory_space<vmem>>, vector<1x16x16x128xf32>,
    return
  }
  func.func @transform_0(%arg0: i32) -> (i32, i32, i32, i32) {
    %c0_i32 = arith.constant 0 : i32
    %c0_i32_0 = arith.constant 0 : i32
    %c0_i32_1 = arith.constant 0 : i32
    %c0_i32_2 = arith.constant 0 : i32
    return %arg0, %c0_i32, %c0_i32_0, %c0_i32_1 : i32, i32, i32, i32
  }
  func.func @transform_1(%arg0: i32) -> (i32, i32) {
    %c0_i32 = arith.constant 0 : i32
    %c0_i32_0 = arith.constant 0 : i32
    %c0_i32_1 = arith.constant 0 : i32
    return %c0_i32, %c0_i32_0 : i32, i32
  }
  func.func @transform_2(%arg0: i32) -> (i32, i32, i32) {
    %c0_i32 = arith.constant 0 : i32
    %c0_i32_0 = arith.constant 0 : i32
    %c0_i32_1 = arith.constant 0 : i32
    %c0_i32_2 = arith.constant 0 : i32
    return %c0_i32, %c0_i32_0, %c0_i32_1 : i32, i32, i32
  }
  func.func @transform_3(%arg0: i32) -> (i32, i32) {
    %c0_i32 = arith.constant 0 : i32
    %c0_i32_0 = arith.constant 0 : i32
    %c0_i32_1 = arith.constant 0 : i32
    return %c0_i32, %c0_i32_0 : i32, i32
  }
  func.func @transform_4(%arg0: i32) -> (i32, i32) {
    %c0_i32 = arith.constant 0 : i32
    %c0_i32_0 = arith.constant 0 : i32
    %c0_i32_1 = arith.constant 0 : i32
    return %c0_i32, %c0_i32_0 : i32, i32
  }
  func.func @transform_5(%arg0: i32) -> (i32, i32, i32, i32) {
    %c0_i32 = arith.constant 0 : i32
    %c0_i32_0 = arith.constant 0 : i32
    %c0_i32_1 = arith.constant 0 : i32
    %c0_i32_2 = arith.constant 0 : i32
    return %arg0, %c0_i32, %c0_i32_0, %c0_i32_1 : i32, i32, i32, i32
  }
}

</mosaic_0001>

<bundles_post_ra>
// kernel: basic_res_block.1
= control target key start
LH: loop header
LB: loop body
LE: loop exit
PB: predicated region body
PF: predicated region fallthrough
CT: control target
= control target key end

     0   :  { %s5923_s18 = smov 0   ;;  %s8593_s0 = inlined_call_operand.vmem [shape: bf16[2,16,16,128], index: 0, kind: input, shape index: {}]   ;;  %s8594_s1 = inlined_call_operand.vmem [shape: bf16[128,128], index: 1, kind: input, shape index: {}]   ;;  %s8595_s2 = inlined_call_operand.vmem [shape: bf16[9,128,128], index: 2, kind: input, shape index: {}]   ;;  %s8596_s3 = inlined_call_operand.vmem [shape: bf16[128,128], index: 3, kind: input, shape index: {}]   ;;  %s8597_s4 = inlined_call_operand.vmem [shape: f32[8,128], index: 4, kind: input, shape index: {}]   ;;  %s8598_s5 = inlined_call_operand.vmem [shape: f32[2,16,16,128], index: 5, kind: output, shape index: {}]  }
   0x1 LB: > { %s4165_s19 = sadd.s32 4294967295, %s5889_s18   ;;  %p4169_p0 = scmp.ge.s32.totalorder %s5889_s18, 1  ;;  %s5889_s18 = sphi %s5923_s18, %s15_s18  }
   0x2   : > { %p187_p1 = scmp.lt.s32.totalorder %s5889_s18, 3 }
   0x4   : > { %p188_p2 = pnand %p4169_p0, %p187_p1 }
   0x6   : > { %191 = sbr.rel (%p188_p2) target bundleno = 1220 (0x4c4), region = 40 }
   0xd   : > { %v5767_v0 = vld [vmem:[%s8594_s1] sm:$0xff]   ;;  %p215_p3 = scmp.lt.s32.totalorder %s4165_s19, 1  ;;  %v5768_v1 = vld [vmem:[%s8594_s1 + $0x8] sm:$0xff]   ;;  %v5769_v2 = vld [vmem:[%s8594_s1 + $0x10] sm:$0xff]   ;;  %vm5892_vm1 = vmmov 1  }
   0xe   : > { %4957 = vmatprep.subr.bf16.mxu1 %v5767_v0  ;;  %v5770_v3 = vld [vmem:[%s8594_s1 + $0x18] sm:$0xff]   ;;  %v5771_v5 = vld [vmem:[%s8594_s1 + $0x20] sm:$0xff]   ;;  %v5772_v6 = vld [vmem:[%s8594_s1 + $0x28] sm:$0xff]  }
   0xf   : > { %s8826_s19 = smov (!%p215_p3, %s4165_s19), 1  ;;  %4958 = vmatpush3.bf16.msra.mxu1 %v5767_v0  ;;  %v5773_v7 = vld [vmem:[%s8594_s1 + $0x30] sm:$0xff]   ;;  %v5774_v8 = vld [vmem:[%s8594_s1 + $0x38] sm:$0xff]   ;;  %v5791_v24 = vld [vmem:[%s8596_s3] sm:$0xff]  }
  0x10   : > { %4959 = vmatprep.subr.bf16.mxu1 %v5768_v1  ;;  %s4691_s26 = sshll.u32 %s8826_s19, 7  ;;  %v5792_v25 = vld [vmem:[%s8596_s3 + $0x8] sm:$0xff]   ;;  %v6033_v27 = vld [vmem:[%s8597_s4] ss:$0 sm:$0xff]  ;;  %v5793_v30 = vld [vmem:[%s8596_s3 + $0x10] sm:$0xff]   ;;  %s4692_s23 = sshll.u32 %s8826_s19, 8 }
  0x11   : > { %s5946_s29 = scalar_lea.vmem %s8593_s0, %s4691_s26  ;;  %v5794_v36 = vld [vmem:[%s8596_s3 + $0x18] sm:$0xff]   ;;  %v5795_v44 = vld [vmem:[%s8596_s3 + $0x20] sm:$0xff]   ;;  %v5796_v50 = vld [vmem:[%s8596_s3 + $0x28] sm:$0xff]   ;;  %s8406_s25 = scalar_lea.vmem %s8598_s5, %s4692_s23 }
  0x12   : > { %v5775_v4 = vld [vmem:[%s5946_s29] sm:$0xff]   ;;  %v5965_v9 = vld [vmem:[%s5946_s29 + $0x8] sm:$0xff]   ;;  %v5968_v10 = vld [vmem:[%s5946_s29 + $0x10] sm:$0xff]  }
  0x13   : > { %4960 = vmatpush3.bf16.msra.mxu1 %v5768_v1  ;;  %4973 = vmatprep.mubr.bf16.mxu1 %v5775_v4  ;;  %v5973_v11 = vld [vmem:[%s5946_s29 + $0x18] sm:$0xff]   ;;  %v5976_v12 = vld [vmem:[%s5946_s29 + $0x20] sm:$0xff]   ;;  %v5981_v13 = vld [vmem:[%s5946_s29 + $0x28] sm:$0xff]  }
  0x14   : > { %4961 = vmatprep.subr.bf16.mxu1 %v5769_v2  ;;  %v5984_v14 = vld [vmem:[%s5946_s29 + $0x30] sm:$0xff]   ;;  %v5989_v15 = vld [vmem:[%s5946_s29 + $0x38] sm:$0xff]   ;;  %v5992_v16 = vld [vmem:[%s5946_s29 + $0x40] sm:$0xff]  }
  0x15   : > { %v5997_v17 = vld [vmem:[%s5946_s29 + $0x48] sm:$0xff]   ;;  %v6000_v18 = vld [vmem:[%s5946_s29 + $0x50] sm:$0xff]   ;;  %v6005_v19 = vld [vmem:[%s5946_s29 + $0x58] sm:$0xff]  }
  0x16   : > { %v6008_v20 = vld [vmem:[%s5946_s29 + $0x60] sm:$0xff]   ;;  %v6013_v21 = vld [vmem:[%s5946_s29 + $0x68] sm:$0xff]   ;;  %v6016_v22 = vld [vmem:[%s5946_s29 + $0x70] sm:$0xff]  }
  0x17   : > { %4962 = vmatpush3.bf16.msra.mxu1 %v5769_v2  ;;  %v6021_v23 = vld [vmem:[%s5946_s29 + $0x78] sm:$0xff]   ;;  %v5797_v58 = vld [vmem:[%s8596_s3 + $0x30] sm:$0xff]  }
  0x18   : > { %4963 = vmatprep.subr.bf16.mxu1 %v5770_v3  ;;  %v5798_v0 = vld [vmem:[%s8596_s3 + $0x38] sm:$0xff]  }
  0x1b   : > { %4964 = vmatpush3.bf16.msra.mxu1 %v5770_v3 }
  0x1c   : > { %4965 = vmatprep.subr.bf16.mxu1 %v5771_v5 }
  0x1f   : > { %4966 = vmatpush3.bf16.msra.mxu1 %v5771_v5 }
  0x20   : > { %4967 = vmatprep.subr.bf16.mxu1 %v5772_v6 }
  0x23   : > { %4968 = vmatpush3.bf16.msra.mxu1 %v5772_v6 }
  0x24   : > { %4969 = vmatprep.subr.bf16.mxu1 %v5773_v7 }
  0x27   : > { %4970 = vmatpush3.bf16.msra.mxu1 %v5773_v7 }
  0x28   : > { %4971 = vmatprep.subr.bf16.mxu1 %v5774_v8 }
  0x2b   : > { %4972 = vmatpush3.bf16.msra.mxu1 %v5774_v8 }
  0x2c   : > { %5005 = vmatprep.subr.bf16.mxu1 %v5791_v24 }
  0x2e   : > { %4974 = vmatmul.mubr.bf16.vlgmr.msra.gmra.mrb[0].mxu1 %v5965_v9 }
  0x2f   : > { %4977 = vmatprep.mubr.bf16.mxu1 %v5968_v10  ;;  %5006 = vmatpush3.bf16.msra.mxu1 %v5791_v24 }
  0x30   : > { %5007 = vmatprep.subr.bf16.mxu1 %v5792_v25 }
  0x33   : > { %5008 = vmatpush3.bf16.msra.mxu1 %v5792_v25 }
  0x34   : > { %5009 = vmatprep.subr.bf16.mxu1 %v5793_v30 }
  0x36   : > { %4978 = vmatmul.mubr.bf16.gmra.mrb[4].mxu1 %v5973_v11 }
  0x37   : > { %4981 = vmatprep.mubr.bf16.mxu1 %v5976_v12  ;;  %5010 = vmatpush3.bf16.msra.mxu1 %v5793_v30 }
  0x38   : > { %5011 = vmatprep.subr.bf16.mxu1 %v5794_v36 }
  0x3b   : > { %5012 = vmatpush3.bf16.msra.mxu1 %v5794_v36 }
  0x3c   : > { %5013 = vmatprep.subr.bf16.mxu1 %v5795_v44 }
  0x3e   : > { %4982 = vmatmul.mubr.bf16.gmra.mrb[8].mxu1 %v5981_v13 }
  0x3f   : > { %4985 = vmatprep.mubr.bf16.mxu1 %v5984_v14  ;;  %5014 = vmatpush3.bf16.msra.mxu1 %v5795_v44 }
  0x40   : > { %5015 = vmatprep.subr.bf16.mxu1 %v5796_v50 }
  0x43   : > { %5016 = vmatpush3.bf16.msra.mxu1 %v5796_v50 }
  0x44   : > { %5017 = vmatprep.subr.bf16.mxu1 %v5797_v58 }
  0x46   : > { %4986 = vmatmul.mubr.bf16.gmra.mrb[12].mxu1 %v5989_v15 }
  0x47   : > { %4989 = vmatprep.mubr.bf16.mxu1 %v5992_v16  ;;  %5018 = vmatpush3.bf16.msra.mxu1 %v5797_v58 }
  0x48   : > { %5019 = vmatprep.subr.bf16.mxu1 %v5798_v0 }
  0x4b   : > { %5020 = vmatpush3.bf16.msra.mxu1 %v5798_v0 }
  0x4e   : > { %4990 = vmatmul.mubr.bf16.gmra.mrb[16].mxu1 %v5997_v17 }
  0x4f   : > { %4993 = vmatprep.mubr.bf16.mxu1 %v6000_v18 }
  0x56   : > { %4994 = vmatmul.mubr.bf16.gmra.mrb[20].mxu1 %v6005_v19 }
  0x57   : > { %4997 = vmatprep.mubr.bf16.mxu1 %v6008_v20 }
  0x5e   : > { %4998 = vmatmul.mubr.bf16.gmra.mrb[24].mxu1 %v6013_v21 }
  0x5f   : > { %5001 = vmatprep.mubr.bf16.mxu1 %v6016_v22 }
  0x66   : > { %5002 = vmatmul.mubr.bf16.gmra.mrb[28].mxu1 %v6021_v23 }
  0x67   : > { %5021 = vmatprep.mubr.bf16.mxu1 %v5775_v4 }
  0x6e   : > { %5022 = vmatmul.mubr.bf16.vlgmr.msra.gmra.mrb[32].mxu1 %v5965_v9 }
  0x6f   : > { %5025 = vmatprep.mubr.bf16.mxu1 %v5968_v10 }
  0x76   : > { %5026 = vmatmul.mubr.bf16.gmra.mrb[36].mxu1 %v5973_v11 }
  0x77   : > { %5029 = vmatprep.mubr.bf16.mxu1 %v5976_v12 }
  0x7e   : > { %5030 = vmatmul.mubr.bf16.gmra.mrb[40].mxu1 %v5981_v13 }
  0x7f   : > { %5033 = vmatprep.mubr.bf16.mxu1 %v5984_v14 }
  0x86   : > { %5034 = vmatmul.mubr.bf16.gmra.mrb[44].mxu1 %v5989_v15 }
  0x87   : > { %5037 = vmatprep.mubr.bf16.mxu1 %v5992_v16  ;;  %v5799_v16 = vld [vmem:[%s8595_s2 + $0x40] sm:$0xff]  }
  0x88   : > { %5053 = vmatprep.subr.bf16.mxu1 %v5799_v16 }
  0x89   : > { %5054 = vmatpush3.bf16.msra.mxu1 %v5799_v16 }
  0x8e   : > { %5038 = vmatmul.mubr.bf16.gmra.mrb[48].mxu1 %v5997_v17 }
  0x8f   : > { %5041 = vmatprep.mubr.bf16.mxu1 %v6000_v18 }
  0x96   : > { %5042 = vmatmul.mubr.bf16.gmra.mrb[52].mxu1 %v6005_v19  ;;  %v5806_v19 = vld [vmem:[%s8595_s2 + $0xd8] sm:$0xff]  }
  0x97   : > { %5045 = vmatprep.mubr.bf16.mxu1 %v6008_v20 }
  0x9e   : > { %5046 = vmatmul.mubr.bf16.gmra.mrb[56].mxu1 %v6013_v21  ;;  %v5810_v21 = vld [vmem:[%s8595_s2 + $0xe8] sm:$0xff]  }
  0x9f   : > { %5049 = vmatprep.mubr.bf16.mxu1 %v6016_v22 }
  0xa6   : > { %5050 = vmatmul.mubr.bf16.gmra.mrb[60].mxu1 %v6021_v23  ;;  %v5812_v23 = vld [vmem:[%s8595_s2 + $0xf0] sm:$0xff]  }
 0x101   : > { %v4975_v26 = vpop.f32.mrb[0].mxu1 }
 0x102   : > { %v463_v28 = vpop.f32.mrb[1].mxu1  ;;  %v6045_v34 = vadd.f32 %v4975_v26, %v6033_v27 }
 0x103   : > { %v4976_v29 = vpop.f32.mrb[2].mxu1  ;;  %v6039_v32 = vadd.f32 %v6033_v27, %v463_v28 }
 0x104   : > { %v466_v31 = vpop.f32.mrb[3].mxu1  ;;  %v6053_v37 = vadd.f32 %v4976_v29, %v6033_v27 }
 0x105   : > { %v6042_v33 = vadd.f32 %v6033_v27, %v466_v31 }
 0x107   : > { %v819_v35 = vadd.f32 %v6042_v33, %v6039_v32 }
 0x109   : > { %v820_v38 = vadd.f32 %v819_v35, %v6045_v34  ;;  %v4979_v39 = vpop.f32.mrb[4].mxu1 }
 0x10a   : > { %v479_v40 = vpop.f32.mrb[5].mxu1  ;;  %v6068_v48 = vadd.f32 %v4979_v39, %v6033_v27 }
 0x10b   : > { %v6057_v41 = vadd.f32 %v6033_v27, %v479_v40  ;;  %v821_v42 = vadd.f32 %v820_v38, %v6053_v37  ;;  %v4980_v43 = vpop.f32.mrb[6].mxu1 }
 0x10c   : > { %v482_v45 = vpop.f32.mrb[7].mxu1  ;;  %v6075_v51 = vadd.f32 %v4980_v43, %v6033_v27 }
 0x10d   : > { %v822_v46 = vadd.f32 %v821_v42, %v6057_v41  ;;  %v6065_v47 = vadd.f32 %v6033_v27, %v482_v45 }
 0x10f   : > { %v823_v49 = vadd.f32 %v822_v46, %v6065_v47 }
 0x111   : > { %v824_v52 = vadd.f32 %v823_v49, %v6068_v48  ;;  %v4983_v53 = vpop.f32.mrb[8].mxu1 }
 0x112   : > { %v495_v54 = vpop.f32.mrb[9].mxu1  ;;  %v6090_v62 = vadd.f32 %v4983_v53, %v6033_v27 }
 0x113   : > { %v6079_v55 = vadd.f32 %v6033_v27, %v495_v54  ;;  %v825_v56 = vadd.f32 %v824_v52, %v6075_v51  ;;  %v4984_v57 = vpop.f32.mrb[10].mxu1 }
 0x114   : > { %v498_v59 = vpop.f32.mrb[11].mxu1  ;;  %v6097_v1 = vadd.f32 %v4984_v57, %v6033_v27 }
 0x115   : > { %v826_v60 = vadd.f32 %v825_v56, %v6079_v55  ;;  %v6087_v61 = vadd.f32 %v6033_v27, %v498_v59 }
 0x117   : > { %v827_v63 = vadd.f32 %v826_v60, %v6087_v61 }
 0x119   : > { %v828_v2 = vadd.f32 %v827_v63, %v6090_v62  ;;  %v4987_v3 = vpop.f32.mrb[12].mxu1 }
 0x11a   : > { %v511_v4 = vpop.f32.mrb[13].mxu1  ;;  %v6111_v26 = vadd.f32 %v4987_v3, %v6033_v27 }
 0x11b   : > { %v6101_v5 = vadd.f32 %v6033_v27, %v511_v4  ;;  %v829_v6 = vadd.f32 %v828_v2, %v6097_v1  ;;  %v4988_v7 = vpop.f32.mrb[14].mxu1 }
 0x11c   : > { %v514_v8 = vpop.f32.mrb[15].mxu1  ;;  %v6115_v29 = vadd.f32 %v4988_v7, %v6033_v27 }
 0x11d   : > { %v830_v24 = vadd.f32 %v829_v6, %v6101_v5  ;;  %v6106_v25 = vadd.f32 %v6033_v27, %v514_v8 }
 0x11f   : > { %v831_v28 = vadd.f32 %v830_v24, %v6106_v25 }
 0x121   : > { %v832_v30 = vadd.f32 %v831_v28, %v6111_v26  ;;  %v4991_v31 = vpop.f32.mrb[16].mxu1 }
 0x122   : > { %v527_v35 = vpop.f32.mrb[17].mxu1  ;;  %v6129_v42 = vadd.f32 %v4991_v31, %v6033_v27 }
 0x123   : > { %v6119_v36 = vadd.f32 %v6033_v27, %v527_v35  ;;  %v833_v38 = vadd.f32 %v832_v30, %v6115_v29  ;;  %v4992_v9 = vpop.f32.mrb[18].mxu1 }
 0x124   : > { %v530_v39 = vpop.f32.mrb[19].mxu1  ;;  %v6133_v44 = vadd.f32 %v4992_v9, %v6033_v27 }
 0x125   : > { %v834_v10 = vadd.f32 %v833_v38, %v6119_v36  ;;  %v6124_v40 = vadd.f32 %v6033_v27, %v530_v39 }
 0x127   : > { %v835_v43 = vadd.f32 %v834_v10, %v6124_v40 }
 0x129   : > { %v836_v45 = vadd.f32 %v835_v43, %v6129_v42  ;;  %v4995_v46 = vpop.f32.mrb[20].mxu1 }
 0x12a   : > { %v543_v49 = vpop.f32.mrb[21].mxu1  ;;  %v6147_v56 = vadd.f32 %v4995_v46, %v6033_v27  ;;  %v5801_v46 = vld [vmem:[%s8595_s2 + $0x48] sm:$0xff]  }
 0x12b   : > { %v6137_v50 = vadd.f32 %v6033_v27, %v543_v49  ;;  %v837_v52 = vadd.f32 %v836_v45, %v6133_v44  ;;  %v4996_v11 = vpop.f32.mrb[22].mxu1  ;;  %v5800_v45 = vld [vmem:[%s8595_s2 + $0xc0] sm:$0xff]   ;;  %5055 = vmatprep.subr.bf16.mxu1 %v5801_v46 }
 0x12c   : > { %v546_v53 = vpop.f32.mrb[23].mxu1  ;;  %v6151_v58 = vadd.f32 %v4996_v11, %v6033_v27  ;;  %5197 = vmatprep.subr.bf16.mxu0 %v5800_v45  ;;  %5056 = vmatpush3.bf16.msra.mxu1 %v5801_v46  ;;  %v5803_v11 = vld [vmem:[%s8595_s2 + $0x50] sm:$0xff]   ;;  %v8600_v46 = vmov 0.0|0.0  }
 0x12d   : > { %v838_v12 = vadd.f32 %v837_v52, %v6137_v50  ;;  %v6142_v54 = vadd.f32 %v6033_v27, %v546_v53  ;;  %5198 = vmatpush3.bf16.msra.mxu0 %v5800_v45  ;;  %v5802_v52 = vld [vmem:[%s8595_s2 + $0xc8] sm:$0xff]   ;;  %5057 = vmatprep.subr.bf16.mxu1 %v5803_v11  ;;  %v6371_v45 = vld [vmem:[%s8595_s2 + $0x100] sm:$0xff]  }
 0x12e   : > { %5199 = vmatprep.subr.bf16.mxu0 %v5802_v52  ;;  %5069 = vmatprep.mubr.bf16.mxu1 %v8600_v46  ;;  %v5829_v46 = vld [vmem:[%s8595_s2 + $0x20] sm:$0xff]  }
 0x12f   : > { %v839_v57 = vadd.f32 %v838_v12, %v6142_v54  ;;  %v5804_v12 = vld [vmem:[%s8595_s2 + $0xd0] sm:$0xff]  }
 0x130   : > { %5058 = vmatpush3.bf16.msra.mxu1 %v5803_v11 }
 0x131   : > { %v840_v59 = vadd.f32 %v839_v57, %v6147_v56  ;;  %v4999_v60 = vpop.f32.mrb[24].mxu1  ;;  %5200 = vmatpush3.bf16.msra.mxu0 %v5802_v52  ;;  %v5805_v57 = vld [vmem:[%s8595_s2 + $0x58] sm:$0xff]  }
 0x132   : > { %v559_v63 = vpop.f32.mrb[25].mxu1  ;;  %v6165_v6 = vadd.f32 %v4999_v60, %v6033_v27  ;;  %5201 = vmatprep.subr.bf16.mxu0 %v5804_v12  ;;  %5059 = vmatprep.subr.bf16.mxu1 %v5805_v57 }
 0x133   : > { %v6155_v0 = vadd.f32 %v6033_v27, %v559_v63  ;;  %v841_v2 = vadd.f32 %v840_v59, %v6151_v58  ;;  %v5000_v13 = vpop.f32.mrb[26].mxu1  ;;  %v5807_v63 = vld [vmem:[%s8595_s2 + $0x60] sm:$0xff]  }
 0x134   : > { %v562_v3 = vpop.f32.mrb[27].mxu1  ;;  %v6169_v8 = vadd.f32 %v5000_v13, %v6033_v27  ;;  %5060 = vmatpush3.bf16.msra.mxu1 %v5805_v57  ;;  %v5808_v13 = vld [vmem:[%s8595_s2 + $0xe0] sm:$0xff]  }
 0x135   : > { %v842_v14 = vadd.f32 %v841_v2, %v6155_v0  ;;  %v6160_v4 = vadd.f32 %v6033_v27, %v562_v3  ;;  %5202 = vmatpush3.bf16.msra.mxu0 %v5804_v12  ;;  %5061 = vmatprep.subr.bf16.mxu1 %v5807_v63  ;;  %v5809_v3 = vld [vmem:[%s8595_s2 + $0x68] sm:$0xff]  }
 0x136   : > { %5203 = vmatprep.subr.bf16.mxu0 %v5806_v19 }
 0x137   : > { %v843_v7 = vadd.f32 %v842_v14, %v6160_v4 }
 0x138   : > { %5062 = vmatpush3.bf16.msra.mxu1 %v5807_v63 }
 0x139   : > { %v844_v24 = vadd.f32 %v843_v7, %v6165_v6  ;;  %v5003_v28 = vpop.f32.mrb[28].mxu1  ;;  %5204 = vmatpush3.bf16.msra.mxu0 %v5806_v19  ;;  %5063 = vmatprep.subr.bf16.mxu1 %v5809_v3  ;;  %v5811_v7 = vld [vmem:[%s8595_s2 + $0x70] sm:$0xff]  }
 0x13a   : > { %v575_v30 = vpop.f32.mrb[29].mxu1  ;;  %v6186_v10 = vadd.f32 %v5003_v28, %v6033_v27  ;;  %5205 = vmatprep.subr.bf16.mxu0 %v5808_v13 }
 0x13b   : > { %v6173_v31 = vadd.f32 %v6033_v27, %v575_v30  ;;  %v845_v35 = vadd.f32 %v844_v24, %v6169_v8  ;;  %v5004_v15 = vpop.f32.mrb[30].mxu1 }
 0x13c   : > { %v578_v38 = vpop.f32.mrb[31].mxu1  ;;  %v6196_v49 = vadd.f32 %v5004_v15, %v6033_v27  ;;  %5064 = vmatpush3.bf16.msra.mxu1 %v5809_v3 }
 0x13d   : > { %v846_v9 = vadd.f32 %v845_v35, %v6173_v31  ;;  %v6181_v39 = vadd.f32 %v6033_v27, %v578_v38  ;;  %5206 = vmatpush3.bf16.msra.mxu0 %v5808_v13  ;;  %5065 = vmatprep.subr.bf16.mxu1 %v5811_v7 }
 0x13e   : > { %5207 = vmatprep.subr.bf16.mxu0 %v5810_v21 }
 0x13f   : > { %v847_v43 = vadd.f32 %v846_v9, %v6181_v39 }
 0x140   : > { %5066 = vmatpush3.bf16.msra.mxu1 %v5811_v7 }
 0x141   : > { %v848_v17 = vadd.f32 %v847_v43, %v6186_v10  ;;  %5208 = vmatpush3.bf16.msra.mxu0 %v5810_v21  ;;  %v1161_v43 = vlaneseq }
 0x142   : > { %5209 = vmatprep.subr.bf16.mxu0 %v5812_v23 }
 0x143   : > { %v849_v18 = vadd.f32 %v848_v17, %v6196_v49  ;;  %v6380_v17 = vshrl.u32 %v1161_v43, 7  ;;  %v6424_v43 = vld [vmem:[%s8595_s2] sm:$0xff]  }
 0x145   : > { %v850_v53 = vrot.slane %v849_v18, 4  ;;  %5210 = vmatpush3.bf16.msra.mxu0 %v5812_v23  ;;  %vm1199_vm7 = vcmp.lt.s32.totalorder %v6380_v17, 1  ;;  %vm1164_vm12 = vcmp.gt.s32.totalorder %v6380_v17, 0  ;;  %vm1773_vm13 = vcmp.lt.s32.totalorder %v6380_v17, 7 }
 0x147   : > { %v851_v27 = vadd.f32 %v850_v53, %v849_v18  ;;  %v1163_v53 = vadd.s32 8, %v6380_v17  ;;  %v5840_v17 = vld [vmem:[%s8595_s2 + $0x180] sm:$0xff]  }
 0x149   : > { %v852_v59 = vrot.slane %v851_v27, 2  ;;  %vm1167_vm0 = vcmp.lt.s32.totalorder %v1163_v53, 15 }
 0x14a   : > { %vm6397_vm2 = vmpackc.low %vm1167_vm0, %vm5892_vm1 }
 0x14b   : > { %v853_v60 = vadd.f32 %v852_v59, %v851_v27 }
 0x14d   : > { %v854_v2 = vrot.slane %v853_v60, 1 }
 0x14f   : > { %v855_v20 = vadd.f32 %v854_v2, %v853_v60 }
 0x151   : > { %v6228_v14 = vmul.f32 0.00390625, %v855_v20 }
 0x153   : > { %v6238_v24 = vsub.f32 %v6079_v55, %v6228_v14  ;;  %v6242_v22 = vsub.f32 %v6087_v61, %v6228_v14  ;;  %v6246_v28 = vsub.f32 %v6090_v62, %v6228_v14  ;;  %v6250_v30 = vsub.f32 %v6097_v1, %v6228_v14 }
 0x154   : > { %v6254_v35 = vsub.f32 %v6101_v5, %v6228_v14  ;;  %v6258_v55 = vsub.f32 %v6106_v25, %v6228_v14  ;;  %v6262_v61 = vsub.f32 %v6111_v26, %v6228_v14  ;;  %v6266_v62 = vsub.f32 %v6115_v29, %v6228_v14  ;;  %v5813_v29 = vld [vmem:[%s8595_s2 + $0x78] sm:$0xff]  }
 0x155   : > { %v6271_v1 = vsub.f32 %v6119_v36, %v6228_v14  ;;  %v6275_v5 = vsub.f32 %v6124_v40, %v6228_v14  ;;  %v6279_v25 = vsub.f32 %v6129_v42, %v6228_v14  ;;  %v6283_v26 = vsub.f32 %v6133_v44, %v6228_v14  ;;  %5067 = vmatprep.subr.bf16.mxu1 %v5813_v29 }
 0x156   : > { %v6293_v36 = vsub.f32 %v6137_v50, %v6228_v14  ;;  %v6297_v40 = vsub.f32 %v6142_v54, %v6228_v14  ;;  %v6301_v42 = vsub.f32 %v6147_v56, %v6228_v14  ;;  %v6305_v44 = vsub.f32 %v6151_v58, %v6228_v14  ;;  %5068 = vmatpush3.bf16.msra.mxu1 %v5813_v29 }
 0x157   : > { %v6309_v15 = vsub.f32 %v6155_v0, %v6228_v14  ;;  %v6313_v50 = vsub.f32 %v6160_v4, %v6228_v14  ;;  %v6317_v54 = vsub.f32 %v6165_v6, %v6228_v14  ;;  %v6321_v56 = vsub.f32 %v6169_v8, %v6228_v14  ;;  %v5814_v8 = vld [vmem:[%s8595_s2 + $0xf8] sm:$0xff]   ;;  %5101 = vmatprep.subr.bf16.mxu1 %v6424_v43 }
 0x158   : > { %v6325_v58 = vsub.f32 %v6173_v31, %v6228_v14  ;;  %v6329_v0 = vsub.f32 %v6181_v39, %v6228_v14  ;;  %v6333_v4 = vsub.f32 %v6186_v10, %v6228_v14  ;;  %v6337_v6 = vsub.f32 %v6196_v49, %v6228_v14  ;;  %5211 = vmatprep.subr.bf16.mxu0 %v5814_v8 }
 0x159   : > { %v6344_v31 = vsub.f32 %v6039_v32, %v6228_v14  ;;  %v6348_v16 = vsub.f32 %v6042_v33, %v6228_v14  ;;  %v6352_v38 = vsub.f32 %v6045_v34, %v6228_v14  ;;  %5212 = vmatpush3.bf16.msra.mxu0 %v5814_v8  ;;  %v6360_v32 = vsub.f32 %v6053_v37, %v6228_v14 }
 0x15a   : > { %v6364_v33 = vsub.f32 %v6057_v41, %v6228_v14  ;;  %v6376_v37 = vsub.f32 %v6065_v47, %v6228_v14  ;;  %5245 = vmatprep.subr.bf16.mxu0 %v6371_v45  ;;  %v6385_v18 = vsub.f32 %v6068_v48, %v6228_v14  ;;  %v6392_v47 = vsub.f32 %v6075_v51, %v6228_v14 }
 0x15b   : > { %v889_v9 = vmul.f32 %v6344_v31, %v6344_v31  ;;  %v890_v39 = vmul.f32 %v6348_v16, %v6348_v16  ;;  %v891_v10 = vmul.f32 %v6352_v38, %v6352_v38  ;;  %v892_v41 = vmul.f32 %v6360_v32, %v6360_v32 }
 0x15c   : > { %v893_v52 = vmul.f32 %v6364_v33, %v6364_v33  ;;  %v894_v27 = vmul.f32 %v6376_v37, %v6376_v37  ;;  %v8623_v48 = vmov 0  ;;  %v895_v57 = vmul.f32 %v6385_v18, %v6385_v18 }
 0x15d   : > { %v921_v34 = vadd.f32 %v890_v39, %v889_v9  ;;  %v8624_v48 = vsel %vm6397_vm2, 4294967295, %v8623_v48  ;;  %v896_v60 = vmul.f32 %v6392_v47, %v6392_v47  ;;  %v897_v19 = vmul.f32 %v6238_v24, %v6238_v24 }
 0x15e   : > { %8625 = vst [vmem:[#allocation2_spill] sm:$0xff] %v8624_v48  ;;  %v898_v2 = vmul.f32 %v6242_v22, %v6242_v22  ;;  %v899_v13 = vmul.f32 %v6246_v28, %v6246_v28  ;;  %v900_v14 = vmul.f32 %v6250_v30, %v6250_v30  ;;  %v901_v7 = vmul.f32 %v6254_v35, %v6254_v35 }
 0x15f   : > { %v922_v49 = vadd.f32 %v921_v34, %v891_v10  ;;  %v902_v29 = vmul.f32 %v6258_v55, %v6258_v55  ;;  %v903_v9 = vmul.f32 %v6262_v61, %v6262_v61  ;;  %v904_v10 = vmul.f32 %v6266_v62, %v6266_v62 }
 0x160   : > { %v907_v53 = vmul.f32 %v6279_v25, %v6279_v25 }
 0x161   : > { %v923_v11 = vadd.f32 %v922_v49, %v892_v41  ;;  %v905_v41 = vmul.f32 %v6271_v1, %v6271_v1 }
 0x163   : > { %v924_v12 = vadd.f32 %v923_v11, %v893_v52  ;;  %v906_v52 = vmul.f32 %v6275_v5, %v6275_v5 }
 0x165   : > { %v925_v59 = vadd.f32 %v924_v12, %v894_v27  ;;  %v908_v12 = vmul.f32 %v6283_v26, %v6283_v26 }
 0x167   : > { %v926_v51 = vadd.f32 %v925_v59, %v895_v57  ;;  %v909_v59 = vmul.f32 %v6293_v36, %v6293_v36 }
 0x169   : > { %v927_v63 = vadd.f32 %v926_v51, %v896_v60  ;;  %v910_v51 = vmul.f32 %v6297_v40, %v6297_v40 }
 0x16b   : > { %v928_v20 = vadd.f32 %v927_v63, %v897_v19  ;;  %v911_v63 = vmul.f32 %v6301_v42, %v6301_v42 }
 0x16d   : > { %v929_v3 = vadd.f32 %v928_v20, %v898_v2  ;;  %v912_v20 = vmul.f32 %v6305_v44, %v6305_v44 }
 0x16f   : > { %v930_v21 = vadd.f32 %v929_v3, %v899_v13  ;;  %v913_v3 = vmul.f32 %v6309_v15, %v6309_v15 }
 0x171   : > { %v931_v23 = vadd.f32 %v930_v21, %v900_v14  ;;  %v914_v21 = vmul.f32 %v6313_v50, %v6313_v50 }
 0x173   : > { %v932_v8 = vadd.f32 %v931_v23, %v901_v7  ;;  %v915_v23 = vmul.f32 %v6317_v54, %v6317_v54 }
 0x175   : > { %v933_v39 = vadd.f32 %v932_v8, %v902_v29  ;;  %v916_v8 = vmul.f32 %v6321_v56, %v6321_v56 }
 0x177   : > { %v934_v34 = vadd.f32 %v933_v39, %v903_v9  ;;  %v917_v39 = vmul.f32 %v6325_v58, %v6325_v58 }
 0x179   : > { %v935_v49 = vadd.f32 %v934_v34, %v904_v10  ;;  %v918_v34 = vmul.f32 %v6329_v0, %v6329_v0 }
 0x17b   : > { %v936_v11 = vadd.f32 %v935_v49, %v905_v41  ;;  %v919_v49 = vmul.f32 %v6333_v4, %v6333_v4 }
 0x17d   : > { %v937_v27 = vadd.f32 %v936_v11, %v906_v52  ;;  %v920_v11 = vmul.f32 %v6337_v6, %v6337_v6 }
 0x17f   : > { %v938_v57 = vadd.f32 %v937_v27, %v907_v53 }
 0x181   : > { %v939_v60 = vadd.f32 %v938_v57, %v908_v12 }
 0x183   : > { %v940_v19 = vadd.f32 %v939_v60, %v909_v59 }
 0x185   : > { %v941_v2 = vadd.f32 %v940_v19, %v910_v51 }
 0x187   : > { %v942_v13 = vadd.f32 %v941_v2, %v911_v63 }
 0x189   : > { %v943_v14 = vadd.f32 %v942_v13, %v912_v20  ;;  %v6462_v13 = vld [vmem:[%s8597_s4 + $0x1] ss:$0 sm:$0xff] }
 0x18b   : > { %v944_v7 = vadd.f32 %v943_v14, %v913_v3 }
 0x18d   : > { %v945_v29 = vadd.f32 %v944_v7, %v914_v21  ;;  %v6469_v21 = vld [vmem:[%s8597_s4 + $0x2] ss:$0 sm:$0xff] }
 0x18f   : > { %v946_v9 = vadd.f32 %v945_v29, %v915_v23 }
 0x191   : > { %v947_v10 = vadd.f32 %v946_v9, %v916_v8 }
 0x193   : > { %v948_v41 = vadd.f32 %v947_v10, %v917_v39 }
 0x195   : > { %v949_v52 = vadd.f32 %v948_v41, %v918_v34 }
 0x197   : > { %v950_v53 = vadd.f32 %v949_v52, %v919_v49 }
 0x199   : > { %v951_v27 = vadd.f32 %v950_v53, %v920_v11 }
 0x19b   : > { %v952_v12 = vrot.slane %v951_v27, 4 }
 0x19d   : > { %v953_v57 = vadd.f32 %v952_v12, %v951_v27 }
 0x19f   : > { %v954_v59 = vrot.slane %v953_v57, 2 }
 0x1a1   : > { %v955_v60 = vadd.f32 %v954_v59, %v953_v57 }
 0x1a3   : > { %v956_v51 = vrot.slane %v955_v60, 1 }
 0x1a5   : > { %v957_v19 = vadd.f32 %v956_v51, %v955_v60 }
 0x1a7   : > { %v958_v63 = vmul.f32 0.00390625, %v957_v19 }
 0x1a9   : > { %v959_v2 = vadd.f32 1e-05, %v958_v63 }
 0x1ab   : > { %5871 = vrsqrt.f32 %v959_v2 }
 0x1b5   : > { %v5872_v20 = vpop.eup %5871 }
 0x1b6   : > { %v990_v3 = vmul.f32 %v5872_v20, %v6329_v0  ;;  %v961_v14 = vmul.f32 %v5872_v20, %v6344_v31  ;;  %v962_v7 = vmul.f32 %v5872_v20, %v6348_v16  ;;  %v963_v23 = vmul.f32 %v5872_v20, %v6352_v38 }
 0x1b7   : > { %v964_v29 = vmul.f32 %v5872_v20, %v6360_v32  ;;  %v965_v8 = vmul.f32 %v5872_v20, %v6364_v33  ;;  %v966_v39 = vmul.f32 %v5872_v20, %v6376_v37  ;;  %v967_v0 = vmul.f32 %v5872_v20, %v6385_v18 }
 0x1b8   : > { %v1026_v9 = vmul.f32 %v6462_v13, %v990_v3  ;;  %v968_v31 = vmul.f32 %v5872_v20, %v6392_v47  ;;  %v969_v10 = vmul.f32 %v5872_v20, %v6238_v24  ;;  %v970_v34 = vmul.f32 %v5872_v20, %v6242_v22 }
 0x1b9   : > { %v971_v16 = vmul.f32 %v5872_v20, %v6246_v28  ;;  %v972_v38 = vmul.f32 %v5872_v20, %v6250_v30  ;;  %v973_v33 = vmul.f32 %v5872_v20, %v6254_v35  ;;  %v974_v41 = vmul.f32 %v5872_v20, %v6258_v55 }
 0x1ba   : > { %v6484_v32 = vadd.f32 %v6469_v21, %v1026_v9  ;;  %v975_v37 = vmul.f32 %v5872_v20, %v6262_v61  ;;  %v976_v18 = vmul.f32 %v5872_v20, %v6266_v62  ;;  %v977_v47 = vmul.f32 %v5872_v20, %v6271_v1 }
 0x1bb   : > { %v978_v24 = vmul.f32 %v5872_v20, %v6275_v5  ;;  %v979_v22 = vmul.f32 %v5872_v20, %v6279_v25  ;;  %v980_v28 = vmul.f32 %v5872_v20, %v6283_v26  ;;  %v981_v30 = vmul.f32 %v5872_v20, %v6293_v36 }
 0x1bc   : > { %v982_v49 = vmul.f32 %v5872_v20, %v6297_v40  ;;  %v983_v35 = vmul.f32 %v5872_v20, %v6301_v42  ;;  %v984_v55 = vmul.f32 %v5872_v20, %v6305_v44  ;;  %v985_v61 = vmul.f32 %v5872_v20, %v6309_v15 }
 0x1bd   : > { %v986_v62 = vmul.f32 %v5872_v20, %v6313_v50  ;;  %v987_v1 = vmul.f32 %v5872_v20, %v6317_v54  ;;  %v988_v5 = vmul.f32 %v5872_v20, %v6321_v56  ;;  %v989_v25 = vmul.f32 %v5872_v20, %v6325_v58 }
 0x1be   : > { %v991_v26 = vmul.f32 %v5872_v20, %v6333_v4  ;;  %v992_v36 = vmul.f32 %v5872_v20, %v6337_v6  ;;  %v997_v40 = vmul.f32 %v6462_v13, %v961_v14  ;;  %v998_v42 = vmul.f32 %v6462_v13, %v962_v7 }
 0x1bf   : > { %v999_v44 = vmul.f32 %v6462_v13, %v963_v23  ;;  %v1000_v15 = vmul.f32 %v6462_v13, %v964_v29  ;;  %v1001_v50 = vmul.f32 %v6462_v13, %v965_v8  ;;  %v1002_v54 = vmul.f32 %v6462_v13, %v966_v39 }
 0x1c0   : > { %v1003_v56 = vmul.f32 %v6462_v13, %v967_v0  ;;  %v1004_v58 = vmul.f32 %v6462_v13, %v968_v31  ;;  %v1005_v4 = vmul.f32 %v6462_v13, %v969_v10  ;;  %v1006_v6 = vmul.f32 %v6462_v13, %v970_v34 }
 0x1c1   : > { %v1007_v52 = vmul.f32 %v6462_v13, %v971_v16  ;;  %v1008_v11 = vmul.f32 %v6462_v13, %v972_v38  ;;  %v1009_v53 = vmul.f32 %v6462_v13, %v973_v33  ;;  %v1010_v27 = vmul.f32 %v6462_v13, %v974_v41 }
 0x1c2   : > { %v1011_v12 = vmul.f32 %v6462_v13, %v975_v37  ;;  %v1012_v57 = vmul.f32 %v6462_v13, %v976_v18  ;;  %v1013_v59 = vmul.f32 %v6462_v13, %v977_v47  ;;  %v1014_v60 = vmul.f32 %v6462_v13, %v978_v24 }
 0x1c3   : > { %v1015_v51 = vmul.f32 %v6462_v13, %v979_v22  ;;  %v1016_v19 = vmul.f32 %v6462_v13, %v980_v28  ;;  %v1017_v63 = vmul.f32 %v6462_v13, %v981_v30  ;;  %v1018_v2 = vmul.f32 %v6462_v13, %v982_v49 }
 0x1c4   : > { %v1019_v20 = vmul.f32 %v6462_v13, %v983_v35  ;;  %v1020_v3 = vmul.f32 %v6462_v13, %v984_v55  ;;  %v1021_v14 = vmul.f32 %v6462_v13, %v985_v61  ;;  %v1022_v7 = vmul.f32 %v6462_v13, %v986_v62 }
 0x1c5   : > { %v1023_v23 = vmul.f32 %v6462_v13, %v987_v1  ;;  %v1027_v29 = vmul.f32 %v6462_v13, %v991_v26  ;;  %v1024_v8 = vmul.f32 %v6462_v13, %v988_v5  ;;  %v1025_v9 = vmul.f32 %v6462_v13, %v989_v25 }
 0x1c6   : > { %v1028_v39 = vmul.f32 %v6462_v13, %v992_v36  ;;  %v1033_v0 = vadd.f32 %v6469_v21, %v997_v40  ;;  %v1034_v31 = vadd.f32 %v6469_v21, %v998_v42  ;;  %v6539_v10 = vadd.f32 %v6469_v21, %v999_v44 }
 0x1c7   : > { %v6542_v34 = vadd.f32 %v6469_v21, %v1000_v15  ;;  %v1037_v16 = vadd.f32 %v6469_v21, %v1001_v50  ;;  %v1038_v38 = vadd.f32 %v6469_v21, %v1002_v54  ;;  %v6547_v33 = vadd.f32 %v6469_v21, %v1003_v56 }
 0x1c8   : > { %v6550_v41 = vadd.f32 %v6469_v21, %v1004_v58  ;;  %v1041_v13 = vadd.f32 %v6469_v21, %v1005_v4  ;;  %v1042_v37 = vadd.f32 %v6469_v21, %v1006_v6  ;;  %v6555_v18 = vadd.f32 %v6469_v21, %v1007_v52 }
 0x1c9   : > { %v6558_v47 = vadd.f32 %v6469_v21, %v1008_v11  ;;  %v1045_v24 = vadd.f32 %v6469_v21, %v1009_v53  ;;  %v1046_v22 = vadd.f32 %v6469_v21, %v1010_v27  ;;  %v6563_v28 = vadd.f32 %v6469_v21, %v1011_v12 }
 0x1ca   : > { %v6566_v30 = vadd.f32 %v6469_v21, %v1012_v57  ;;  %v6569_v49 = vadd.f32 %v6469_v21, %v1013_v59  ;;  %v6572_v35 = vadd.f32 %v6469_v21, %v1014_v60  ;;  %v6575_v55 = vadd.f32 %v6469_v21, %v1015_v51 }
 0x1cb   : > { %v6578_v61 = vadd.f32 %v6469_v21, %v1016_v19  ;;  %v6581_v62 = vadd.f32 %v6469_v21, %v1017_v63  ;;  %v6584_v1 = vadd.f32 %v6469_v21, %v1018_v2  ;;  %v6587_v5 = vadd.f32 %v6469_v21, %v1019_v20 }
 0x1cc   : > { %v6590_v25 = vadd.f32 %v6469_v21, %v1020_v3  ;;  %v6593_v26 = vadd.f32 %v6469_v21, %v1021_v14  ;;  %v6596_v36 = vadd.f32 %v6469_v21, %v1022_v7  ;;  %v6599_v40 = vadd.f32 %v6469_v21, %v1023_v23  ;;  %v5825_v14 = vld [vmem:[%s8595_s2 + $0x8] sm:$0xff]  }
 0x1cd   : > { %v6602_v42 = vadd.f32 %v6469_v21, %v1027_v29  ;;  %v1064_v44 = vadd.f32 %v6469_v21, %v1028_v39  ;;  %vm1065_vm3 = vcmp.ge.f32.partialorder %v1033_v0, 0.0  ;;  %vm1066_vm4 = vcmp.ge.f32.partialorder %v1034_v31, 0.0 }
 0x1ce   : > { %vm1069_vm5 = vcmp.ge.f32.partialorder %v1037_v16, 0.0  ;;  %vm1070_vm6 = vcmp.ge.f32.partialorder %v1038_v38, 0.0  ;;  %vm1073_vm8 = vcmp.ge.f32.partialorder %v1041_v13, 0.0  ;;  %vm1074_vm9 = vcmp.ge.f32.partialorder %v1042_v37, 0.0 }
 0x1cf   : > { %vm1077_vm10 = vcmp.ge.f32.partialorder %v1045_v24, 0.0  ;;  %vm1078_vm11 = vcmp.ge.f32.partialorder %v1046_v22, 0.0  ;;  %v6608_v15 = vadd.f32 %v6469_v21, %v1024_v8  ;;  %v1097_v50 = vmul.f32 0.01, %v1033_v0 }
 0x1d0   : > { %v1098_v54 = vmul.f32 0.01, %v1034_v31  ;;  %v1101_v56 = vmul.f32 0.01, %v1037_v16  ;;  %v6612_v58 = vadd.f32 %v6469_v21, %v1025_v9  ;;  %v1102_v4 = vmul.f32 0.01, %v1038_v38 }
 0x1d1   : > { %v1105_v6 = vmul.f32 0.01, %v1041_v13  ;;  %v1106_v52 = vmul.f32 0.01, %v1042_v37  ;;  %v1109_v11 = vmul.f32 0.01, %v1045_v24  ;;  %v6615_v12 = vsel %vm1065_vm3, %v1033_v0, %v1097_v50  ;;  %vm6680_vm3 = vmpackc.low %vm5892_vm1, %vm1164_vm12 }
 0x1d2   : > { %v1110_v53 = vmul.f32 0.01, %v1046_v22  ;;  %v1128_v27 = vmul.f32 0.01, %v1064_v44  ;;  %v6618_v57 = vsel %vm1066_vm4, %v1034_v31, %v1098_v54  ;;  %v6621_v59 = vsel %vm1069_vm5, %v1037_v16, %v1101_v56 }
 0x1d3   : > { %v6624_v60 = vsel %vm1070_vm6, %v1038_v38, %v1102_v4  ;;  %v6627_v21 = vsel %vm1073_vm8, %v1041_v13, %v1105_v6  ;;  %v6630_v51 = vsel %vm1074_vm9, %v1042_v37, %v1106_v52  ;;  %v6633_v19 = vsel %vm1077_vm10, %v1045_v24, %v1109_v11 }
 0x1d4   : > { %v6636_v63 = vsel %vm1078_vm11, %v1046_v22, %v1110_v53  ;;  %v8602_v2 = vrot.slane %v6621_v59, 1  ;;  %v6641_v20 = vpack.c.bf16 %v6618_v57, %v6615_v12  ;;  %vm1067_vm14 = vcmp.ge.f32.partialorder %v6539_v10, 0.0 }
 0x1d5   : > { %vm1068_vm15 = vcmp.ge.f32.partialorder %v6542_v34, 0.0  ;;  %v1099_v3 = vmul.f32 0.01, %v6539_v10  ;;  %v1100_v7 = vmul.f32 0.01, %v6542_v34  ;;  %vm1096_vm0 = vcmp.ge.f32.partialorder %v1064_v44, 0.0 }
 0x1d6   : > { %v1168_v23 = vrot.slane %v6615_v12, 7  ;;  %v1169_v29 = vrot.slane %v6618_v57, 7  ;;  %5070 = vmatmul.mubr.bf16.vlgmr.msra.gmra.mrb[64].mxu1 %v6641_v20  ;;  %v6656_v9 = vsel %vm1096_vm0, %v1064_v44, %v1128_v27  ;;  %v1172_v39 = vrot.slane %v6621_v59, 7 }
 0x1d7   : > { %v6654_v8 = vsel %vm1067_vm14, %v6539_v10, %v1099_v3  ;;  %v1173_v0 = vrot.slane %v6624_v60, 7  ;;  %v1132_v31 = vsel %vm1068_vm15, %v6542_v34, %v1100_v7  ;;  %v8599_v13 = vrot.slane %v6656_v9, 7  ;;  %5102 = vmatpush3.bf16.msra.mxu1 %v6424_v43  ;;  %v5826_v34 = vld [vmem:[%s8595_s2 + $0x10] sm:$0xff]   ;;  %v5816_v7 = vld [vmem:[%s8595_s2 + $0x108] sm:$0xff]   ;;  %v5866_v43 = vld [vmem:[%s8595_s2 + $0x218] sm:$0xff]  }
 0x1d8   : > { %v1170_v16 = vrot.slane %v6654_v8, 7  ;;  %v8603_v38 = vrot.slane %v6654_v8, 1  ;;  %v1171_v37 = vrot.slane %v1132_v31, 7  ;;  %v6666_v10 = vpack.c.bf16 %v1132_v31, %v6654_v8  ;;  %5103 = vmatprep.subr.bf16.mxu1 %v5825_v14 }
 0x1d9   : > { %v1745_v24 = vrot.slane %v1132_v31, 1  ;;  %v1228_v22 = vsel %vm1199_vm7, %v1168_v23, %v1169_v29  ;;  %v1229_v44 = vsel %vm1199_vm7, %v8599_v13, %v1168_v23  ;;  %v1224_v56 = vsel %vm1199_vm7, %v1172_v39, %v1173_v0 }
 0x1da   : > { %8626 = vst [vmem:[#allocation3_spill] sm:$0xff] %v6666_v10  ;;  %v1227_v54 = vsel %vm1199_vm7, %v1169_v29, %v1170_v16  ;;  %5073 = vmatprep.mubr.bf16.mxu1 %v6666_v10  ;;  %v6698_v52 = vpack.c.bf16 %v1228_v22, %v1229_v44  ;;  %v1226_v11 = vsel %vm1199_vm7, %v1170_v16, %v1171_v37  ;;  %vm1071_vm1 = vcmp.ge.f32.partialorder %v6547_v33, 0.0 }
 0x1db   : > { %v1800_v4 = vsel %vm1773_vm13, %v1745_v24, %v8602_v2  ;;  %v1801_v6 = vsel %vm1773_vm13, %v8603_v38, %v1745_v24  ;;  %v6704_v27 = vpack.c.bf16 %v1226_v11, %v1227_v54  ;;  %v1225_v3 = vsel %vm1199_vm7, %v1171_v37, %v1172_v39  ;;  %5104 = vmatpush3.bf16.msra.mxu1 %v5825_v14  ;;  %v5828_v24 = vld [vmem:[%s8595_s2 + $0x18] sm:$0xff]  }
 0x1dc   : > { %v6702_v53 = vpack.c.bf16 %v1800_v4, %v1801_v6  ;;  %v6713_v23 = vpack.c.bf16 %v6624_v60, %v6621_v59  ;;  %5213 = vmatprep.mubr.msk.bf16.mxu0 %vm6680_vm3, %v6698_v52  ;;  %v6718_v29 = vpack.c.bf16 %v1224_v56, %v1225_v3  ;;  %vm1072_vm4 = vcmp.ge.f32.partialorder %v6550_v41, 0.0  ;;  %5105 = vmatprep.subr.bf16.mxu1 %v5826_v34 }
 0x1dd   : > { %v1103_v39 = vmul.f32 0.01, %v6547_v33  ;;  %5214 = vmatmul.mubr.msk.bf16.vlgmr.msra.gmra.mrb[0].mxu0 %vm6680_vm3, %v6704_v27  ;;  %v1104_v31 = vmul.f32 0.01, %v6550_v41  ;;  %v1176_v14 = vrot.slane %v6627_v21, 7  ;;  %v1177_v16 = vrot.slane %v6630_v51, 7 }
 0x1de   : > { %8629 = vst [vmem:[#allocation4_spill] sm:$0xff] %v6702_v53  ;;  %8630 = vst [vmem:[#allocation5_spill] sm:$0xff] %v6713_v23  ;;  %v6731_v37 = vpack.c.bf16 %v6630_v51, %v6627_v21  ;;  %5246 = vmatpush3.bf16.msra.mxu0 %v6371_v45  ;;  %5217 = vmatprep.mubr.msk.bf16.mxu0 %vm6680_vm3, %v6718_v29  ;;  %vm1075_vm5 = vcmp.ge.f32.partialorder %v6555_v18, 0.0  ;;  %vm1076_vm6 = vcmp.ge.f32.partialorder %v6558_v47, 0.0  ;;  %v1107_v44 = vmul.f32 0.01, %v6555_v18 }
 0x1df   : > { %v6741_v22 = vsel %vm1071_vm1, %v6547_v33, %v1103_v39  ;;  %5247 = vmatprep.subr.bf16.mxu0 %v5816_v7  ;;  %5074 = vmatmul.mubr.bf16.gmra.mrb[68].mxu1 %v6713_v23  ;;  %v6750_v45 = vsel %vm1072_vm4, %v6550_v41, %v1104_v31  ;;  %v5817_v33 = vld [vmem:[%s8595_s2 + $0x110] sm:$0xff]   ;;  %v1220_v4 = vsel %vm1199_vm7, %v1176_v14, %v1177_v16  ;;  %v1108_v3 = vmul.f32 0.01, %v6558_v47 }
 0x1e0   : > { %8631 = vst [vmem:[#allocation6_spill] sm:$0xff] %v6731_v37  ;;  %v1174_v54 = vrot.slane %v6741_v22, 7  ;;  %v1175_v6 = vrot.slane %v6750_v45, 7  ;;  %v6762_v11 = vpack.c.bf16 %v6750_v45, %v6741_v22  ;;  %5106 = vmatpush3.bf16.msra.mxu1 %v5826_v34  ;;  %v6771_v31 = vsel %vm1075_vm5, %v6555_v18, %v1107_v44 }
 0x1e1   : > { %v1180_v13 = vrot.slane %v6633_v19, 7  ;;  %v1181_v50 = vrot.slane %v6636_v63, 7  ;;  %5107 = vmatprep.subr.bf16.mxu1 %v5828_v24  ;;  %v6786_v18 = vsel %vm1076_vm6, %v6558_v47, %v1108_v3  ;;  %v1178_v44 = vrot.slane %v6771_v31, 7  ;;  %v6945_v47 = vld [vmem:[%s8595_s2 + $0x80] sm:$0xff]  }
 0x1e2   : > { %v1223_v39 = vsel %vm1199_vm7, %v1173_v0, %v1174_v54  ;;  %5248 = vmatpush3.bf16.msra.mxu0 %v5816_v7  ;;  %5077 = vmatprep.mubr.bf16.mxu1 %v6762_v11  ;;  %v1222_v0 = vsel %vm1199_vm7, %v1174_v54, %v1175_v6  ;;  %v1221_v34 = vsel %vm1199_vm7, %v1175_v6, %v1176_v14  ;;  %v5818_v7 = vld [vmem:[%s8595_s2 + $0x118] sm:$0xff]   ;;  %v1179_v54 = vrot.slane %v6786_v18, 7 }
 0x1e3   : > { %5249 = vmatprep.subr.bf16.mxu0 %v5817_v33  ;;  %v6789_v41 = vpack.c.bf16 %v1222_v0, %v1223_v39  ;;  %v6791_v2 = vpack.c.bf16 %v1220_v4, %v1221_v34  ;;  %v6799_v14 = vpack.c.bf16 %v6786_v18, %v6771_v31  ;;  %v1219_v3 = vsel %vm1199_vm7, %v1177_v16, %v1178_v44  ;;  %v5831_v16 = vld [vmem:[%s8595_s2 + $0x28] sm:$0xff]  }
 0x1e4   : > { %v1216_v4 = vsel %vm1199_vm7, %v1180_v13, %v1181_v50  ;;  %5108 = vmatpush3.bf16.msra.mxu1 %v5828_v24  ;;  %v1218_v39 = vsel %vm1199_vm7, %v1178_v44, %v1179_v54  ;;  %v1217_v0 = vsel %vm1199_vm7, %v1179_v54, %v1180_v13  ;;  %v6816_v34 = vpack.c.bf16 %v6636_v63, %v6633_v19  ;;  %v5819_v13 = vld [vmem:[%s8595_s2 + $0x120] sm:$0xff]  }
 0x1e5   : > { %8632 = vst [vmem:[#allocation7_spill] sm:$0xff] %v6791_v2  ;;  %5218 = vmatmul.mubr.msk.bf16.gmra.mrb[4].mxu0 %vm6680_vm3, %v6789_v41  ;;  %vm1079_vm8 = vcmp.ge.f32.partialorder %v6563_v28, 0.0  ;;  %5109 = vmatprep.subr.bf16.mxu1 %v5829_v46  ;;  %v6828_v24 = vpack.c.bf16 %v1218_v39, %v1219_v3  ;;  %v6830_v44 = vpack.c.bf16 %v1216_v4, %v1217_v0  ;;  %vm1080_vm9 = vcmp.ge.f32.partialorder %v6566_v30, 0.0 }
 0x1e6   : > { %5250 = vmatpush3.bf16.msra.mxu0 %v5817_v33  ;;  %5221 = vmatprep.mubr.msk.bf16.mxu0 %vm6680_vm3, %v6791_v2  ;;  %v1111_v54 = vmul.f32 0.01, %v6563_v28  ;;  %v1112_v33 = vmul.f32 0.01, %v6566_v30  ;;  %vm1081_vm10 = vcmp.ge.f32.partialorder %v6569_v49, 0.0  ;;  %vm1082_vm11 = vcmp.ge.f32.partialorder %v6572_v35, 0.0 }
 0x1e7   : > { %8633 = vst [vmem:[#allocation8_spill] sm:$0xff] %v6828_v24  ;;  %8634 = vst [vmem:[#allocation9_spill] sm:$0xff] %v6830_v44  ;;  %5251 = vmatprep.subr.bf16.mxu0 %v5818_v7  ;;  %5078 = vmatmul.mubr.bf16.gmra.mrb[72].mxu1 %v6731_v37  ;;  %v1113_v6 = vmul.f32 0.01, %v6569_v49  ;;  %v1114_v4 = vmul.f32 0.01, %v6572_v35 }
 0x1e8   : > { %5081 = vmatprep.mubr.bf16.mxu1 %v6799_v14  ;;  %v6843_v3 = vsel %vm1079_vm8, %v6563_v28, %v1111_v54  ;;  %vm1083_vm12 = vcmp.ge.f32.partialorder %v6575_v55, 0.0  ;;  %vm1084_vm14 = vcmp.ge.f32.partialorder %v6578_v61, 0.0  ;;  %5110 = vmatpush3.bf16.msra.mxu1 %v5829_v46  ;;  %v6849_v39 = vsel %vm1080_vm9, %v6566_v30, %v1112_v33  ;;  %v5832_v28 = vld [vmem:[%s8595_s2 + $0x30] sm:$0xff]  }
 0x1e9   : > { %v1182_v0 = vrot.slane %v6843_v3, 7  ;;  %v6854_v56 = vsel %vm1081_vm10, %v6569_v49, %v1113_v6  ;;  %5111 = vmatprep.subr.bf16.mxu1 %v5831_v16  ;;  %v8605_v54 = vrot.slane %v6849_v39, 7  ;;  %v6862_v46 = vpack.c.bf16 %v6849_v39, %v6843_v3  ;;  %v5820_v49 = vld [vmem:[%s8595_s2 + $0x128] sm:$0xff]  }
 0x1ea   : > { %5252 = vmatpush3.bf16.msra.mxu0 %v5818_v7  ;;  %v6868_v33 = vsel %vm1082_vm11, %v6572_v35, %v1114_v4  ;;  %v1115_v53 = vmul.f32 0.01, %v6575_v55  ;;  %v1116_v6 = vmul.f32 0.01, %v6578_v61  ;;  %vm1085_vm15 = vcmp.ge.f32.partialorder %v6581_v62, 0.0 }
 0x1eb   : > { %5253 = vmatprep.subr.bf16.mxu0 %v5819_v13  ;;  %v1215_v7 = vsel %vm1199_vm7, %v1181_v50, %v1182_v0  ;;  %v6879_v30 = vpack.c.bf16 %v6868_v33, %v6854_v56  ;;  %v1214_v35 = vsel %vm1199_vm7, %v1182_v0, %v8605_v54  ;;  %vm1086_vm0 = vcmp.ge.f32.partialorder %v6584_v1, 0.0  ;;  %v5834_v0 = vld [vmem:[%s8595_s2 + $0x38] sm:$0xff]  }
 0x1ec   : > { %5112 = vmatpush3.bf16.msra.mxu1 %v5831_v16  ;;  %v6891_v50 = vpack.c.bf16 %v1214_v35, %v1215_v7  ;;  %v6905_v16 = vsel %vm1083_vm12, %v6575_v55, %v1115_v53  ;;  %v1117_v7 = vmul.f32 0.01, %v6581_v62  ;;  %v1118_v35 = vmul.f32 0.01, %v6584_v1 }
 0x1ed   : > { %5222 = vmatmul.mubr.msk.bf16.gmra.mrb[8].mxu0 %vm6680_vm3, %v6828_v24  ;;  %5113 = vmatprep.subr.bf16.mxu1 %v5832_v28  ;;  %vm1087_vm1 = vcmp.ge.f32.partialorder %v6587_v5, 0.0  ;;  %v6917_v38 = vsel %vm1084_vm14, %v6578_v61, %v1116_v6  ;;  %vm1088_vm4 = vcmp.ge.f32.partialorder %v6590_v25, 0.0  ;;  %v1119_v4 = vmul.f32 0.01, %v6587_v5 }
 0x1ee   : > { %8635 = vst [vmem:[#allocation10_spill] sm:$0xff] %v6891_v50  ;;  %5254 = vmatpush3.bf16.msra.mxu0 %v5819_v13  ;;  %5225 = vmatprep.mubr.msk.bf16.mxu0 %vm6680_vm3, %v6830_v44  ;;  %v5821_v13 = vld [vmem:[%s8595_s2 + $0x130] sm:$0xff]   ;;  %v6926_v54 = vpack.c.bf16 %v6917_v38, %v6905_v16  ;;  %v6932_v61 = vsel %vm1085_vm15, %v6581_v62, %v1117_v7  ;;  %v1120_v7 = vmul.f32 0.01, %v6590_v25  ;;  %vm1089_vm5 = vcmp.ge.f32.partialorder %v6593_v26, 0.0  ;;  %v5827_v44 = vld [vmem:[%s8595_s2 + $0x148] sm:$0xff]  }
 0x1ef   : > { %5255 = vmatprep.subr.bf16.mxu0 %v5820_v49  ;;  %5082 = vmatmul.mubr.bf16.gmra.mrb[76].mxu1 %v6816_v34  ;;  %v6937_v6 = vsel %vm1086_vm0, %v6584_v1, %v1118_v35  ;;  %v5822_v35 = vld [vmem:[%s8595_s2 + $0x138] sm:$0xff]   ;;  %v6960_v55 = vsel %vm1087_vm1, %v6587_v5, %v1119_v4  ;;  %vm1090_vm6 = vcmp.ge.f32.partialorder %v6596_v36, 0.0  ;;  %v1122_v48 = vmul.f32 0.01, %v6596_v36 }
 0x1f0   : > { %5085 = vmatprep.mubr.bf16.mxu1 %v6862_v46  ;;  %5114 = vmatpush3.bf16.msra.mxu1 %v5832_v28  ;;  %v6950_v28 = vpack.c.bf16 %v6937_v6, %v6932_v61  ;;  %v6968_v1 = vsel %vm1088_vm4, %v6590_v25, %v1120_v7  ;;  %vm1091_vm8 = vcmp.ge.f32.partialorder %v6599_v40, 0.0  ;;  %vm1092_vm9 = vcmp.ge.f32.partialorder %v6608_v15, 0.0 }
 0x1f1   : > { %5115 = vmatprep.subr.bf16.mxu1 %v5834_v0  ;;  %v6979_v4 = vpack.c.bf16 %v6968_v1, %v6960_v55  ;;  %vm1093_vm10 = vcmp.ge.f32.partialorder %v6612_v58, 0.0  ;;  %vm1094_vm11 = vcmp.ge.f32.partialorder %v6484_v32, 0.0  ;;  %v1125_v25 = vmul.f32 0.01, %v6612_v58 }
 0x1f2   : > { %5256 = vmatpush3.bf16.msra.mxu0 %v5820_v49  ;;  %v1121_v49 = vmul.f32 0.01, %v6593_v26  ;;  %v1126_v53 = vmul.f32 0.01, %v6484_v32  ;;  %vm1095_vm12 = vcmp.ge.f32.partialorder %v6602_v42, 0.0  ;;  %v8646_v24 = vrot.slane %v6905_v16, 7 }
 0x1f3   : > { %5257 = vmatprep.subr.bf16.mxu0 %v5821_v13  ;;  %8636 = vst [vmem:[#allocation11_spill] sm:$0xff] %v6979_v4  ;;  %v1127_v5 = vmul.f32 0.01, %v6602_v42  ;;  %v8650_v2 = vrot.slane %v6621_v59, 1 }
 0x1f4   : > { %5116 = vmatpush3.bf16.msra.mxu1 %v5834_v0  ;;  %v6983_v7 = vsel %vm1089_vm5, %v6593_v26, %v1121_v49  ;;  %v6988_v0 = vsel %vm1090_vm6, %v6596_v36, %v1122_v48  ;;  %v5824_v26 = vld [vmem:[%s8595_s2 + $0x140] sm:$0xff]   ;;  %v1123_v36 = vmul.f32 0.01, %v6599_v40  ;;  %v1124_v49 = vmul.f32 0.01, %v6608_v15 }
 0x1f5   : > { %5226 = vmatmul.mubr.msk.bf16.gmra.mrb[12].mxu0 %vm6680_vm3, %v6891_v50  ;;  %5149 = vmatprep.subr.bf16.mxu1 %v6945_v47  ;;  %v1743_v50 = vrot.slane %v6618_v57, 1  ;;  %v7037_v57 = vsel %vm1093_vm10, %v6612_v58, %v1125_v25  ;;  %v5830_v25 = vld [vmem:[%s8595_s2 + $0x150] sm:$0xff]  }
 0x1f6   : > { %5258 = vmatpush3.bf16.msra.mxu0 %v5821_v13  ;;  %5261 = vmatprep.mubr.bf16.mxu0 %v6641_v20  ;;  %v7000_v20 = vpack.c.bf16 %v6988_v0, %v6983_v7  ;;  %v7016_v62 = vsel %vm1091_vm8, %v6599_v40, %v1123_v36  ;;  %v7019_v13 = vsel %vm1092_vm9, %v6608_v15, %v1124_v49  ;;  %v8640_v15 = vrot.slane %v6868_v33, 7 }
 0x1f7   : > { %5259 = vmatprep.subr.bf16.mxu0 %v5822_v35  ;;  %5086 = vmatmul.mubr.bf16.gmra.mrb[80].mxu1 %v6879_v30  ;;  %v1194_v48 = vrot.slane %v7016_v62, 7  ;;  %v7030_v40 = vpack.c.bf16 %v7019_v13, %v7016_v62  ;;  %v7042_v49 = vsel %vm1094_vm11, %v6484_v32, %v1126_v53  ;;  %v8641_v36 = vrot.slane %v6854_v56, 7 }
 0x1f8   : > { %5089 = vmatprep.mubr.bf16.mxu1 %v6926_v54  ;;  %v7054_v58 = vpack.c.bf16 %v7042_v49, %v7037_v57 }
 0x1fa   : > { %5260 = vmatpush3.bf16.msra.mxu0 %v5822_v35  ;;  %v7047_v35 = vsel %vm1095_vm12, %v6602_v42, %v1127_v5  ;;  %v8639_v42 = vrot.slane %v6615_v12, 1 }
 0x1fb   : > { %5293 = vmatprep.subr.bf16.mxu0 %v5824_v26  ;;  %v7063_v5 = vpack.c.bf16 %v6656_v9, %v7047_v35 }
 0x1fc   : > { %v1803_v53 = vsel %vm1773_vm13, %v8639_v42, %v1743_v50  ;;  %v8645_v42 = vrot.slane %v6917_v38, 7 }
 0x1fd   : > { %5262 = vmatmul.mubr.bf16.vlgmr.msra.gmra.mrb[0].mxu0 %v6666_v10  ;;  %8637 = vst [vmem:[#allocation12_spill] sm:$0xff] %v7063_v5  ;;  %v1747_v10 = vrot.slane %v6624_v60, 1  ;;  %v8644_v5 = vrot.slane %v6849_v39, 7  ;;  %v8647_v60 = vmov %v8646_v24 }
 0x1fe   : > { %5294 = vmatpush3.bf16.msra.mxu0 %v5824_v26  ;;  %5265 = vmatprep.mubr.bf16.mxu0 %v6713_v23  ;;  %v8638_v26 = vrot.slane %v6654_v8, 1  ;;  %v1212_v23 = vsel %vm1199_vm7, %v8641_v36, %v8640_v15  ;;  %v1210_v15 = vsel %vm1199_vm7, %v8646_v24, %v8645_v42 }
 0x1ff   : > { %5090 = vmatmul.mubr.bf16.gmra.mrb[84].mxu1 %v6950_v28  ;;  %5295 = vmatprep.subr.bf16.mxu0 %v5827_v44  ;;  %v1799_v24 = vsel %vm1773_vm13, %v8650_v2, %v1747_v10  ;;  %v8656_v2 = vrot.slane %v6960_v55, 7 }
 0x200   : > { %v1802_v32 = vsel %vm1773_vm13, %v1743_v50, %v8638_v26  ;;  %5093 = vmatprep.mubr.bf16.mxu1 %v6979_v4  ;;  %v8643_v26 = vmov %v8641_v36  ;;  %v8648_v36 = vrot.slane %v6868_v33, 7  ;;  %v8651_v4 = vrot.slane %v6937_v6, 7 }
 0x201   : > { %v7085_v8 = vpack.c.bf16 %v1802_v32, %v1803_v53  ;;  %v1213_v50 = vsel %vm1199_vm7, %v8644_v5, %v8643_v26  ;;  %v8649_v5 = vrot.slane %v6741_v22, 1 }
 0x202   : > { %v1211_v32 = vsel %vm1199_vm7, %v8648_v36, %v8647_v60  ;;  %v7105_v53 = vpack.c.bf16 %v1212_v23, %v1213_v50  ;;  %5296 = vmatpush3.bf16.msra.mxu0 %v5827_v44  ;;  %v8652_v23 = vrot.slane %v6932_v61, 7  ;;  %v8654_v60 = vrot.slane %v6917_v38, 7  ;;  %v5833_v44 = vld [vmem:[%s8595_s2 + $0x158] sm:$0xff]  }
 0x203   : > { %8642 = vst [vmem:[#allocation13_spill] sm:$0xff] %v7085_v8  ;;  %v7107_v8 = vpack.c.bf16 %v1210_v15, %v1211_v32  ;;  %v1798_v26 = vsel %vm1773_vm13, %v1747_v10, %v8649_v5  ;;  %v8655_v36 = vrot.slane %v6968_v1, 7  ;;  %5297 = vmatprep.subr.bf16.mxu0 %v5830_v25  ;;  %v8657_v32 = vmov %v8656_v2 }
 0x204   : > { %v7117_v42 = vpack.c.bf16 %v1798_v26, %v1799_v24  ;;  %v1208_v50 = vsel %vm1199_vm7, %v8652_v23, %v8651_v4  ;;  %v8653_v15 = vmov %v8652_v23  ;;  %v8658_v5 = vrot.slane %v6937_v6, 7 }
 0x205   : > { %v1209_v59 = vsel %vm1199_vm7, %v8654_v60, %v8653_v15  ;;  %v1206_v10 = vsel %vm1199_vm7, %v8656_v2, %v8655_v36  ;;  %v1750_v24 = vrot.slane %v6627_v21, 1  ;;  %v8659_v23 = vrot.slane %v6750_v45, 1  ;;  %5266 = vmatmul.mubr.bf16.gmra.mrb[4].mxu0 %v6762_v11 }
 0x206   : > { %v7140_v4 = vpack.c.bf16 %v1208_v50, %v1209_v59  ;;  %v1207_v26 = vsel %vm1199_vm7, %v8658_v5, %v8657_v32  ;;  %v8660_v15 = vrot.slane %v6741_v22, 1  ;;  %v1751_v50 = vrot.slane %v6630_v51, 1  ;;  %5269 = vmatprep.mubr.bf16.mxu0 %v6731_v37  ;;  %5298 = vmatpush3.bf16.msra.mxu0 %v5830_v25 }
 0x207   : > { %v7155_v36 = vpack.c.bf16 %v1206_v10, %v1207_v26  ;;  %v8661_v59 = vrot.slane %v6988_v0, 7  ;;  %v8662_v2 = vrot.slane %v6983_v7, 7  ;;  %v8664_v5 = vrot.slane %v6968_v1, 7  ;;  %5094 = vmatmul.mubr.bf16.gmra.mrb[88].mxu1 %v7000_v20  ;;  %5299 = vmatprep.subr.bf16.mxu0 %v5833_v44 }
 0x208   : > { %v1797_v60 = vsel %vm1773_vm13, %v8660_v15, %v8659_v23  ;;  %v8665_v10 = vmov %v8659_v23  ;;  %v8666_v23 = vrot.slane %v7019_v13, 7  ;;  %v8667_v45 = vrot.slane %v6771_v31, 1  ;;  %5097 = vmatprep.mubr.bf16.mxu1 %v7030_v40 }
 0x209   : > { %v1204_v32 = vsel %vm1199_vm7, %v8662_v2, %v8661_v59  ;;  %v8663_v21 = vmov %v8662_v2  ;;  %v1796_v51 = vsel %vm1773_vm13, %v8665_v10, %v1750_v24  ;;  %v1203_v2 = vsel %vm1199_vm7, %v8661_v59, %v1194_v48 }
 0x20a   : > { %v1205_v22 = vsel %vm1199_vm7, %v8664_v5, %v8663_v21  ;;  %v1202_v15 = vsel %vm1199_vm7, %v1194_v48, %v8666_v23  ;;  %v7186_v21 = vpack.c.bf16 %v1796_v51, %v1797_v60  ;;  %v1795_v5 = vsel %vm1773_vm13, %v1750_v24, %v1751_v50  ;;  %v5835_v48 = vld [vmem:[%s8595_s2 + $0x160] sm:$0xff]   ;;  %5300 = vmatpush3.bf16.msra.mxu0 %v5833_v44 }
 0x20b   : > { %v7175_v26 = vpack.c.bf16 %v1204_v32, %v1205_v22  ;;  %v1794_v32 = vsel %vm1773_vm13, %v1751_v50, %v8667_v45  ;;  %v1754_v22 = vrot.slane %v6633_v19, 1  ;;  %v7201_v60 = vpack.c.bf16 %v1202_v15, %v1203_v2  ;;  %5301 = vmatprep.subr.bf16.mxu0 %v5835_v48 }
 0x20c   : > { %v7199_v25 = vpack.c.bf16 %v1794_v32, %v1795_v5  ;;  %v8668_v10 = vrot.slane %v6786_v18, 1  ;;  %v8669_v51 = vmov %v8667_v45  ;;  %v1755_v19 = vrot.slane %v6636_v63, 1 }
 0x20d   : > { %v8671_v59 = vrot.slane %v7042_v49, 7  ;;  %v8672_v15 = vrot.slane %v7037_v57, 7  ;;  %v8674_v45 = vrot.slane %v7019_v13, 7  ;;  %v8675_v32 = vrot.slane %v6854_v56, 1  ;;  %5270 = vmatmul.mubr.bf16.gmra.mrb[8].mxu0 %v6799_v14 }
 0x20e   : > { %v1793_v24 = vsel %vm1773_vm13, %v8669_v51, %v8668_v10  ;;  %v8670_v50 = vmov %v8668_v10  ;;  %v8676_v18 = vrot.slane %v6849_v39, 1  ;;  %v8677_v51 = vrot.slane %v6843_v3, 1  ;;  %v5836_v3 = vld [vmem:[%s8595_s2 + $0x168] sm:$0xff]   ;;  %5273 = vmatprep.mubr.bf16.mxu0 %v6816_v34  ;;  %5302 = vmatpush3.bf16.msra.mxu0 %v5835_v48 }
 0x20f   : > { %v1792_v23 = vsel %vm1773_vm13, %v8670_v50, %v1754_v22  ;;  %v1200_v2 = vsel %vm1199_vm7, %v8672_v15, %v8671_v59  ;;  %v8673_v31 = vmov %v8672_v15  ;;  %v1791_v59 = vsel %vm1773_vm13, %v1754_v22, %v1755_v19  ;;  %5098 = vmatmul.mubr.bf16.gmra.mrb[92].mxu1 %v7054_v58  ;;  %5303 = vmatprep.subr.bf16.mxu0 %v5836_v3 }
 0x210   : > { %v1201_v63 = vsel %vm1199_vm7, %v8674_v45, %v8673_v31  ;;  %v1788_v5 = vsel %vm1773_vm13, %v8676_v18, %v8675_v32  ;;  %v7233_v10 = vpack.c.bf16 %v1792_v23, %v1793_v24  ;;  %v1790_v50 = vsel %vm1773_vm13, %v1755_v19, %v8677_v51 }
 0x211   : > { %v7241_v15 = vpack.c.bf16 %v1200_v2, %v1201_v63  ;;  %v7243_v31 = vpack.c.bf16 %v1790_v50, %v1791_v59  ;;  %v8678_v45 = vmov %v8676_v18  ;;  %v8679_v37 = vmov %v8677_v51 }
 0x212   : > { %v1789_v24 = vsel %vm1773_vm13, %v8679_v37, %v8678_v45  ;;  %v8680_v23 = vrot.slane %v6905_v16, 1  ;;  %v8681_v32 = vrot.slane %v6868_v33, 1  ;;  %v8683_v44 = vrot.slane %v6854_v56, 1  ;;  %5304 = vmatpush3.bf16.msra.mxu0 %v5836_v3  ;;  %v5847_v3 = vld [vmem:[%s8595_s2 + $0xa8] sm:$0xff]  }
 0x213   : > { %v7266_v37 = vpack.c.bf16 %v1788_v5, %v1789_v24  ;;  %v8684_v2 = vrot.slane %v6932_v61, 1  ;;  %v8685_v63 = vrot.slane %v6917_v38, 1  ;;  %v8688_v5 = vrot.slane %v6960_v55, 1 }
 0x214   : > { %v1786_v18 = vsel %vm1773_vm13, %v8681_v32, %v8680_v23  ;;  %v8682_v22 = vmov %v8681_v32  ;;  %v8687_v51 = vmov %v8680_v23  ;;  %v8689_v45 = vrot.slane %v6937_v6, 1 }
 0x215   : > { %v1787_v19 = vsel %vm1773_vm13, %v8683_v44, %v8682_v22  ;;  %v1784_v33 = vsel %vm1773_vm13, %v8685_v63, %v8684_v2  ;;  %v8686_v56 = vmov %v8685_v63  ;;  %v8691_v32 = vmov %v8684_v2  ;;  %5274 = vmatmul.mubr.bf16.gmra.mrb[12].mxu0 %v6862_v46 }
 0x216   : > { %v7268_v39 = vpack.c.bf16 %v1786_v18, %v1787_v19  ;;  %v1785_v50 = vsel %vm1773_vm13, %v8687_v51, %v8686_v56  ;;  %v1782_v24 = vsel %vm1773_vm13, %v8689_v45, %v8688_v5  ;;  %v8690_v23 = vmov %v8689_v45  ;;  %5277 = vmatprep.mubr.bf16.mxu0 %v6879_v30 }
 0x217   : > { %v7282_v59 = vpack.c.bf16 %v1784_v33, %v1785_v50  ;;  %v1783_v38 = vsel %vm1773_vm13, %v8691_v32, %v8690_v23  ;;  %v8692_v16 = vrot.slane %v6983_v7, 1  ;;  %v8693_v18 = vrot.slane %v6968_v1, 1  ;;  %v5837_v7 = vld [vmem:[%s8595_s2 + $0x170] sm:$0xff]  }
 0x218   : > { %v7303_v44 = vpack.c.bf16 %v1782_v24, %v1783_v38  ;;  %v8695_v6 = vmov %v8688_v5  ;;  %v8696_v2 = vrot.slane %v7016_v62, 1  ;;  %v8697_v63 = vrot.slane %v6988_v0, 1  ;;  %5305 = vmatprep.subr.bf16.mxu0 %v5837_v7 }
 0x219   : > { %v1780_v22 = vsel %vm1773_vm13, %v8693_v18, %v8692_v16  ;;  %v8694_v19 = vmov %v8693_v18  ;;  %v8699_v51 = vmov %v8692_v16  ;;  %v8700_v5 = vrot.slane %v7037_v57, 1  ;;  %5306 = vmatpush3.bf16.msra.mxu0 %v5837_v7  ;;  %v8718_v7 = vld [vmem:[#allocation7_spill] sm:$0xff] }
 0x21a   : > { %v1781_v61 = vsel %vm1773_vm13, %v8695_v6, %v8694_v19  ;;  %v1778_v33 = vsel %vm1773_vm13, %v8697_v63, %v8696_v2  ;;  %v8698_v56 = vmov %v8697_v63  ;;  %v8701_v45 = vrot.slane %v7019_v13, 1 }
 0x21b   : > { %v1779_v50 = vsel %vm1773_vm13, %v8699_v51, %v8698_v56  ;;  %v7324_v55 = vpack.c.bf16 %v1780_v22, %v1781_v61  ;;  %v8703_v48 = vmov %v8696_v2  ;;  %v8704_v32 = vrot.slane %v7047_v35, 1 }
 0x21c   : > { %v7326_v1 = vpack.c.bf16 %v1778_v33, %v1779_v50  ;;  %v1776_v24 = vsel %vm1773_vm13, %v8701_v45, %v8700_v5  ;;  %v8702_v0 = vmov %v8701_v45  ;;  %v8705_v38 = vrot.slane %v7042_v49, 1 }
 0x21d   : > { %v1777_v23 = vsel %vm1773_vm13, %v8703_v48, %v8702_v0  ;;  %v8707_v22 = vmov %v8700_v5  ;;  %v8708_v13 = vmov 0.0|0.0   ;;  %v8709_v61 = vrot.slane %v6656_v9, 1  ;;  %5278 = vmatmul.mubr.bf16.gmra.mrb[16].mxu0 %v6926_v54 }
 0x21e   : > { %v1774_v16 = vsel %vm1773_vm13, %v8705_v38, %v8704_v32  ;;  %v8706_v18 = vmov %v8705_v38  ;;  %5117 = vmatprep.mubr.bf16.mxu1 %v8708_v13  ;;  %v7357_v62 = vpack.c.bf16 %v1776_v24, %v1777_v23  ;;  %v8710_v2 = vmov %v8704_v32  ;;  %v5841_v23 = vld [vmem:[%s8595_s2 + $0x88] sm:$0xff]   ;;  %5281 = vmatprep.mubr.bf16.mxu0 %v6950_v28  ;;  %v8719_v32 = vld [vmem:[#allocation8_spill] sm:$0xff] }
 0x21f   : > { %v1775_v19 = vsel %vm1773_vm13, %v8707_v22, %v8706_v18  ;;  %v2631_v63 = vsel %vm1773_vm13, %v8710_v2, %v8709_v61  ;;  %v8711_v33 = vrot.slane %v6615_v12, 1  ;;  %v8712_v57 = vmov %v8709_v61  ;;  %5118 = vmatmul.mubr.msk.bf16.vlgmr.msra.gmra.mrb[64].mxu1 %vm6680_vm3, %v6698_v52  ;;  %v5844_v52 = vld [vmem:[%s8595_s2 + $0x98] sm:$0xff]   ;;  %v5848_v38 = vld [vmem:[%s8595_s2 + $0xb0] sm:$0xff]   ;;  %v8721_v22 = vld [vmem:[#allocation10_spill] sm:$0xff] }
 0x220   : > { %v7359_v6 = vpack.c.bf16 %v1774_v16, %v1775_v19  ;;  %v8713_v50 = vrot.slane %v6656_v9, 7  ;;  %v8714_v5 = vrot.slane %v7047_v35, 7  ;;  %v8716_v0 = vrot.slane %v7042_v49, 7  ;;  %v5838_v9 = vld [vmem:[%s8595_s2 + $0x178] sm:$0xff]   ;;  %5121 = vmatprep.mubr.msk.bf16.mxu1 %vm6680_vm3, %v6704_v27  ;;  %5150 = vmatpush3.bf16.msra.mxu1 %v6945_v47  ;;  %v5842_v35 = vld [vmem:[%s8595_s2 + $0x90] sm:$0xff]   ;;  %v5845_v47 = vld [vmem:[%s8595_s2 + $0xa0] sm:$0xff]  }
 0x221   : > { %v2632_v56 = vsel %vm1773_vm13, %v8712_v57, %v8711_v33  ;;  %5307 = vmatprep.subr.bf16.mxu0 %v5838_v9  ;;  %5151 = vmatprep.subr.bf16.mxu1 %v5841_v23  ;;  %v8717_v49 = vld [vmem:[#allocation11_spill] sm:$0xff]  ;;  %v5850_v16 = vld [vmem:[%s8595_s2 + $0xb8] sm:$0xff]   ;;  %v8722_v19 = vld [vmem:[#allocation12_spill] sm:$0xff] }
 0x222   : > { %v7373_v51 = vpack.c.bf16 %v2632_v56, %v2631_v63  ;;  %v2108_v45 = vsel %vm1199_vm7, %v8714_v5, %v8713_v50  ;;  %v8715_v24 = vmov %v8714_v5  ;;  %5308 = vmatpush3.bf16.msra.mxu0 %v5838_v9  ;;  %v8720_v18 = vld [vmem:[#allocation9_spill] sm:$0xff]  ;;  %v5875_v61 = vld [vmem:[%s8595_s2 + $0xc0] sm:$0xff]   ;;  %v5843_v33 = vld [vmem:[%s8595_s2 + $0x188] sm:$0xff]  }
 0x223   : > { %v2109_v12 = vsel %vm1199_vm7, %v8716_v0, %v8715_v24  ;;  %5341 = vmatprep.subr.bf16.mxu0 %v5840_v17  ;;  %v8723_v2 = vld [vmem:[#allocation13_spill] sm:$0xff]  ;;  %v8725_v57 = vld [vmem:[#allocation4_spill] sm:$0xff]  ;;  %v5851_v5 = vld [vmem:[%s8595_s2 + $0x1a0] sm:$0xff]  }
 0x224   : > { %v7387_v48 = vpack.c.bf16 %v2108_v45, %v2109_v12  ;;  %5152 = vmatpush3.bf16.msra.mxu1 %v5841_v23  ;;  %v5846_v56 = vld [vmem:[%s8595_s2 + $0x190] sm:$0xff]   ;;  %v5849_v50 = vld [vmem:[%s8595_s2 + $0x198] sm:$0xff]   ;;  %v5852_v45 = vld [vmem:[%s8595_s2 + $0x1a8] sm:$0xff]  }
 0x225   : > { %5153 = vmatprep.subr.bf16.mxu1 %v5842_v35  ;;  %5282 = vmatmul.mubr.bf16.gmra.mrb[20].mxu0 %v8717_v49  ;;  %v5853_v24 = vld [vmem:[%s8595_s2 + $0x1b0] sm:$0xff]   ;;  %v5854_v0 = vld [vmem:[%s8595_s2 + $0x1b8] sm:$0xff]   ;;  %v5855_v12 = vld [vmem:[%s8595_s2 + $0x1c0] sm:$0xff]  }
 0x226   : > { %5285 = vmatprep.mubr.bf16.mxu0 %v7000_v20  ;;  %v5876_v9 = vld [vmem:[%s8595_s2 + $0xc8] sm:$0xff]   ;;  %v5877_v23 = vld [vmem:[%s8595_s2 + $0xd0] sm:$0xff]  }
 0x227   : > { %5122 = vmatmul.mubr.msk.bf16.gmra.mrb[68].mxu1 %vm6680_vm3, %v6718_v29 }
 0x228   : > { %5125 = vmatprep.mubr.msk.bf16.mxu1 %vm6680_vm3, %v6789_v41  ;;  %5154 = vmatpush3.bf16.msra.mxu1 %v5842_v35  ;;  %v5879_v35 = vld [vmem:[%s8595_s2 + $0xe0] sm:$0xff]  }
 0x229   : > { %5155 = vmatprep.subr.bf16.mxu1 %v5844_v52 }
 0x22c   : > { %5156 = vmatpush3.bf16.msra.mxu1 %v5844_v52  ;;  %v7562_v52 = vpop.f32.mrb[32].mxu1 }
 0x22d   : > { %5157 = vmatprep.subr.bf16.mxu1 %v5845_v47  ;;  %5286 = vmatmul.mubr.bf16.gmra.mrb[24].mxu0 %v7030_v40 }
 0x22e   : > { %5289 = vmatprep.mubr.bf16.mxu0 %v7054_v58 }
 0x22f   : > { %5126 = vmatmul.mubr.msk.bf16.gmra.mrb[72].mxu1 %vm6680_vm3, %v8718_v7 }
 0x230   : > { %5129 = vmatprep.mubr.msk.bf16.mxu1 %vm6680_vm3, %v8719_v32  ;;  %5158 = vmatpush3.bf16.msra.mxu1 %v5845_v47  ;;  %v5880_v47 = vld [vmem:[%s8595_s2 + $0xe8] sm:$0xff]  }
 0x231   : > { %5159 = vmatprep.subr.bf16.mxu1 %v5847_v3 }
 0x234   : > { %5160 = vmatpush3.bf16.msra.mxu1 %v5847_v3  ;;  %v5881_v3 = vld [vmem:[%s8595_s2 + $0xf0] sm:$0xff]  }
 0x235   : > { %5161 = vmatprep.subr.bf16.mxu1 %v5848_v38  ;;  %5290 = vmatmul.mubr.bf16.gmra.mrb[28].mxu0 %v8722_v19 }
 0x236   : > { %5309 = vmatprep.mubr.msk.bf16.mxu0 %vm6397_vm2, %v8723_v2 }
 0x237   : > { %5130 = vmatmul.mubr.msk.bf16.gmra.mrb[76].mxu1 %vm6680_vm3, %v8720_v18 }
 0x238   : > { %5133 = vmatprep.mubr.msk.bf16.mxu1 %vm6680_vm3, %v8721_v22  ;;  %5162 = vmatpush3.bf16.msra.mxu1 %v5848_v38  ;;  %v7579_v38 = vpop.f32.mrb[33].mxu1 }
 0x239   : > { %5163 = vmatprep.subr.bf16.mxu1 %v5850_v16 }
 0x23c   : > { %5164 = vmatpush3.bf16.msra.mxu1 %v5850_v16  ;;  %v7584_v16 = vpop.f32.mrb[34].mxu1 }
 0x23d   : > { %5485 = vmatprep.subr.bf16.mxu1 %v5875_v61  ;;  %5310 = vmatmul.mubr.msk.bf16.vlgmr.msra.gmra.mrb[0].mxu0 %vm6397_vm2, %v8725_v57 }
 0x23e   : > { %5342 = vmatpush3.bf16.msra.mxu0 %v5840_v17  ;;  %5313 = vmatprep.mubr.msk.bf16.mxu0 %vm6397_vm2, %v7117_v42  ;;  %v5878_v17 = vld [vmem:[%s8595_s2 + $0xd8] sm:$0xff]  }
 0x23f   : > { %5134 = vmatmul.mubr.msk.bf16.gmra.mrb[80].mxu1 %vm6680_vm3, %v7105_v53  ;;  %5343 = vmatprep.subr.bf16.mxu0 %v5843_v33 }
 0x240   : > { %5137 = vmatprep.mubr.msk.bf16.mxu1 %vm6680_vm3, %v7107_v8 }
 0x242   : > { %5344 = vmatpush3.bf16.msra.mxu0 %v5843_v33  ;;  %v5882_v33 = vld [vmem:[%s8595_s2 + $0xf8] sm:$0xff]  }
 0x243   : > { %5345 = vmatprep.subr.bf16.mxu0 %v5846_v56 }
 0x245   : > { %5314 = vmatmul.mubr.msk.bf16.gmra.mrb[4].mxu0 %vm6397_vm2, %v7186_v21 }
 0x246   : > { %5317 = vmatprep.mubr.msk.bf16.mxu0 %vm6397_vm2, %v7199_v25  ;;  %5346 = vmatpush3.bf16.msra.mxu0 %v5846_v56 }
 0x247   : > { %5138 = vmatmul.mubr.msk.bf16.gmra.mrb[84].mxu1 %vm6680_vm3, %v7140_v4  ;;  %5347 = vmatprep.subr.bf16.mxu0 %v5849_v50 }
 0x248   : > { %5141 = vmatprep.mubr.msk.bf16.mxu1 %vm6680_vm3, %v7155_v36 }
 0x24a   : > { %5348 = vmatpush3.bf16.msra.mxu0 %v5849_v50 }
 0x24b   : > { %5349 = vmatprep.subr.bf16.mxu0 %v5851_v5 }
 0x24d   : > { %5318 = vmatmul.mubr.msk.bf16.gmra.mrb[8].mxu0 %vm6397_vm2, %v7233_v10 }
 0x24e   : > { %5321 = vmatprep.mubr.msk.bf16.mxu0 %vm6397_vm2, %v7243_v31  ;;  %5350 = vmatpush3.bf16.msra.mxu0 %v5851_v5 }
 0x24f   : > { %5142 = vmatmul.mubr.msk.bf16.gmra.mrb[88].mxu1 %vm6680_vm3, %v7175_v26  ;;  %5351 = vmatprep.subr.bf16.mxu0 %v5852_v45 }
 0x250   : > { %5145 = vmatprep.mubr.msk.bf16.mxu1 %vm6680_vm3, %v7201_v60 }
 0x252   : > { %5352 = vmatpush3.bf16.msra.mxu0 %v5852_v45 }
 0x253   : > { %5353 = vmatprep.subr.bf16.mxu0 %v5853_v24 }
 0x255   : > { %5322 = vmatmul.mubr.msk.bf16.gmra.mrb[12].mxu0 %vm6397_vm2, %v7266_v37 }
 0x256   : > { %5325 = vmatprep.mubr.msk.bf16.mxu0 %vm6397_vm2, %v7268_v39  ;;  %5354 = vmatpush3.bf16.msra.mxu0 %v5853_v24  ;;  %v5856_v24 = vld [vmem:[%s8595_s2 + $0x1c8] sm:$0xff]  }
 0x257   : > { %5146 = vmatmul.mubr.msk.bf16.gmra.mrb[92].mxu1 %vm6680_vm3, %v7241_v15  ;;  %5355 = vmatprep.subr.bf16.mxu0 %v5854_v0 }
 0x258   : > { %5165 = vmatprep.mubr.bf16.mxu1 %v8708_v13 }
 0x25a   : > { %5356 = vmatpush3.bf16.msra.mxu0 %v5854_v0 }
 0x25b   : > { %5389 = vmatprep.subr.bf16.mxu0 %v5855_v12 }
 0x25d   : > { %5326 = vmatmul.mubr.msk.bf16.gmra.mrb[16].mxu0 %vm6397_vm2, %v7282_v59 }
 0x25e   : > { %5329 = vmatprep.mubr.msk.bf16.mxu0 %vm6397_vm2, %v7303_v44 }
 0x25f   : > { %5166 = vmatmul.mubr.msk.bf16.vlgmr.msra.gmra.mrb[64].mxu1 %vm6397_vm2, %v8723_v2 }
 0x260   : > { %5169 = vmatprep.mubr.msk.bf16.mxu1 %vm6397_vm2, %v8725_v57  ;;  %5493 = vmatpush3.bf16.msra.mxu1 %v5875_v61  ;;  %v7589_v61 = vpop.f32.mrb[35].mxu1 }
 0x261   : > { %5486 = vmatprep.subr.bf16.mxu1 %v5876_v9  ;;  %v7594_v2 = vpop.f32.mrb[36].mxu1 }
 0x262   : > { %v7602_v56 = vpop.f32.mrb[37].mxu1 }
 0x263   : > { %v7607_v50 = vpop.f32.mrb[38].mxu1 }
 0x264   : > { %5494 = vmatpush3.bf16.msra.mxu1 %v5876_v9  ;;  %v7612_v5 = vpop.f32.mrb[39].mxu1  ;;  %v5857_v9 = vld [vmem:[%s8595_s2 + $0x1d0] sm:$0xff]  }
 0x265   : > { %5487 = vmatprep.subr.bf16.mxu1 %v5877_v23  ;;  %5330 = vmatmul.mubr.msk.bf16.gmra.mrb[20].mxu0 %vm6397_vm2, %v7324_v55  ;;  %v7617_v45 = vpop.f32.mrb[40].mxu1 }
 0x266   : > { %5333 = vmatprep.mubr.msk.bf16.mxu0 %vm6397_vm2, %v7326_v1 }
 0x267   : > { %5170 = vmatmul.mubr.msk.bf16.gmra.mrb[68].mxu1 %vm6397_vm2, %v7117_v42 }
 0x268   : > { %5173 = vmatprep.mubr.msk.bf16.mxu1 %vm6397_vm2, %v7186_v21  ;;  %5495 = vmatpush3.bf16.msra.mxu1 %v5877_v23 }
 0x269   : > { %5488 = vmatprep.subr.bf16.mxu1 %v5878_v17 }
 0x26c   : > { %5496 = vmatpush3.bf16.msra.mxu1 %v5878_v17 }
 0x26d   : > { %5489 = vmatprep.subr.bf16.mxu1 %v5879_v35  ;;  %5334 = vmatmul.mubr.msk.bf16.gmra.mrb[24].mxu0 %vm6397_vm2, %v7357_v62 }
 0x26e   : > { %5337 = vmatprep.mubr.msk.bf16.mxu0 %vm6397_vm2, %v7359_v6 }
 0x26f   : > { %5174 = vmatmul.mubr.msk.bf16.gmra.mrb[72].mxu1 %vm6397_vm2, %v7199_v25 }
 0x270   : > { %5177 = vmatprep.mubr.msk.bf16.mxu1 %vm6397_vm2, %v7233_v10  ;;  %5497 = vmatpush3.bf16.msra.mxu1 %v5879_v35  ;;  %v5859_v35 = vld [vmem:[%s8595_s2 + $0x1e0] sm:$0xff]  }
 0x271   : > { %5490 = vmatprep.subr.bf16.mxu1 %v5880_v47 }
 0x274   : > { %5498 = vmatpush3.bf16.msra.mxu1 %v5880_v47 }
 0x275   : > { %5491 = vmatprep.subr.bf16.mxu1 %v5881_v3  ;;  %5338 = vmatmul.mubr.msk.bf16.gmra.mrb[28].mxu0 %vm6397_vm2, %v7373_v51 }
 0x276   : > { %5357 = vmatprep.mubr.msk.bf16.mxu0 %vm6680_vm3, %v6704_v27  ;;  %v7625_v27 = vpop.f32.mrb[41].mxu1 }
 0x277   : > { %5178 = vmatmul.mubr.msk.bf16.gmra.mrb[76].mxu1 %vm6397_vm2, %v7243_v31  ;;  %v7630_v0 = vpop.f32.mrb[42].mxu1 }
 0x278   : > { %5181 = vmatprep.mubr.msk.bf16.mxu1 %vm6397_vm2, %v7266_v37  ;;  %5499 = vmatpush3.bf16.msra.mxu1 %v5881_v3  ;;  %v7638_v23 = vpop.f32.mrb[43].mxu1 }
 0x279   : > { %5492 = vmatprep.subr.bf16.mxu1 %v5882_v33 }
 0x27c   : > { %5500 = vmatpush3.bf16.msra.mxu1 %v5882_v33 }
 0x27d   : > { %5358 = vmatmul.mubr.msk.bf16.vlgmr.msra.gmra.mrb[0].mxu0 %vm6680_vm3, %v6718_v29  ;;  %v7643_v29 = vpop.f32.mrb[44].mxu1 }
 0x27e   : > { %5390 = vmatpush3.bf16.msra.mxu0 %v5855_v12  ;;  %5361 = vmatprep.mubr.msk.bf16.mxu0 %vm6680_vm3, %v6789_v41  ;;  %v5858_v41 = vld [vmem:[%s8595_s2 + $0x1d8] sm:$0xff]   ;;  %v7651_v12 = vpop.f32.mrb[45].mxu1 }
 0x27f   : > { %5182 = vmatmul.mubr.msk.bf16.gmra.mrb[80].mxu1 %vm6397_vm2, %v7268_v39  ;;  %5391 = vmatprep.subr.bf16.mxu0 %v5856_v24  ;;  %8726 = vst [vmem:[#allocation11_spill] sm:$0xff] %v7651_v12  ;;  %v7656_v17 = vpop.f32.mrb[46].mxu1 }
 0x280   : > { %5185 = vmatprep.mubr.msk.bf16.mxu1 %vm6397_vm2, %v7282_v59  ;;  %8727 = vst [vmem:[#allocation7_spill] sm:$0xff] %v7656_v17  ;;  %v7664_v47 = vpop.f32.mrb[47].mxu1 }
 0x281   : > { %8728 = vst [vmem:[#allocation8_spill] sm:$0xff] %v7664_v47 }
 0x282   : > { %5392 = vmatpush3.bf16.msra.mxu0 %v5856_v24  ;;  %v5861_v24 = vld [vmem:[%s8595_s2 + $0x1f0] sm:$0xff]  }
 0x283   : > { %5393 = vmatprep.subr.bf16.mxu0 %v5857_v9 }
 0x285   : > { %5362 = vmatmul.mubr.msk.bf16.gmra.mrb[4].mxu0 %vm6680_vm3, %v8718_v7  ;;  %v7669_v7 = vpop.f32.mrb[48].mxu1 }
 0x286   : > { %5365 = vmatprep.mubr.msk.bf16.mxu0 %vm6680_vm3, %v8719_v32  ;;  %5394 = vmatpush3.bf16.msra.mxu0 %v5857_v9  ;;  %8729 = vst [vmem:[#allocation9_spill] sm:$0xff] %v7669_v7  ;;  %v5860_v32 = vld [vmem:[%s8595_s2 + $0x1e8] sm:$0xff]   ;;  %v7677_v3 = vpop.f32.mrb[49].mxu1 }
 0x287   : > { %5186 = vmatmul.mubr.msk.bf16.gmra.mrb[84].mxu1 %vm6397_vm2, %v7303_v44  ;;  %5395 = vmatprep.subr.bf16.mxu0 %v5858_v41  ;;  %8730 = vst [vmem:[#allocation10_spill] sm:$0xff] %v7677_v3  ;;  %v7682_v33 = vpop.f32.mrb[50].mxu1 }
 0x288   : > { %5189 = vmatprep.mubr.msk.bf16.mxu1 %vm6397_vm2, %v7324_v55  ;;  %8731 = vst [vmem:[#allocation12_spill] sm:$0xff] %v7682_v33  ;;  %v7690_v9 = vpop.f32.mrb[51].mxu1 }
 0x289   : > { %8732 = vst [vmem:[#allocation13_spill] sm:$0xff] %v7690_v9 }
 0x28a   : > { %5396 = vmatpush3.bf16.msra.mxu0 %v5858_v41 }
 0x28b   : > { %5397 = vmatprep.subr.bf16.mxu0 %v5859_v35 }
 0x28d   : > { %5366 = vmatmul.mubr.msk.bf16.gmra.mrb[8].mxu0 %vm6680_vm3, %v8720_v18  ;;  %v7695_v18 = vpop.f32.mrb[52].mxu1 }
 0x28e   : > { %5369 = vmatprep.mubr.msk.bf16.mxu0 %vm6680_vm3, %v8721_v22  ;;  %5398 = vmatpush3.bf16.msra.mxu0 %v5859_v35  ;;  %8733 = vst [vmem:[#allocation2_spill] sm:$0xff] %v7695_v18  ;;  %v5862_v22 = vld [vmem:[%s8595_s2 + $0x1f8] sm:$0xff]   ;;  %v7703_v41 = vpop.f32.mrb[53].mxu1 }
 0x28f   : > { %5190 = vmatmul.mubr.msk.bf16.gmra.mrb[88].mxu1 %vm6397_vm2, %v7326_v1  ;;  %5399 = vmatprep.subr.bf16.mxu0 %v5860_v32  ;;  %8734 = vst [vmem:[#allocation4_spill] sm:$0xff] %v7703_v41  ;;  %v7708_v35 = vpop.f32.mrb[54].mxu1 }
 0x290   : > { %5193 = vmatprep.mubr.msk.bf16.mxu1 %vm6397_vm2, %v7357_v62  ;;  %8735 = vst [vmem:[#allocation14_spill] sm:$0xff] %v7708_v35  ;;  %v7716_v18 = vpop.f32.mrb[55].mxu1 }
 0x291   : > { %8736 = vst [vmem:[#allocation15_spill] sm:$0xff] %v7716_v18 }
 0x292   : > { %5400 = vmatpush3.bf16.msra.mxu0 %v5860_v32  ;;  %v5863_v32 = vld [vmem:[%s8595_s2 + $0x200] sm:$0xff]  }
 0x293   : > { %5401 = vmatprep.subr.bf16.mxu0 %v5861_v24 }
 0x295   : > { %5370 = vmatmul.mubr.msk.bf16.gmra.mrb[12].mxu0 %vm6680_vm3, %v7105_v53 }
 0x296   : > { %5373 = vmatprep.mubr.msk.bf16.mxu0 %vm6680_vm3, %v7107_v8  ;;  %5402 = vmatpush3.bf16.msra.mxu0 %v5861_v24 }
 0x297   : > { %5194 = vmatmul.mubr.msk.bf16.gmra.mrb[92].mxu1 %vm6397_vm2, %v7359_v6  ;;  %5403 = vmatprep.subr.bf16.mxu0 %v5862_v22 }
 0x298   : > { %5229 = vmatprep.mubr.msk.bf16.mxu1 %vm6680_vm3, %v7105_v53  ;;  %v7721_v53 = vpop.f32.mrb[56].mxu1 }
 0x299   : > { %8737 = vst [vmem:[#allocation16_spill] sm:$0xff] %v7721_v53 }
 0x29a   : > { %5404 = vmatpush3.bf16.msra.mxu0 %v5862_v22 }
 0x29b   : > { %5437 = vmatprep.subr.bf16.mxu0 %v5863_v32 }
 0x29d   : > { %5374 = vmatmul.mubr.msk.bf16.gmra.mrb[16].mxu0 %vm6680_vm3, %v7140_v4 }
 0x29e   : > { %5377 = vmatprep.mubr.msk.bf16.mxu0 %vm6680_vm3, %v7155_v36 }
 0x29f   : > { %5230 = vmatmul.mubr.msk.bf16.vlgmr.msra.gmra.mrb[80].mxu1 %vm6680_vm3, %v7107_v8  ;;  %v7726_v8 = vpop.f32.mrb[57].mxu1 }
 0x2a0   : > { %5233 = vmatprep.mubr.msk.bf16.mxu1 %vm6680_vm3, %v7140_v4  ;;  %8738 = vst [vmem:[#allocation17_spill] sm:$0xff] %v7726_v8  ;;  %v7731_v24 = vpop.f32.mrb[58].mxu1 }
 0x2a1   : > { %8739 = vst [vmem:[#allocation18_spill] sm:$0xff] %v7731_v24  ;;  %v7736_v18 = vpop.f32.mrb[59].mxu1 }
 0x2a2   : > { %8740 = vst [vmem:[#allocation19_spill] sm:$0xff] %v7736_v18  ;;  %v7741_v22 = vpop.f32.mrb[60].mxu1 }
 0x2a3   : > { %8741 = vst [vmem:[#allocation20_spill] sm:$0xff] %v7741_v22  ;;  %v7746_v4 = vpop.f32.mrb[61].mxu1 }
 0x2a4   : > { %8742 = vst [vmem:[#allocation21_spill] sm:$0xff] %v7746_v4  ;;  %v7751_v24 = vpop.f32.mrb[62].mxu1  ;;  %v7897_v4 = vld [vmem:[%s8597_s4 + $0x3] ss:$0 sm:$0xff] }
 0x2a5   : > { %5378 = vmatmul.mubr.msk.bf16.gmra.mrb[20].mxu0 %vm6680_vm3, %v7175_v26  ;;  %8743 = vst [vmem:[#allocation22_spill] sm:$0xff] %v7751_v24 }
 0x2a6   : > { %5381 = vmatprep.mubr.msk.bf16.mxu0 %vm6680_vm3, %v7201_v60 }
 0x2a7   : > { %5234 = vmatmul.mubr.msk.bf16.gmra.mrb[84].mxu1 %vm6680_vm3, %v7155_v36  ;;  %v7756_v36 = vpop.f32.mrb[63].mxu1 }
 0x2a8   : > { %5237 = vmatprep.mubr.msk.bf16.mxu1 %vm6680_vm3, %v7175_v26  ;;  %8744 = vst [vmem:[#allocation23_spill] sm:$0xff] %v7756_v36  ;;  %v8745_v26 = vld [vmem:[#allocation3_spill] sm:$0xff]  ;;  %v8746_v36 = vld [vmem:[#allocation5_spill] sm:$0xff] }
 0x2ad   : > { %5382 = vmatmul.mubr.msk.bf16.gmra.mrb[24].mxu0 %vm6680_vm3, %v7241_v15 }
 0x2ae   : > { %5385 = vmatprep.mubr.msk.bf16.mxu0 %vm6680_vm3, %v7387_v48 }
 0x2af   : > { %5238 = vmatmul.mubr.msk.bf16.gmra.mrb[88].mxu1 %vm6680_vm3, %v7201_v60  ;;  %v5864_v60 = vld [vmem:[%s8595_s2 + $0x208] sm:$0xff]  }
 0x2b0   : > { %5241 = vmatprep.mubr.msk.bf16.mxu1 %vm6680_vm3, %v7241_v15  ;;  %v5865_v15 = vld [vmem:[%s8595_s2 + $0x210] sm:$0xff]  }
 0x2b5   : > { %5386 = vmatmul.mubr.bf16.gmra.mrb[28].mxu0 %v8708_v13 }
 0x2b6   : > { %5405 = vmatprep.mubr.bf16.mxu0 %v8745_v26 }
 0x2b7   : > { %5242 = vmatmul.mubr.msk.bf16.gmra.mrb[92].mxu1 %vm6680_vm3, %v7387_v48  ;;  %v8747_v48 = vld [vmem:[#allocation6_spill] sm:$0xff] }
 0x2bd   : > { %5406 = vmatmul.mubr.bf16.vlgmr.msra.gmra.mrb[0].mxu0 %v8746_v36  ;;  %v5870_v36 = vld [vmem:[%s8595_s2 + $0x238] sm:$0xff]  }
 0x2be   : > { %5438 = vmatpush3.bf16.msra.mxu0 %v5863_v32  ;;  %5409 = vmatprep.mubr.bf16.mxu0 %v6762_v11  ;;  %v5867_v11 = vld [vmem:[%s8595_s2 + $0x220] sm:$0xff]   ;;  %v5868_v32 = vld [vmem:[%s8595_s2 + $0x228] sm:$0xff]  }
 0x2bf   : > { %5439 = vmatprep.subr.bf16.mxu0 %v5864_v60 }
 0x2c2   : > { %5440 = vmatpush3.bf16.msra.mxu0 %v5864_v60 }
 0x2c3   : > { %5441 = vmatprep.subr.bf16.mxu0 %v5865_v15 }
 0x2c5   : > { %5410 = vmatmul.mubr.bf16.gmra.mrb[4].mxu0 %v8747_v48 }
 0x2c6   : > { %5413 = vmatprep.mubr.bf16.mxu0 %v6799_v14  ;;  %5442 = vmatpush3.bf16.msra.mxu0 %v5865_v15  ;;  %v5869_v14 = vld [vmem:[%s8595_s2 + $0x230] sm:$0xff]  }
 0x2c7   : > { %5443 = vmatprep.subr.bf16.mxu0 %v5866_v43 }
 0x2ca   : > { %5444 = vmatpush3.bf16.msra.mxu0 %v5866_v43 }
 0x2cb   : > { %5445 = vmatprep.subr.bf16.mxu0 %v5867_v11 }
 0x2cd   : > { %5414 = vmatmul.mubr.bf16.gmra.mrb[8].mxu0 %v6816_v34 }
 0x2ce   : > { %5417 = vmatprep.mubr.bf16.mxu0 %v6862_v46  ;;  %5446 = vmatpush3.bf16.msra.mxu0 %v5867_v11 }
 0x2cf   : > { %5447 = vmatprep.subr.bf16.mxu0 %v5868_v32 }
 0x2d2   : > { %5448 = vmatpush3.bf16.msra.mxu0 %v5868_v32 }
 0x2d3   : > { %5449 = vmatprep.subr.bf16.mxu0 %v5869_v14 }
 0x2d5   : > { %5418 = vmatmul.mubr.bf16.gmra.mrb[12].mxu0 %v6879_v30 }
 0x2d6   : > { %5421 = vmatprep.mubr.bf16.mxu0 %v6926_v54  ;;  %5450 = vmatpush3.bf16.msra.mxu0 %v5869_v14 }
 0x2d7   : > { %5451 = vmatprep.subr.bf16.mxu0 %v5870_v36 }
 0x2da   : > { %5452 = vmatpush3.bf16.msra.mxu0 %v5870_v36 }
 0x2dd   : > { %5422 = vmatmul.mubr.bf16.gmra.mrb[16].mxu0 %v6950_v28 }
 0x2de   : > { %5425 = vmatprep.mubr.bf16.mxu0 %v8717_v49 }
 0x2e5   : > { %5426 = vmatmul.mubr.bf16.gmra.mrb[20].mxu0 %v7000_v20 }
 0x2e6   : > { %5429 = vmatprep.mubr.bf16.mxu0 %v7030_v40 }
 0x2ed   : > { %5430 = vmatmul.mubr.bf16.gmra.mrb[24].mxu0 %v7054_v58 }
 0x2ee   : > { %5433 = vmatprep.mubr.bf16.mxu0 %v8722_v19 }
 0x2f5   : > { %5434 = vmatmul.mubr.bf16.gmra.mrb[28].mxu0 %v8708_v13 }
 0x2f6   : > { %5453 = vmatprep.mubr.msk.bf16.mxu0 %vm6397_vm2, %v8725_v57 }
 0x2fd   : > { %5454 = vmatmul.mubr.msk.bf16.vlgmr.msra.gmra.mrb[0].mxu0 %vm6397_vm2, %v7117_v42 }
 0x2fe   : > { %5457 = vmatprep.mubr.msk.bf16.mxu0 %vm6397_vm2, %v7186_v21 }
 0x305   : > { %5458 = vmatmul.mubr.msk.bf16.gmra.mrb[4].mxu0 %vm6397_vm2, %v7199_v25 }
 0x306   : > { %5461 = vmatprep.mubr.msk.bf16.mxu0 %vm6397_vm2, %v7233_v10 }
 0x30d   : > { %5462 = vmatmul.mubr.msk.bf16.gmra.mrb[8].mxu0 %vm6397_vm2, %v7243_v31 }
 0x30e   : > { %5465 = vmatprep.mubr.msk.bf16.mxu0 %vm6397_vm2, %v7266_v37 }
 0x315   : > { %5466 = vmatmul.mubr.msk.bf16.gmra.mrb[12].mxu0 %vm6397_vm2, %v7268_v39 }
 0x316   : > { %5469 = vmatprep.mubr.msk.bf16.mxu0 %vm6397_vm2, %v7282_v59 }
 0x31d   : > { %5470 = vmatmul.mubr.msk.bf16.gmra.mrb[16].mxu0 %vm6397_vm2, %v7303_v44 }
 0x31e   : > { %5473 = vmatprep.mubr.msk.bf16.mxu0 %vm6397_vm2, %v7324_v55 }
 0x325   : > { %5474 = vmatmul.mubr.msk.bf16.gmra.mrb[20].mxu0 %vm6397_vm2, %v7326_v1 }
 0x326   : > { %5477 = vmatprep.mubr.msk.bf16.mxu0 %vm6397_vm2, %v7357_v62 }
 0x32d   : > { %5478 = vmatmul.mubr.msk.bf16.gmra.mrb[24].mxu0 %vm6397_vm2, %v7359_v6 }
 0x32e   : > { %5481 = vmatprep.mubr.msk.bf16.mxu0 %vm6397_vm2, %v7373_v51 }
 0x332   : > { %v5167_v34 = vpop.f32.mrb[64].mxu1 }
 0x333   : > { %v1948_v54 = vpop.f32.mrb[65].mxu1 }
 0x334   : > { %v5168_v46 = vpop.f32.mrb[66].mxu1 }
 0x335   : > { %v1951_v30 = vpop.f32.mrb[67].mxu1  ;;  %5482 = vmatmul.mubr.bf16.gmra.mrb[28].mxu0 %v8708_v13 }
 0x33a   : > { %v5171_v28 = vpop.f32.mrb[68].mxu1 }
 0x33b   : > { %v1964_v20 = vpop.f32.mrb[69].mxu1 }
 0x33c   : > { %v5172_v40 = vpop.f32.mrb[70].mxu1 }
 0x33d   : > { %v1967_v58 = vpop.f32.mrb[71].mxu1 }
 0x342   : > { %v5175_v42 = vpop.f32.mrb[72].mxu1 }
 0x343   : > { %v1980_v21 = vpop.f32.mrb[73].mxu1 }
 0x344   : > { %v5176_v25 = vpop.f32.mrb[74].mxu1 }
 0x345   : > { %v1983_v10 = vpop.f32.mrb[75].mxu1 }
 0x34a   : > { %v7854_v31 = vpop.f32.mrb[76].mxu1 }
 0x34b   : > { %v7856_v37 = vpop.f32.mrb[77].mxu1 }
 0x34c   : > { %v7858_v39 = vpop.f32.mrb[78].mxu1 }
 0x34d   : > { %v7860_v59 = vpop.f32.mrb[79].mxu1 }
 0x372   : > { %v7862_v44 = vpop.f32.mrb[80].mxu1 }
 0x373   : > { %v7864_v55 = vpop.f32.mrb[81].mxu1 }
 0x374   : > { %v7866_v1 = vpop.f32.mrb[82].mxu1 }
 0x375   : > { %v7868_v13 = vpop.f32.mrb[83].mxu1 }
 0x37a   : > { %v7870_v62 = vpop.f32.mrb[84].mxu1 }
 0x37b   : > { %v7872_v6 = vpop.f32.mrb[85].mxu1 }
 0x37c   : > { %v7874_v51 = vpop.f32.mrb[86].mxu1 }
 0x37d   : > { %v7876_v49 = vpop.f32.mrb[87].mxu1 }
 0x382   : > { %v7878_v19 = vpop.f32.mrb[88].mxu1 }
 0x383   : > { %v7880_v63 = vpop.f32.mrb[89].mxu1 }
 0x384   : > { %v7882_v57 = vpop.f32.mrb[90].mxu1 }
 0x385   : > { %v7884_v26 = vpop.f32.mrb[91].mxu1 }
 0x38a   : > { %v7886_v60 = vpop.f32.mrb[92].mxu1 }
 0x38b   : > { %v7888_v15 = vpop.f32.mrb[93].mxu1 }
 0x38c   : > { %v7890_v43 = vpop.f32.mrb[94].mxu1 }
 0x38d   : > { %v7892_v48 = vpop.f32.mrb[95].mxu1 }
 0x3d0   : > { %v5455_v11 = vpop.f32.mrb[0].mxu0 }
 0x3d1   : > { %v5501_v32 = vadd.f32 %v5455_v11, %v5167_v34  ;;  %v3509_v14 = vpop.f32.mrb[1].mxu0 }
 0x3d2   : > { %v5502_v36 = vadd.f32 %v3509_v14, %v1948_v54  ;;  %v5456_v24 = vpop.f32.mrb[2].mxu0 }
 0x3d3   : > { %v5503_v22 = vadd.f32 %v5456_v24, %v5168_v46  ;;  %v3512_v18 = vpop.f32.mrb[3].mxu0  ;;  %v7906_v41 = vadd.f32 %v5501_v32, %v7897_v4 }
 0x3d4   : > { %v5504_v8 = vadd.f32 %v3512_v18, %v1951_v30  ;;  %v7900_v53 = vadd.f32 %v5502_v36, %v7897_v4 }
 0x3d5   : > { %v7911_v9 = vadd.f32 %v5503_v22, %v7897_v4 }
 0x3d6   : > { %v7903_v35 = vadd.f32 %v5504_v8, %v7897_v4 }
 0x3d8   : > { %v3704_v34 = vadd.f32 %v7903_v35, %v7900_v53  ;;  %v5459_v54 = vpop.f32.mrb[4].mxu0 }
 0x3d9   : > { %v5505_v11 = vadd.f32 %v5459_v54, %v5171_v28  ;;  %v3525_v14 = vpop.f32.mrb[5].mxu0 }
 0x3da   : > { %v3705_v18 = vadd.f32 %v3704_v34, %v7906_v41  ;;  %v5506_v24 = vadd.f32 %v3525_v14, %v1964_v20  ;;  %v5460_v46 = vpop.f32.mrb[6].mxu0 }
 0x3db   : > { %v5507_v30 = vadd.f32 %v5460_v46, %v5172_v40  ;;  %v3528_v36 = vpop.f32.mrb[7].mxu0  ;;  %v7923_v22 = vadd.f32 %v5505_v11, %v7897_v4 }
 0x3dc   : > { %v7915_v8 = vadd.f32 %v5506_v24, %v7897_v4  ;;  %v3706_v32 = vadd.f32 %v3705_v18, %v7911_v9  ;;  %v5508_v33 = vadd.f32 %v3528_v36, %v1967_v58 }
 0x3dd   : > { %v7927_v14 = vadd.f32 %v5507_v30, %v7897_v4 }
 0x3de   : > { %v3707_v3 = vadd.f32 %v3706_v32, %v7915_v8  ;;  %v7920_v28 = vadd.f32 %v5508_v33, %v7897_v4 }
 0x3e0   : > { %v3708_v34 = vadd.f32 %v3707_v3, %v7920_v28  ;;  %v5463_v20 = vpop.f32.mrb[8].mxu0 }
 0x3e1   : > { %v5509_v54 = vadd.f32 %v5463_v20, %v5175_v42  ;;  %v3541_v40 = vpop.f32.mrb[9].mxu0 }
 0x3e2   : > { %v3709_v24 = vadd.f32 %v3708_v34, %v7923_v22  ;;  %v5510_v18 = vadd.f32 %v3541_v40, %v1980_v21  ;;  %v5464_v58 = vpop.f32.mrb[10].mxu0 }
 0x3e3   : > { %v5511_v46 = vadd.f32 %v5464_v58, %v5176_v25  ;;  %v3544_v36 = vpop.f32.mrb[11].mxu0  ;;  %v7939_v30 = vadd.f32 %v5509_v54, %v7897_v4 }
 0x3e4   : > { %v7931_v33 = vadd.f32 %v5510_v18, %v7897_v4  ;;  %v3710_v11 = vadd.f32 %v3709_v24, %v7927_v14  ;;  %v5512_v32 = vadd.f32 %v3544_v36, %v1983_v10 }
 0x3e5   : > { %v7944_v40 = vadd.f32 %v5511_v46, %v7897_v4 }
 0x3e6   : > { %v3711_v3 = vadd.f32 %v3710_v11, %v7931_v33  ;;  %v7936_v42 = vadd.f32 %v5512_v32, %v7897_v4 }
 0x3e8   : > { %v3712_v34 = vadd.f32 %v3711_v3, %v7936_v42  ;;  %v5467_v21 = vpop.f32.mrb[12].mxu0 }
 0x3e9   : > { %v5513_v25 = vadd.f32 %v5467_v21, %v7854_v31  ;;  %v3557_v20 = vpop.f32.mrb[13].mxu0 }
 0x3ea   : > { %v3713_v24 = vadd.f32 %v3712_v34, %v7939_v30  ;;  %v5514_v10 = vadd.f32 %v3557_v20, %v7856_v37  ;;  %v5468_v18 = vpop.f32.mrb[14].mxu0 }
 0x3eb   : > { %v5515_v58 = vadd.f32 %v5468_v18, %v7858_v39  ;;  %v3560_v36 = vpop.f32.mrb[15].mxu0  ;;  %v7959_v3 = vadd.f32 %v5513_v25, %v7897_v4 }
 0x3ec   : > { %v7950_v54 = vadd.f32 %v5514_v10, %v7897_v4  ;;  %v3714_v11 = vadd.f32 %v3713_v24, %v7944_v40  ;;  %v5516_v32 = vadd.f32 %v3560_v36, %v7860_v59 }
 0x3ed   : > { %v7964_v20 = vadd.f32 %v5515_v58, %v7897_v4 }
 0x3ee   : > { %v3715_v31 = vadd.f32 %v3714_v11, %v7950_v54  ;;  %v7956_v46 = vadd.f32 %v5516_v32, %v7897_v4 }
 0x3f0   : > { %v3716_v37 = vadd.f32 %v3715_v31, %v7956_v46  ;;  %v5471_v34 = vpop.f32.mrb[16].mxu0 }
 0x3f1   : > { %v5517_v39 = vadd.f32 %v5471_v34, %v7862_v44  ;;  %v3573_v21 = vpop.f32.mrb[17].mxu0 }
 0x3f2   : > { %v3717_v24 = vadd.f32 %v3716_v37, %v7959_v3  ;;  %v5518_v59 = vadd.f32 %v3573_v21, %v7864_v55  ;;  %v5472_v10 = vpop.f32.mrb[18].mxu0 }
 0x3f3   : > { %v5519_v18 = vadd.f32 %v5472_v10, %v7866_v1  ;;  %v3576_v36 = vpop.f32.mrb[19].mxu0  ;;  %v7979_v31 = vadd.f32 %v5517_v39, %v7897_v4 }
 0x3f4   : > { %v7970_v25 = vadd.f32 %v5518_v59, %v7897_v4  ;;  %v3718_v11 = vadd.f32 %v3717_v24, %v7964_v20  ;;  %v5520_v32 = vadd.f32 %v3576_v36, %v7868_v13 }
 0x3f5   : > { %v7984_v21 = vadd.f32 %v5519_v18, %v7897_v4 }
 0x3f6   : > { %v3719_v44 = vadd.f32 %v3718_v11, %v7970_v25  ;;  %v7976_v58 = vadd.f32 %v5520_v32, %v7897_v4 }
 0x3f8   : > { %v3720_v55 = vadd.f32 %v3719_v44, %v7976_v58  ;;  %v5475_v37 = vpop.f32.mrb[20].mxu0 }
 0x3f9   : > { %v5521_v1 = vadd.f32 %v5475_v37, %v7870_v62  ;;  %v3589_v34 = vpop.f32.mrb[21].mxu0 }
 0x3fa   : > { %v3721_v24 = vadd.f32 %v3720_v55, %v7979_v31  ;;  %v5522_v13 = vadd.f32 %v3589_v34, %v7872_v6  ;;  %v5476_v59 = vpop.f32.mrb[22].mxu0 }
 0x3fb   : > { %v5523_v10 = vadd.f32 %v5476_v59, %v7874_v51  ;;  %v3592_v36 = vpop.f32.mrb[23].mxu0  ;;  %v3694_v18 = vadd.f32 %v5521_v1, %v7897_v4 }
 0x3fc   : > { %v3692_v39 = vadd.f32 %v5522_v13, %v7897_v4  ;;  %v3722_v11 = vadd.f32 %v3721_v24, %v7984_v21  ;;  %v5524_v32 = vadd.f32 %v3592_v36, %v7876_v49 }
 0x3fd   : > { %v3695_v34 = vadd.f32 %v5523_v10, %v7897_v4 }
 0x3fe   : > { %v3723_v44 = vadd.f32 %v3722_v11, %v3692_v39  ;;  %v3693_v62 = vadd.f32 %v5524_v32, %v7897_v4 }
 0x400   : > { %v3724_v37 = vadd.f32 %v3723_v44, %v3693_v62  ;;  %v5479_v7 = vpop.f32.mrb[24].mxu0 }
 0x401   : > { %v5525_v55 = vadd.f32 %v5479_v7, %v7878_v19  ;;  %v3605_v6 = vpop.f32.mrb[25].mxu0 }
 0x402   : > { %v3725_v51 = vadd.f32 %v3724_v37, %v3694_v18  ;;  %v5526_v59 = vadd.f32 %v3605_v6, %v7880_v63  ;;  %v5480_v13 = vpop.f32.mrb[26].mxu0 }
 0x403   : > { %v5527_v24 = vadd.f32 %v5480_v13, %v7882_v57  ;;  %v3608_v47 = vpop.f32.mrb[27].mxu0  ;;  %v3698_v7 = vadd.f32 %v5525_v55, %v7897_v4 }
 0x404   : > { %v3696_v49 = vadd.f32 %v5526_v59, %v7897_v4  ;;  %v3726_v36 = vadd.f32 %v3725_v51, %v3695_v34  ;;  %v5528_v11 = vadd.f32 %v3608_v47, %v7884_v26 }
 0x405   : > { %v3699_v63 = vadd.f32 %v5527_v24, %v7897_v4 }
 0x406   : > { %v3727_v1 = vadd.f32 %v3726_v36, %v3696_v49  ;;  %v3697_v32 = vadd.f32 %v5528_v11, %v7897_v4 }
 0x408   : > { %v3728_v19 = vadd.f32 %v3727_v1, %v3697_v32  ;;  %v5483_v44 = vpop.f32.mrb[28].mxu0 }
 0x409   : > { %v5529_v10 = vadd.f32 %v5483_v44, %v7886_v60  ;;  %v3621_v37 = vpop.f32.mrb[29].mxu0 }
 0x40a   : > { %v3729_v6 = vadd.f32 %v3728_v19, %v3698_v7  ;;  %v5530_v57 = vadd.f32 %v3621_v37, %v7888_v15  ;;  %v5484_v13 = vpop.f32.mrb[30].mxu0 }
 0x40b   : > { %v5531_v51 = vadd.f32 %v5484_v13, %v7890_v43  ;;  %v3624_v59 = vpop.f32.mrb[31].mxu0  ;;  %v3702_v60 = vadd.f32 %v5529_v10, %v7897_v4 }
 0x40c   : > { %v3700_v47 = vadd.f32 %v5530_v57, %v7897_v4  ;;  %v3730_v26 = vadd.f32 %v3729_v6, %v3699_v63  ;;  %v5532_v36 = vadd.f32 %v3624_v59, %v7892_v48 }
 0x40d   : > { %v3703_v24 = vadd.f32 %v5531_v51, %v7897_v4 }
 0x40e   : > { %v3731_v55 = vadd.f32 %v3730_v26, %v3700_v47  ;;  %v3701_v11 = vadd.f32 %v5532_v36, %v7897_v4 }
 0x410   : > { %v3732_v1 = vadd.f32 %v3731_v55, %v3701_v11 }
 0x412   : > { %v3733_v19 = vadd.f32 %v3732_v1, %v3702_v60 }
 0x414   : > { %v3734_v44 = vadd.f32 %v3733_v19, %v3703_v24 }
 0x416   : > { %v3735_v15 = vrot.slane %v3734_v44, 4 }
 0x418   : > { %v3736_v37 = vadd.f32 %v3735_v15, %v3734_v44 }
 0x41a   : > { %v3737_v17 = vrot.slane %v3736_v37, 2 }
 0x41c   : > { %v3738_v43 = vadd.f32 %v3737_v17, %v3736_v37 }
 0x41e   : > { %v3739_v13 = vrot.slane %v3738_v43, 1 }
 0x420   : > { %v3740_v12 = vadd.f32 %v3739_v13, %v3738_v43 }
 0x422   : > { %v3741_v57 = vmul.f32 0.00390625, %v3740_v12 }
 0x424   : > { %v8012_v6 = vsub.f32 %v7931_v33, %v3741_v57  ;;  %v8015_v48 = vsub.f32 %v7936_v42, %v3741_v57  ;;  %v8018_v10 = vsub.f32 %v7939_v30, %v3741_v57  ;;  %v8021_v4 = vsub.f32 %v7944_v40, %v3741_v57 }
 0x425   : > { %v8024_v51 = vsub.f32 %v7950_v54, %v3741_v57  ;;  %v8027_v17 = vsub.f32 %v7956_v46, %v3741_v57  ;;  %v8030_v12 = vsub.f32 %v7959_v3, %v3741_v57  ;;  %v8033_v33 = vsub.f32 %v7964_v20, %v3741_v57 }
 0x426   : > { %v8036_v42 = vsub.f32 %v7970_v25, %v3741_v57  ;;  %v8039_v30 = vsub.f32 %v7976_v58, %v3741_v57  ;;  %v8042_v40 = vsub.f32 %v7979_v31, %v3741_v57  ;;  %v8045_v54 = vsub.f32 %v7984_v21, %v3741_v57 }
 0x427   : > { %v8047_v46 = vsub.f32 %v3692_v39, %v3741_v57  ;;  %v8049_v59 = vsub.f32 %v3693_v62, %v3741_v57  ;;  %v8051_v3 = vsub.f32 %v3694_v18, %v3741_v57  ;;  %v8053_v20 = vsub.f32 %v3695_v34, %v3741_v57 }
 0x428   : > { %v8055_v26 = vsub.f32 %v3696_v49, %v3741_v57  ;;  %v8057_v25 = vsub.f32 %v3697_v32, %v3741_v57  ;;  %v8059_v58 = vsub.f32 %v3698_v7, %v3741_v57  ;;  %v8061_v36 = vsub.f32 %v3699_v63, %v3741_v57 }
 0x429   : > { %v8063_v31 = vsub.f32 %v3700_v47, %v3741_v57  ;;  %v8065_v21 = vsub.f32 %v3701_v11, %v3741_v57  ;;  %v8067_v39 = vsub.f32 %v3702_v60, %v3741_v57  ;;  %v8069_v62 = vsub.f32 %v3703_v24, %v3741_v57 }
 0x42a   : > { %v8072_v18 = vsub.f32 %v7900_v53, %v3741_v57  ;;  %v8075_v34 = vsub.f32 %v7903_v35, %v3741_v57  ;;  %v8078_v49 = vsub.f32 %v7906_v41, %v3741_v57  ;;  %v8085_v63 = vsub.f32 %v7911_v9, %v3741_v57 }
 0x42b   : > { %v8088_v47 = vsub.f32 %v7915_v8, %v3741_v57  ;;  %v8093_v55 = vsub.f32 %v7920_v28, %v3741_v57  ;;  %v8098_v60 = vsub.f32 %v7923_v22, %v3741_v57  ;;  %v8103_v8 = vsub.f32 %v7927_v14, %v3741_v57 }
 0x42c   : > { %v3774_v32 = vmul.f32 %v8072_v18, %v8072_v18  ;;  %v3775_v7 = vmul.f32 %v8075_v34, %v8075_v34  ;;  %v3776_v53 = vmul.f32 %v8078_v49, %v8078_v49  ;;  %v3777_v41 = vmul.f32 %v8085_v63, %v8085_v63 }
 0x42d   : > { %v3778_v9 = vmul.f32 %v8088_v47, %v8088_v47  ;;  %v3779_v24 = vmul.f32 %v8093_v55, %v8093_v55  ;;  %v3780_v28 = vmul.f32 %v8098_v60, %v8098_v60  ;;  %v3781_v15 = vmul.f32 %v8103_v8, %v8103_v8 }
 0x42e   : > { %v3806_v35 = vadd.f32 %v3775_v7, %v3774_v32  ;;  %v3782_v37 = vmul.f32 %v8012_v6, %v8012_v6  ;;  %v3783_v14 = vmul.f32 %v8015_v48, %v8015_v48  ;;  %v3784_v57 = vmul.f32 %v8018_v10, %v8018_v10 }
 0x42f   : > { %v3785_v7 = vmul.f32 %v8021_v4, %v8021_v4 }
 0x430   : > { %v3807_v11 = vadd.f32 %v3806_v35, %v3776_v53  ;;  %v3786_v35 = vmul.f32 %v8024_v51, %v8024_v51 }
 0x432   : > { %v3808_v1 = vadd.f32 %v3807_v11, %v3777_v41  ;;  %v3787_v11 = vmul.f32 %v8027_v17, %v8027_v17 }
 0x434   : > { %v3809_v19 = vadd.f32 %v3808_v1, %v3778_v9  ;;  %v3788_v1 = vmul.f32 %v8030_v12, %v8030_v12 }
 0x436   : > { %v3810_v44 = vadd.f32 %v3809_v19, %v3779_v24  ;;  %v3789_v19 = vmul.f32 %v8033_v33, %v8033_v33 }
 0x438   : > { %v3811_v22 = vadd.f32 %v3810_v44, %v3780_v28  ;;  %v3790_v44 = vmul.f32 %v8036_v42, %v8036_v42 }
 0x43a   : > { %v3812_v43 = vadd.f32 %v3811_v22, %v3781_v15  ;;  %v3791_v22 = vmul.f32 %v8039_v30, %v8039_v30 }
 0x43c   : > { %v3813_v13 = vadd.f32 %v3812_v43, %v3782_v37  ;;  %v3792_v43 = vmul.f32 %v8042_v40, %v8042_v40 }
 0x43e   : > { %v3814_v32 = vadd.f32 %v3813_v13, %v3783_v14  ;;  %v3793_v13 = vmul.f32 %v8045_v54, %v8045_v54 }
 0x440   : > { %v3815_v53 = vadd.f32 %v3814_v32, %v3784_v57  ;;  %v3794_v32 = vmul.f32 %v8047_v46, %v8047_v46 }
 0x442   : > { %v3816_v41 = vadd.f32 %v3815_v53, %v3785_v7  ;;  %v3795_v53 = vmul.f32 %v8049_v59, %v8049_v59 }
 0x444   : > { %v3817_v9 = vadd.f32 %v3816_v41, %v3786_v35  ;;  %v3796_v41 = vmul.f32 %v8051_v3, %v8051_v3 }
 0x446   : > { %v3818_v24 = vadd.f32 %v3817_v9, %v3787_v11  ;;  %v3797_v9 = vmul.f32 %v8053_v20, %v8053_v20 }
 0x448   : > { %v3819_v28 = vadd.f32 %v3818_v24, %v3788_v1  ;;  %v3798_v24 = vmul.f32 %v8055_v26, %v8055_v26 }
 0x44a   : > { %v3820_v15 = vadd.f32 %v3819_v28, %v3789_v19  ;;  %v3799_v28 = vmul.f32 %v8057_v25, %v8057_v25 }
 0x44c   : > { %v3821_v37 = vadd.f32 %v3820_v15, %v3790_v44  ;;  %v3800_v15 = vmul.f32 %v8059_v58, %v8059_v58 }
 0x44e   : > { %v3822_v14 = vadd.f32 %v3821_v37, %v3791_v22  ;;  %v3801_v37 = vmul.f32 %v8061_v36, %v8061_v36 }
 0x450   : > { %v3823_v57 = vadd.f32 %v3822_v14, %v3792_v43  ;;  %v3802_v14 = vmul.f32 %v8063_v31, %v8063_v31 }
 0x452   : > { %v3824_v7 = vadd.f32 %v3823_v57, %v3793_v13  ;;  %v3803_v57 = vmul.f32 %v8065_v21, %v8065_v21 }
 0x454   : > { %v3825_v35 = vadd.f32 %v3824_v7, %v3794_v32  ;;  %v3804_v7 = vmul.f32 %v8067_v39, %v8067_v39 }
 0x456   : > { %v3826_v11 = vadd.f32 %v3825_v35, %v3795_v53  ;;  %v3805_v35 = vmul.f32 %v8069_v62, %v8069_v62 }
 0x458   : > { %v3827_v1 = vadd.f32 %v3826_v11, %v3796_v41 }
 0x45a   : > { %v3828_v19 = vadd.f32 %v3827_v1, %v3797_v9 }
 0x45c   : > { %v3829_v44 = vadd.f32 %v3828_v19, %v3798_v24 }
 0x45e   : > { %v3830_v22 = vadd.f32 %v3829_v44, %v3799_v28 }
 0x460   : > { %v3831_v43 = vadd.f32 %v3830_v22, %v3800_v15 }
 0x462   : > { %v3832_v13 = vadd.f32 %v3831_v43, %v3801_v37  ;;  %v4199_v37 = vld [vmem:[%s8597_s4 + $0x6] ss:$0 sm:$0xff] }
 0x463   : > { %v8163_v43 = vadd.f32 %v7562_v52, %v4199_v37  ;;  %v8184_v52 = vadd.f32 %v4199_v37, %v7612_v5  ;;  %v8753_v5 = vld [vmem:[#allocation7_spill] sm:$0xff] }
 0x464   : > { %v3833_v32 = vadd.f32 %v3832_v13, %v3802_v14  ;;  %v8166_v14 = vadd.f32 %v4199_v37, %v7579_v38  ;;  %v8169_v13 = vadd.f32 %v7584_v16, %v4199_v37  ;;  %v8187_v38 = vadd.f32 %v7617_v45, %v4199_v37  ;;  %v8755_v45 = vld [vmem:[#allocation8_spill] sm:$0xff] }
 0x465   : > { %v8190_v16 = vadd.f32 %v4199_v37, %v7625_v27  ;;  %v8757_v27 = vld [vmem:[#allocation9_spill] sm:$0xff] }
 0x466   : > { %v3834_v53 = vadd.f32 %v3833_v32, %v3803_v57  ;;  %v8172_v57 = vadd.f32 %v4199_v37, %v7589_v61  ;;  %v8175_v32 = vadd.f32 %v7594_v2, %v4199_v37  ;;  %8748 = vst [vmem:[#allocation3_spill] sm:$0xff] %v8187_v38  ;;  %v8193_v61 = vadd.f32 %v7630_v0, %v4199_v37  ;;  %v8759_v0 = vld [vmem:[#allocation10_spill] sm:$0xff] }
 0x467   : > { %v8196_v2 = vadd.f32 %v4199_v37, %v7638_v23  ;;  %v8761_v23 = vld [vmem:[#allocation12_spill] sm:$0xff] }
 0x468   : > { %v3835_v41 = vadd.f32 %v3834_v53, %v3804_v7  ;;  %v8178_v7 = vadd.f32 %v4199_v37, %v7602_v56  ;;  %v8181_v53 = vadd.f32 %v7607_v50, %v4199_v37  ;;  %8749 = vst [vmem:[#allocation5_spill] sm:$0xff] %v8193_v61  ;;  %v8199_v56 = vadd.f32 %v7643_v29, %v4199_v37  ;;  %v8751_v50 = vld [vmem:[#allocation11_spill] sm:$0xff]  ;;  %v8763_v29 = vld [vmem:[#allocation13_spill] sm:$0xff] }
 0x46a   : > { %v3836_v11 = vadd.f32 %v3835_v41, %v3805_v35  ;;  %8750 = vst [vmem:[#allocation6_spill] sm:$0xff] %v8199_v56  ;;  %v8202_v35 = vadd.f32 %v4199_v37, %v8751_v50  ;;  %v8205_v41 = vadd.f32 %v8753_v5, %v4199_v37  ;;  %v8769_v50 = vld [vmem:[#allocation14_spill] sm:$0xff] }
 0x46b   : > { %v8229_v5 = vadd.f32 %v8769_v50, %v4199_v37  ;;  %v8783_v50 = vld [vmem:[#allocation21_spill] sm:$0xff] }
 0x46c   : > { %v3837_v9 = vrot.slane %v3836_v11, 4  ;;  %8752 = vst [vmem:[#allocation11_spill] sm:$0xff] %v8202_v35  ;;  %8754 = vst [vmem:[#allocation7_spill] sm:$0xff] %v8205_v41 }
 0x46d   : > { %8770 = vst [vmem:[#allocation14_spill] sm:$0xff] %v8229_v5  ;;  %v8250_v5 = vadd.f32 %v4199_v37, %v8783_v50 }
 0x46e   : > { %v3838_v1 = vadd.f32 %v3837_v9, %v3836_v11  ;;  %v8208_v11 = vadd.f32 %v4199_v37, %v8755_v45  ;;  %v8211_v9 = vadd.f32 %v8757_v27, %v4199_v37  ;;  %v8771_v45 = vld [vmem:[#allocation15_spill] sm:$0xff] }
 0x46f   : > { %v8232_v27 = vadd.f32 %v4199_v37, %v8771_v45  ;;  %8784 = vst [vmem:[#allocation21_spill] sm:$0xff] %v8250_v5  ;;  %v8785_v45 = vld [vmem:[#allocation22_spill] sm:$0xff] }
 0x470   : > { %v3839_v24 = vrot.slane %v3838_v1, 2  ;;  %8756 = vst [vmem:[#allocation8_spill] sm:$0xff] %v8208_v11  ;;  %8758 = vst [vmem:[#allocation9_spill] sm:$0xff] %v8211_v9 }
 0x471   : > { %8772 = vst [vmem:[#allocation15_spill] sm:$0xff] %v8232_v27  ;;  %v8253_v27 = vadd.f32 %v8785_v45, %v4199_v37 }
 0x472   : > { %v3840_v19 = vadd.f32 %v3839_v24, %v3838_v1  ;;  %v8214_v1 = vadd.f32 %v4199_v37, %v8759_v0  ;;  %v8217_v24 = vadd.f32 %v8761_v23, %v4199_v37  ;;  %v8773_v0 = vld [vmem:[#allocation16_spill] sm:$0xff]  ;;  %v8775_v23 = vld [vmem:[#allocation17_spill] sm:$0xff] }
 0x473   : > { %v8235_v9 = vadd.f32 %v8773_v0, %v4199_v37  ;;  %8786 = vst [vmem:[#allocation22_spill] sm:$0xff] %v8253_v27  ;;  %v8787_v0 = vld [vmem:[#allocation23_spill] sm:$0xff] }
 0x474   : > { %v3841_v28 = vrot.slane %v3840_v19, 1  ;;  %8760 = vst [vmem:[#allocation10_spill] sm:$0xff] %v8214_v1  ;;  %8762 = vst [vmem:[#allocation12_spill] sm:$0xff] %v8217_v24  ;;  %v8238_v24 = vadd.f32 %v4199_v37, %v8775_v23 }
 0x475   : > { %8774 = vst [vmem:[#allocation16_spill] sm:$0xff] %v8235_v9  ;;  %v8256_v9 = vadd.f32 %v4199_v37, %v8787_v0 }
 0x476   : > { %v3842_v44 = vadd.f32 %v3841_v28, %v3840_v19  ;;  %v8220_v19 = vadd.f32 %v4199_v37, %v8763_v29  ;;  %v8765_v28 = vld [vmem:[#allocation2_spill] sm:$0xff]  ;;  %8776 = vst [vmem:[#allocation17_spill] sm:$0xff] %v8238_v24 }
 0x477   : > { %v8777_v29 = vld [vmem:[#allocation18_spill] sm:$0xff]  ;;  %8788 = vst [vmem:[#allocation23_spill] sm:$0xff] %v8256_v9 }
 0x478   : > { %v3843_v15 = vmul.f32 0.00390625, %v3842_v44  ;;  %8764 = vst [vmem:[#allocation13_spill] sm:$0xff] %v8220_v19  ;;  %v8223_v44 = vadd.f32 %v8765_v28, %v4199_v37  ;;  %v8241_v19 = vadd.f32 %v8777_v29, %v4199_v37  ;;  %v8779_v28 = vld [vmem:[#allocation19_spill] sm:$0xff] }
 0x47a   : > { %v3844_v22 = vadd.f32 1e-05, %v3843_v15  ;;  %8766 = vst [vmem:[#allocation2_spill] sm:$0xff] %v8223_v44  ;;  %v8767_v15 = vld [vmem:[#allocation4_spill] sm:$0xff]  ;;  %8778 = vst [vmem:[#allocation18_spill] sm:$0xff] %v8241_v19  ;;  %v8244_v44 = vadd.f32 %v4199_v37, %v8779_v28 }
 0x47c   : > { %5873 = vrsqrt.f32 %v3844_v22  ;;  %v8226_v22 = vadd.f32 %v4199_v37, %v8767_v15  ;;  %8780 = vst [vmem:[#allocation19_spill] sm:$0xff] %v8244_v44 }
 0x47e   : > { %8768 = vst [vmem:[#allocation4_spill] sm:$0xff] %v8226_v22  ;;  %v8781_v22 = vld [vmem:[#allocation20_spill] sm:$0xff] }
 0x47f   : > { %v8247_v1 = vadd.f32 %v8781_v22, %v4199_v37 }
 0x481   : > { %8782 = vst [vmem:[#allocation20_spill] sm:$0xff] %v8247_v1 }
 0x486   : > { %v5874_v15 = vpop.eup %5873 }
 0x487   : > { %v3846_v23 = vmul.f32 %v5874_v15, %v8072_v18  ;;  %v3847_v29 = vmul.f32 %v5874_v15, %v8075_v34  ;;  %v3848_v28 = vmul.f32 %v5874_v15, %v8078_v49  ;;  %v3849_v19 = vmul.f32 %v5874_v15, %v8085_v63 }
 0x488   : > { %v3850_v22 = vmul.f32 %v5874_v15, %v8088_v47  ;;  %v3851_v1 = vmul.f32 %v5874_v15, %v8093_v55  ;;  %v3852_v50 = vmul.f32 %v5874_v15, %v8098_v60  ;;  %v3853_v45 = vmul.f32 %v5874_v15, %v8103_v8 }
 0x489   : > { %v3854_v27 = vmul.f32 %v5874_v15, %v8012_v6  ;;  %v3855_v37 = vmul.f32 %v5874_v15, %v8015_v48  ;;  %v3856_v18 = vmul.f32 %v5874_v15, %v8018_v10  ;;  %v3857_v34 = vmul.f32 %v5874_v15, %v8021_v4  ;;  %v4687_v10 = vld [vmem:[%s8597_s4 + $0x4] ss:$0 sm:$0xff] }
 0x48a   : > { %v3858_v49 = vmul.f32 %v5874_v15, %v8024_v51  ;;  %v3859_v63 = vmul.f32 %v5874_v15, %v8027_v17  ;;  %v3860_v47 = vmul.f32 %v5874_v15, %v8030_v12  ;;  %v3861_v55 = vmul.f32 %v5874_v15, %v8033_v33 }
 0x48b   : > { %v3862_v60 = vmul.f32 %v5874_v15, %v8036_v42  ;;  %v3863_v8 = vmul.f32 %v5874_v15, %v8039_v30  ;;  %v3864_v6 = vmul.f32 %v5874_v15, %v8042_v40  ;;  %v3865_v48 = vmul.f32 %v5874_v15, %v8045_v54 }
 0x48c   : > { %v3866_v4 = vmul.f32 %v5874_v15, %v8047_v46  ;;  %v3867_v51 = vmul.f32 %v5874_v15, %v8049_v59  ;;  %v3868_v17 = vmul.f32 %v5874_v15, %v8051_v3  ;;  %v3869_v12 = vmul.f32 %v5874_v15, %v8053_v20 }
 0x48d   : > { %v3870_v33 = vmul.f32 %v5874_v15, %v8055_v26  ;;  %v3871_v42 = vmul.f32 %v5874_v15, %v8057_v25  ;;  %v3872_v30 = vmul.f32 %v5874_v15, %v8059_v58  ;;  %v3873_v40 = vmul.f32 %v5874_v15, %v8061_v36 }
 0x48e   : > { %v3874_v54 = vmul.f32 %v5874_v15, %v8063_v31  ;;  %v3875_v0 = vmul.f32 %v5874_v15, %v8065_v21  ;;  %v3876_v46 = vmul.f32 %v5874_v15, %v8067_v39  ;;  %v3877_v59 = vmul.f32 %v5874_v15, %v8069_v62 }
 0x48f   : > { %v3882_v9 = vmul.f32 %v4687_v10, %v3846_v23  ;;  %v3883_v3 = vmul.f32 %v4687_v10, %v3847_v29  ;;  %v3884_v5 = vmul.f32 %v4687_v10, %v3848_v28  ;;  %v3885_v20 = vmul.f32 %v4687_v10, %v3849_v19  ;;  %v4688_v19 = vld [vmem:[%s8597_s4 + $0x5] ss:$0 sm:$0xff] }
 0x490   : > { %v3886_v44 = vmul.f32 %v4687_v10, %v3850_v22  ;;  %v3887_v26 = vmul.f32 %v4687_v10, %v3851_v1  ;;  %v3888_v24 = vmul.f32 %v4687_v10, %v3852_v50  ;;  %v3889_v25 = vmul.f32 %v4687_v10, %v3853_v45 }
 0x491   : > { %v3890_v41 = vmul.f32 %v4687_v10, %v3854_v27  ;;  %v3891_v58 = vmul.f32 %v4687_v10, %v3855_v37  ;;  %v3892_v56 = vmul.f32 %v4687_v10, %v3856_v18  ;;  %v3893_v36 = vmul.f32 %v4687_v10, %v3857_v34 }
 0x492   : > { %v3894_v11 = vmul.f32 %v4687_v10, %v3858_v49  ;;  %v3895_v31 = vmul.f32 %v4687_v10, %v3859_v63  ;;  %v3896_v35 = vmul.f32 %v4687_v10, %v3860_v47  ;;  %v3897_v21 = vmul.f32 %v4687_v10, %v3861_v55 }
 0x493   : > { %v3898_v61 = vmul.f32 %v4687_v10, %v3862_v60  ;;  %v3899_v39 = vmul.f32 %v4687_v10, %v3863_v8  ;;  %v3900_v38 = vmul.f32 %v4687_v10, %v3864_v6  ;;  %v3901_v62 = vmul.f32 %v4687_v10, %v3865_v48 }
 0x494   : > { %v3902_v15 = vmul.f32 %v4687_v10, %v3866_v4  ;;  %v3903_v1 = vmul.f32 %v4687_v10, %v3867_v51  ;;  %v3904_v23 = vmul.f32 %v4687_v10, %v3868_v17  ;;  %v3905_v29 = vmul.f32 %v4687_v10, %v3869_v12 }
 0x495   : > { %v3906_v27 = vmul.f32 %v4687_v10, %v3870_v33  ;;  %v3907_v28 = vmul.f32 %v4687_v10, %v3871_v42  ;;  %v3908_v22 = vmul.f32 %v4687_v10, %v3872_v30  ;;  %v3909_v50 = vmul.f32 %v4687_v10, %v3873_v40 }
 0x496   : > { %v3910_v45 = vmul.f32 %v4687_v10, %v3874_v54  ;;  %v3911_v37 = vmul.f32 %v4687_v10, %v3875_v0  ;;  %v3912_v18 = vmul.f32 %v4687_v10, %v3876_v46  ;;  %v3913_v34 = vmul.f32 %v4687_v10, %v3877_v59 }
 0x497   : > { %v3918_v49 = vadd.f32 %v4688_v19, %v3882_v9  ;;  %v3919_v63 = vadd.f32 %v4688_v19, %v3883_v3  ;;  %v3920_v47 = vadd.f32 %v4688_v19, %v3884_v5  ;;  %v3921_v55 = vadd.f32 %v4688_v19, %v3885_v20 }
 0x498   : > { %v3922_v60 = vadd.f32 %v4688_v19, %v3886_v44  ;;  %v3923_v8 = vadd.f32 %v4688_v19, %v3887_v26  ;;  %v3924_v6 = vadd.f32 %v4688_v19, %v3888_v24  ;;  %v3925_v48 = vadd.f32 %v4688_v19, %v3889_v25 }
 0x499   : > { %v3926_v4 = vadd.f32 %v4688_v19, %v3890_v41  ;;  %v3927_v51 = vadd.f32 %v4688_v19, %v3891_v58  ;;  %v3928_v17 = vadd.f32 %v4688_v19, %v3892_v56  ;;  %v3929_v12 = vadd.f32 %v4688_v19, %v3893_v36 }
 0x49a   : > { %v3930_v33 = vadd.f32 %v4688_v19, %v3894_v11  ;;  %v3931_v42 = vadd.f32 %v4688_v19, %v3895_v31  ;;  %v3932_v30 = vadd.f32 %v4688_v19, %v3896_v35  ;;  %v3933_v40 = vadd.f32 %v4688_v19, %v3897_v21 }
 0x49b   : > { %v3934_v54 = vadd.f32 %v4688_v19, %v3898_v61  ;;  %v3935_v0 = vadd.f32 %v4688_v19, %v3899_v39  ;;  %v3936_v46 = vadd.f32 %v4688_v19, %v3900_v38  ;;  %v3937_v10 = vadd.f32 %v4688_v19, %v3901_v62 }
 0x49c   : > { %v3938_v9 = vadd.f32 %v4688_v19, %v3902_v15  ;;  %v3939_v59 = vadd.f32 %v4688_v19, %v3903_v1  ;;  %v3940_v5 = vadd.f32 %v4688_v19, %v3904_v23  ;;  %v3941_v3 = vadd.f32 %v4688_v19, %v3905_v29 }
 0x49d   : > { %v3942_v44 = vadd.f32 %v4688_v19, %v3906_v27  ;;  %v3943_v20 = vadd.f32 %v4688_v19, %v3907_v28  ;;  %v3944_v24 = vadd.f32 %v4688_v19, %v3908_v22  ;;  %v3945_v26 = vadd.f32 %v4688_v19, %v3909_v50  ;;  %v8796_v27 = vld [vmem:[#allocation13_spill] sm:$0xff] }
 0x49e   : > { %v3946_v41 = vadd.f32 %v4688_v19, %v3910_v45  ;;  %v3947_v25 = vadd.f32 %v4688_v19, %v3911_v37  ;;  %v3948_v56 = vadd.f32 %v4688_v19, %v3912_v18  ;;  %v3949_v58 = vadd.f32 %v4688_v19, %v3913_v34  ;;  %v8797_v22 = vld [vmem:[#allocation9_spill] sm:$0xff]  ;;  %v8798_v45 = vld [vmem:[#allocation12_spill] sm:$0xff] }
 0x49f   : > { %v8297_v11 = vadd.f32 %v3918_v49, %v8166_v14  ;;  %v8300_v61 = vadd.f32 %v3919_v63, %v8172_v57  ;;  %v8303_v38 = vadd.f32 %v3920_v47, %v8163_v43  ;;  %v8306_v35 = vadd.f32 %v3921_v55, %v8169_v13  ;;  %v8789_v13 = vld [vmem:[#allocation3_spill] sm:$0xff]  ;;  %v8799_v18 = vld [vmem:[#allocation4_spill] sm:$0xff]  ;;  %v8801_v47 = vld [vmem:[#allocation2_spill] sm:$0xff] }
 0x4a0   : > { %v8309_v36 = vadd.f32 %v3922_v60, %v8178_v7  ;;  %v8312_v31 = vadd.f32 %v3923_v8, %v8184_v52  ;;  %v8315_v21 = vadd.f32 %v3924_v6, %v8175_v32  ;;  %v8318_v14 = vadd.f32 %v3925_v48, %v8181_v53  ;;  %v8790_v7 = vld [vmem:[#allocation5_spill] sm:$0xff]  ;;  %v8791_v52 = vld [vmem:[#allocation11_spill] sm:$0xff]  ;;  %v8792_v32 = vld [vmem:[#allocation8_spill] sm:$0xff] }
 0x4a1   : > { %v8321_v57 = vadd.f32 %v3926_v4, %v8190_v16  ;;  %v8324_v43 = vadd.f32 %v3927_v51, %v8196_v2  ;;  %v8327_v39 = vadd.f32 %v3928_v17, %v8789_v13  ;;  %v8330_v62 = vadd.f32 %v3929_v12, %v8790_v7  ;;  %v8793_v53 = vld [vmem:[#allocation6_spill] sm:$0xff]  ;;  %v8794_v16 = vld [vmem:[#allocation7_spill] sm:$0xff]  ;;  %v8803_v6 = vld [vmem:[#allocation17_spill] sm:$0xff] }
 0x4a2   : > { %v8333_v19 = vadd.f32 %v3930_v33, %v8791_v52  ;;  %v8336_v15 = vadd.f32 %v3931_v42, %v8792_v32  ;;  %v8339_v1 = vadd.f32 %v3932_v30, %v8793_v53  ;;  %v8342_v23 = vadd.f32 %v3933_v40, %v8794_v16  ;;  %v8795_v2 = vld [vmem:[#allocation10_spill] sm:$0xff]  ;;  %v8800_v49 = vld [vmem:[#allocation15_spill] sm:$0xff]  ;;  %v8805_v17 = vld [vmem:[#allocation16_spill] sm:$0xff] }
 0x4a3   : > { %v8345_v29 = vadd.f32 %v3934_v54, %v8795_v2  ;;  %v8348_v28 = vadd.f32 %v3935_v0, %v8796_v27  ;;  %v8351_v50 = vadd.f32 %v3936_v46, %v8797_v22  ;;  %v8354_v37 = vadd.f32 %v3937_v10, %v8798_v45  ;;  %v8802_v60 = vld [vmem:[#allocation14_spill] sm:$0xff]  ;;  %v8804_v4 = vld [vmem:[#allocation19_spill] sm:$0xff]  ;;  %v8807_v30 = vld [vmem:[#allocation21_spill] sm:$0xff] }
 0x4a4   : > { %v8357_v34 = vadd.f32 %v3938_v9, %v8799_v18  ;;  %v8360_v63 = vadd.f32 %v3939_v59, %v8800_v49  ;;  %v8363_v55 = vadd.f32 %v3940_v5, %v8801_v47  ;;  %v8366_v8 = vadd.f32 %v3941_v3, %v8802_v60  ;;  %v8806_v33 = vld [vmem:[#allocation18_spill] sm:$0xff]  ;;  %v8808_v54 = vld [vmem:[#allocation23_spill] sm:$0xff]  ;;  %v8809_v46 = vld [vmem:[#allocation20_spill] sm:$0xff] }
 0x4a5   : > { %v8369_v48 = vadd.f32 %v3942_v44, %v8803_v6  ;;  %v8372_v51 = vadd.f32 %v3943_v20, %v8804_v4  ;;  %v8375_v12 = vadd.f32 %v3944_v24, %v8805_v17  ;;  %v8378_v42 = vadd.f32 %v3945_v26, %v8806_v33  ;;  %v8810_v9 = vld [vmem:[#allocation22_spill] sm:$0xff] }
 0x4a6   : > { %v8381_v40 = vadd.f32 %v3946_v41, %v8807_v30  ;;  %v8384_v0 = vadd.f32 %v3947_v25, %v8808_v54  ;;  %v8387_v10 = vadd.f32 %v3948_v56, %v8809_v46  ;;  %v8390_v59 = vadd.f32 %v3949_v58, %v8810_v9 }
 0x4a7   : > { %vm3982_vm2 = vcmp.ge.f32.partialorder %v8297_v11, 0.0  ;;  %vm3983_vm7 = vcmp.ge.f32.partialorder %v8300_v61, 0.0  ;;  %vm3984_vm13 = vcmp.ge.f32.partialorder %v8303_v38, 0.0  ;;  %vm3985_vm3 = vcmp.ge.f32.partialorder %v8306_v35, 0.0 }
 0x4a8   : > { %vm3986_vm14 = vcmp.ge.f32.partialorder %v8309_v36, 0.0  ;;  %vm3987_vm15 = vcmp.ge.f32.partialorder %v8312_v31, 0.0  ;;  %vm3988_vm0 = vcmp.ge.f32.partialorder %v8315_v21, 0.0  ;;  %vm3989_vm1 = vcmp.ge.f32.partialorder %v8318_v14, 0.0 }
 0x4a9   : > { %vm3990_vm4 = vcmp.ge.f32.partialorder %v8321_v57, 0.0  ;;  %v4014_v5 = vmul.f32 0.01, %v8297_v11  ;;  %v4015_v3 = vmul.f32 0.01, %v8300_v61  ;;  %vm3997_vm12 = vcmp.ge.f32.partialorder %v8342_v23, 0.0 }
 0x4aa   : > { %v4016_v44 = vmul.f32 0.01, %v8303_v38  ;;  %vm3998_vm5 = vcmp.ge.f32.partialorder %v8345_v29, 0.0  ;;  %v4017_v20 = vmul.f32 0.01, %v8306_v35  ;;  %vm4003_vm11 = vcmp.ge.f32.partialorder %v8360_v63, 0.0 }
 0x4ab   : > { %v4018_v24 = vmul.f32 0.01, %v8309_v36  ;;  %v4019_v26 = vmul.f32 0.01, %v8312_v31  ;;  %v4020_v41 = vmul.f32 0.01, %v8315_v21  ;;  %v4046_v58 = vsel %vm3982_vm2, %v8297_v11, %v4014_v5 }
 0x4ac   : > { %v4021_v25 = vmul.f32 0.01, %v8318_v14  ;;  %v4022_v56 = vmul.f32 0.01, %v8321_v57  ;;  %vm4004_vm6 = vcmp.ge.f32.partialorder %v8363_v55, 0.0  ;;  %v4047_v32 = vsel %vm3983_vm7, %v8300_v61, %v4015_v3  ;;  %4078 = vst [vmem:[%s8406_s25] sm:$0xff] %v4046_v58 }
 0x4ad   : > { %v4023_v13 = vmul.f32 0.01, %v8324_v43  ;;  %v4024_v7 = vmul.f32 0.01, %v8327_v39  ;;  %v4025_v52 = vmul.f32 0.01, %v8330_v62  ;;  %v4048_v61 = vsel %vm3984_vm13, %v8303_v38, %v4016_v44 }
 0x4ae   : > { %vm4008_vm2 = vcmp.ge.f32.partialorder %v8375_v12, 0.0  ;;  %vm4010_vm9 = vcmp.ge.f32.partialorder %v8381_v40, 0.0  ;;  %vm4011_vm8 = vcmp.ge.f32.partialorder %v8384_v0, 0.0  ;;  %v4026_v11 = vmul.f32 0.01, %v8333_v19  ;;  %4079 = vst [vmem:[%s8406_s25 + $0x8] sm:$0xff] %v4047_v32 }
 0x4af   : > { %v4027_v53 = vmul.f32 0.01, %v8336_v15  ;;  %v4028_v16 = vmul.f32 0.01, %v8339_v1  ;;  %vm4012_vm7 = vcmp.ge.f32.partialorder %v8387_v10, 0.0  ;;  %vm4013_vm10 = vcmp.ge.f32.partialorder %v8390_v59, 0.0 }
 0x4b0   : > { %v4029_v2 = vmul.f32 0.01, %v8342_v23  ;;  %v4030_v27 = vmul.f32 0.01, %v8345_v29  ;;  %v4031_v22 = vmul.f32 0.01, %v8348_v28  ;;  %v4049_v45 = vsel %vm3985_vm3, %v8306_v35, %v4017_v20 }
 0x4b1   : > { %4080 = vst [vmem:[%s8406_s25 + $0x10] sm:$0xff] %v4048_v61  ;;  %v4032_v38 = vmul.f32 0.01, %v8351_v50  ;;  %v4033_v18 = vmul.f32 0.01, %v8354_v37  ;;  %v4050_v47 = vsel %vm3986_vm14, %v8309_v36, %v4018_v24  ;;  %4081 = vst [vmem:[%s8406_s25 + $0x18] sm:$0xff] %v4049_v45  ;;  %v4051_v4 = vsel %vm3987_vm15, %v8312_v31, %v4019_v26 }
 0x4b2   : > { %v4034_v49 = vmul.f32 0.01, %v8357_v34  ;;  %v4035_v60 = vmul.f32 0.01, %v8360_v63  ;;  %v4036_v6 = vmul.f32 0.01, %v8363_v55  ;;  %v4052_v30 = vsel %vm3988_vm0, %v8315_v21, %v4020_v41 }
 0x4b3   : > { %v4037_v35 = vmul.f32 0.01, %v8366_v8  ;;  %4082 = vst [vmem:[%s8406_s25 + $0x20] sm:$0xff] %v4050_v47  ;;  %v4038_v17 = vmul.f32 0.01, %v8369_v48  ;;  %4083 = vst [vmem:[%s8406_s25 + $0x28] sm:$0xff] %v4051_v4  ;;  %v4053_v9 = vsel %vm3989_vm1, %v8318_v14, %v4021_v25  ;;  %v4054_v3 = vsel %vm3990_vm4, %v8321_v57, %v4022_v56 }
 0x4b4   : > { %v4039_v33 = vmul.f32 0.01, %v8372_v51  ;;  %v4040_v36 = vmul.f32 0.01, %v8375_v12  ;;  %v4041_v54 = vmul.f32 0.01, %v8378_v42 }
 0x4b5   : > { %v4042_v46 = vmul.f32 0.01, %v8381_v40  ;;  %v4043_v31 = vmul.f32 0.01, %v8384_v0  ;;  %4084 = vst [vmem:[%s8406_s25 + $0x30] sm:$0xff] %v4052_v30  ;;  %vm8811_vm13 = vcmp.ge.f32.partialorder %v8324_v43, 0.0 }
 0x4b6   : > { %v4044_v5 = vmul.f32 0.01, %v8387_v10  ;;  %v4045_v21 = vmul.f32 0.01, %v8390_v59  ;;  %v4055_v44 = vsel %vm8811_vm13, %v8324_v43, %v4023_v13  ;;  %4085 = vst [vmem:[%s8406_s25 + $0x38] sm:$0xff] %v4053_v9  ;;  %vm8812_vm3 = vcmp.ge.f32.partialorder %v8327_v39, 0.0 }
 0x4b7   : > { %v4056_v14 = vsel %vm8812_vm3, %v8327_v39, %v4024_v7  ;;  %vm8813_vm14 = vcmp.ge.f32.partialorder %v8330_v62, 0.0  ;;  %vm8814_vm15 = vcmp.ge.f32.partialorder %v8333_v19, 0.0  ;;  %vm8815_vm0 = vcmp.ge.f32.partialorder %v8336_v15, 0.0  ;;  %4086 = vst [vmem:[%s8406_s25 + $0x40] sm:$0xff] %v4054_v3  ;;  %4087 = vst [vmem:[%s8406_s25 + $0x48] sm:$0xff] %v4055_v44 }
 0x4b8   : > { %v4057_v20 = vsel %vm8813_vm14, %v8330_v62, %v4025_v52  ;;  %v4058_v24 = vsel %vm8814_vm15, %v8333_v19, %v4026_v11  ;;  %v4059_v57 = vsel %vm8815_vm0, %v8336_v15, %v4027_v53  ;;  %vm8816_vm1 = vcmp.ge.f32.partialorder %v8339_v1, 0.0  ;;  %4088 = vst [vmem:[%s8406_s25 + $0x50] sm:$0xff] %v4056_v14 }
 0x4b9   : > { %v4060_v43 = vsel %vm8816_vm1, %v8339_v1, %v4028_v16  ;;  %v4061_v39 = vsel %vm3997_vm12, %v8342_v23, %v4029_v2  ;;  %v4062_v62 = vsel %vm3998_vm5, %v8345_v29, %v4030_v27  ;;  %vm8817_vm4 = vcmp.ge.f32.partialorder %v8348_v28, 0.0  ;;  %4089 = vst [vmem:[%s8406_s25 + $0x58] sm:$0xff] %v4057_v20  ;;  %4090 = vst [vmem:[%s8406_s25 + $0x60] sm:$0xff] %v4058_v24 }
 0x4ba   : > { %v4063_v19 = vsel %vm8817_vm4, %v8348_v28, %v4031_v22  ;;  %4091 = vst [vmem:[%s8406_s25 + $0x68] sm:$0xff] %v4059_v57  ;;  %vm8818_vm13 = vcmp.ge.f32.partialorder %v8351_v50, 0.0  ;;  %vm8819_vm12 = vcmp.ge.f32.partialorder %v8354_v37, 0.0  ;;  %vm8820_vm5 = vcmp.ge.f32.partialorder %v8357_v34, 0.0  ;;  %4092 = vst [vmem:[%s8406_s25 + $0x70] sm:$0xff] %v4060_v43 }
 0x4bb   : > { %v4064_v15 = vsel %vm8818_vm13, %v8351_v50, %v4032_v38  ;;  %v4065_v1 = vsel %vm8819_vm12, %v8354_v37, %v4033_v18  ;;  %v4066_v23 = vsel %vm8820_vm5, %v8357_v34, %v4034_v49  ;;  %v4067_v29 = vsel %vm4003_vm11, %v8360_v63, %v4035_v60  ;;  %4093 = vst [vmem:[%s8406_s25 + $0x78] sm:$0xff] %v4061_v39 }
 0x4bc   : > { %4094 = vst [vmem:[%s8406_s25 + $0x80] sm:$0xff] %v4062_v62  ;;  %4095 = vst [vmem:[%s8406_s25 + $0x88] sm:$0xff] %v4063_v19  ;;  %v4068_v28 = vsel %vm4004_vm6, %v8363_v55, %v4036_v6  ;;  %vm8821_vm3 = vcmp.ge.f32.partialorder %v8366_v8, 0.0  ;;  %vm8822_vm14 = vcmp.ge.f32.partialorder %v8369_v48, 0.0  ;;  %vm8823_vm11 = vcmp.ge.f32.partialorder %v8372_v51, 0.0 }
 0x4bd   : > { %v4069_v50 = vsel %vm8821_vm3, %v8366_v8, %v4037_v35  ;;  %v4070_v37 = vsel %vm8822_vm14, %v8369_v48, %v4038_v17  ;;  %v4071_v34 = vsel %vm8823_vm11, %v8372_v51, %v4039_v33  ;;  %4096 = vst [vmem:[%s8406_s25 + $0x90] sm:$0xff] %v4064_v15  ;;  %4097 = vst [vmem:[%s8406_s25 + $0x98] sm:$0xff] %v4065_v1  ;;  %vm8824_vm6 = vcmp.ge.f32.partialorder %v8378_v42, 0.0 }
 0x4be   : > { %4098 = vst [vmem:[%s8406_s25 + $0xa0] sm:$0xff] %v4066_v23  ;;  %4099 = vst [vmem:[%s8406_s25 + $0xa8] sm:$0xff] %v4067_v29  ;;  %v4072_v63 = vsel %vm4008_vm2, %v8375_v12, %v4040_v36  ;;  %v4073_v55 = vsel %vm8824_vm6, %v8378_v42, %v4041_v54  ;;  %v4074_v8 = vsel %vm4010_vm9, %v8381_v40, %v4042_v46 }
 0x4bf   : > { %v4075_v48 = vsel %vm4011_vm8, %v8384_v0, %v4043_v31  ;;  %4100 = vst [vmem:[%s8406_s25 + $0xb0] sm:$0xff] %v4068_v28  ;;  %4101 = vst [vmem:[%s8406_s25 + $0xb8] sm:$0xff] %v4069_v50  ;;  %v4076_v51 = vsel %vm4012_vm7, %v8387_v10, %v4044_v5  ;;  %v4077_v12 = vsel %vm4013_vm10, %v8390_v59, %v4045_v21 }
 0x4c0   : > { %4102 = vst [vmem:[%s8406_s25 + $0xc0] sm:$0xff] %v4070_v37  ;;  %4103 = vst [vmem:[%s8406_s25 + $0xc8] sm:$0xff] %v4071_v34 }
 0x4c1   : > { %4104 = vst [vmem:[%s8406_s25 + $0xd0] sm:$0xff] %v4072_v63  ;;  %4105 = vst [vmem:[%s8406_s25 + $0xd8] sm:$0xff] %v4073_v55 }
 0x4c2   : > { %4106 = vst [vmem:[%s8406_s25 + $0xe0] sm:$0xff] %v4074_v8  ;;  %4107 = vst [vmem:[%s8406_s25 + $0xe8] sm:$0xff] %v4075_v48 }
 0x4c3   : > { %4108 = vst [vmem:[%s8406_s25 + $0xf0] sm:$0xff] %v4076_v51  ;;  %4109 = vst [vmem:[%s8406_s25 + $0xf8] sm:$0xff] %v4077_v12 }
 0x4c4 PF: > { %s15_s18 = sadd.s32 1, %s5889_s18  }
 0x4c5   : > { %p12_p4 = scmp.ge.s32.totalorder %s15_s18, 4  }
 0x4c7   :  { %14 = sbr.rel (!%p12_p4) target bundleno = 1 (0x1), region = 78 }

</bundles_post_ra>
